<compile_context>
chip_gen: v6e
topology: v6e:2x2x1
jax: 0.10.0
libtpu: 0.0.40
codegen_flags: <defaults>
</compile_context>

<pallas_src>
import numpy as np

import jax
import jax.numpy as jnp
from jax.experimental import pallas as pl
from jax.experimental.pallas import tpu as pltpu


_LANE_BLK = 256   # per-kh lane block (>= W*Cin for every layer; lane-dense, MXU friendly)
_KH = 4           # vertical kernel taps


# ---------------------------------------------------------------------------
# Fused kernel: conv1+LeakyReLU, (conv+BN+LeakyReLU) x3, conv5+Sigmoid.
# ---------------------------------------------------------------------------
def _disc_kernel(x_ref,
                 r1, g1,
                 r2, g2, gam2, bet2, p2, pt2,
                 r3, g3_hbm, gam3, bet3, p3, pt3,
                 r4, g4_hbm, gam4, bet4, p4, pt4,
                 w5t, csel,
                 o_ref,
                 scr, g3v, g4v, sem):
    # Prefetch layer-3/4 folded weights from HBM; overlaps with layer-1/2 compute.
    cp3 = pltpu.make_async_copy(g3_hbm, g3v, sem.at[0])
    cp4 = pltpu.make_async_copy(g4_hbm, g4v, sem.at[1])
    cp3.start()
    cp4.start()

    def leaky(v):
        return jnp.where(v >= 0.0, v, 0.2 * v)

    def conv(x_bf, r_ref, g):
        # x_bf: (N*H, 256) bf16;  r_ref: (KH*N*OH, N*H) bf16 0/1 selector;
        # g:    (KH*256, OW*Cout) bf16 banded weights (kw gather + pad + cin folded).
        rows = r_ref.shape[0] // _KH                                   # N*OH
        # 1 MXU op: vertical taps + stride-2 + zero-pad row gather (exact: R is 0/1).
        yall = jnp.dot(r_ref[...], x_bf, preferred_element_type=jnp.float32)
        # Lay the KH row-blocks side by side in lanes (im2row in VMEM scratch).
        for kh in range(_KH):
            scr[0:rows, kh * _LANE_BLK:(kh + 1) * _LANE_BLK] = (
                yall[kh * rows:(kh + 1) * rows, :].astype(jnp.bfloat16))
        # 1 wide MXU op: contraction over (kh, kw, cin) at M = N*OH.
        return jnp.dot(scr[0:rows, :], g, preferred_element_type=jnp.float32)

    def bn_leaky(y, gam_ref, bet_ref, p_ref, pt_ref):
        # y: (N*OH, OW*C) f32 conv output. Batch-stat BN (biased var, eps=1e-5)
        # in f32 using 3 small matmuls, then LeakyReLU(0.2).
        m = y.shape[0]
        c = pt_ref.shape[0]
        ow = pt_ref.shape[1] // c
        inv_n = 1.0 / float(m * ow)
        ones = jnp.ones((1, m), jnp.float32)
        cat = jnp.concatenate([y, y * y], axis=1)                           # (m, 2*OW*C)
        colstats = jnp.dot(ones, cat, preferred_element_type=jnp.float32)   # (1, 2*OW*C)
        stats = jnp.dot(colstats, p_ref[...],
                        preferred_element_type=jnp.float32) * inv_n         # (1, 2C)
        mean = stats[:, :c]
        var = stats[:, c:] - mean * mean
        scale = gam_ref[...] * jax.lax.rsqrt(var + 1e-5)                    # (1, C)
        shift = bet_ref[...] - mean * scale                                 # (1, C)
        ss = jnp.concatenate([scale, shift], axis=0)                        # (2, C)
        sst = jnp.dot(ss, pt_ref[...], preferred_element_type=jnp.float32)  # (2, OW*C)
        return leaky(y * sst[0:1, :] + sst[1:2, :])

    y = leaky(conv(x_ref[...], r1, g1[...]))                                # (N*32, 256)
    y = bn_leaky(conv(y.astype(jnp.bfloat16), r2, g2[...]),
                 gam2, bet2, p2, pt2)                                       # (N*16, 256)
    cp3.wait()
    y = bn_leaky(conv(y.astype(jnp.bfloat16), r3, g3v[...]),
                 gam3, bet3, p3, pt3)                                       # (N*8, 256)
    cp4.wait()
    y = bn_leaky(conv(y.astype(jnp.bfloat16), r4, g4v[...]),
                 gam4, bet4, p4, pt4)                                       # (N*4, 256)
    # conv5 (4x4 valid, Cout=1): VPU multiply + per-image combine + lane sum, sigmoid.
    prod = y * w5t[...]                                                     # (N*4, 256)
    t = jnp.dot(csel[...], prod, preferred_element_type=jnp.float32)        # (N, 256)
    logits = jnp.sum(t, axis=1, keepdims=True)                              # (N, 1)
    o_ref[...] = 1.0 / (1.0 + jnp.exp(-logits))


# ---------------------------------------------------------------------------
# One-time (numpy) lowering of the convs into constant R / Gbig / BN-fold matrices.
# ---------------------------------------------------------------------------
def _row_select_all(N, H, OH, KH, stride, pad):
    # R[kh*N*OH + n*OH + i, n*H + r] = 1  iff  r == stride*i + kh - pad, 0 <= r < H.
    R = np.zeros((KH, N * OH, N * H), np.float32)
    for kh in range(KH):
        for n in range(N):
            for i in range(OH):
                r = stride * i + kh - pad
                if 0 <= r < H:
                    R[kh, n * OH + i, n * H + r] = 1.0
    return R.reshape(KH * N * OH, N * H)


def _col_weight_big(w, W, OW, stride, pad, lane_blk):
    # Gbig[kh*lane_blk + s*Cin + ci, j*Cout + co] = w[co, ci, kh, s - stride*j + pad]
    # (zero when the horizontal tap falls in the padding / outside the image).
    Cout, Cin, KH, KW = w.shape
    assert W * Cin <= lane_blk
    G = np.zeros((KH, lane_blk, OW * Cout), np.float32)
    for kh in range(KH):
        for kw in range(KW):
            for j in range(OW):
                s = stride * j + kw - pad
                if 0 <= s < W:
                    G[kh, s * Cin:(s + 1) * Cin, j * Cout:(j + 1) * Cout] = \
                        w[:, :, kh, kw].T
    return G.reshape(KH * lane_blk, OW * Cout)


def _bn_mats(OW, C):
    P1 = np.tile(np.eye(C, dtype=np.float32), (OW, 1))                 # (OW*C, C)
    Z = np.zeros_like(P1)
    P2 = np.concatenate([np.concatenate([P1, Z], axis=1),
                         np.concatenate([Z, P1], axis=1)], axis=0)     # (2*OW*C, 2C)
    return P2, np.ascontiguousarray(P1.T)                              # PT: (C, OW*C)


def prepare_discriminator_constants(params, batch, image_hw=64):
    """Build all lowering constants once per weight set, off the per-call path."""
    p = {k: np.asarray(v, np.float32) for k, v in params.items()}
    consts = []
    H = W = image_hw
    layer_defs = [("w1", 2, 1, None),
                  ("w2", 2, 1, ("g2", "b2")),
                  ("w3", 2, 1, ("g3", "b3")),
                  ("w4", 2, 1, ("g4", "b4"))]
    for name, stride, pad, bn in layer_defs:
        w = p[name]
        Cout, Cin, KH, KW = w.shape
        OH = (H + 2 * pad - KH) // stride + 1
        OW = (W + 2 * pad - KW) // stride + 1
        consts.append(jnp.asarray(_row_select_all(batch, H, OH, KH, stride, pad),
                                  jnp.bfloat16))
        consts.append(jnp.asarray(_col_weight_big(w, W, OW, stride, pad, _LANE_BLK),
                                  jnp.bfloat16))
        if bn is not None:
            gname, bname = bn
            P2, PT = _bn_mats(OW, Cout)
            consts += [jnp.asarray(p[gname].reshape(1, Cout), jnp.float32),
                       jnp.asarray(p[bname].reshape(1, Cout), jnp.float32),
                       jnp.asarray(P2, jnp.float32),
                       jnp.asarray(PT, jnp.float32)]
        H, W = OH, OW
    # Layer 5: 4x4 valid conv, Cout=1 -> per-image dot product, kept in f32.
    w5 = p["w5"][0]                                                     # (Cin, 4, 4)
    w5_2d = np.transpose(w5, (1, 2, 0)).reshape(4, 4 * w5.shape[0])     # (h, w*ci)
    consts.append(jnp.asarray(np.tile(w5_2d, (batch, 1)), jnp.float32))  # (N*4, 256)
    csel = np.kron(np.eye(batch, dtype=np.float32), np.ones((1, 4), np.float32))
    consts.append(jnp.asarray(csel, jnp.float32))                        # (N, N*4)
    return tuple(consts)


# ---------------------------------------------------------------------------
# Per-call wrapper (jitted): input layout transform + single pallas_call.
# ---------------------------------------------------------------------------
def discriminator_forward(x_nchw, consts):
    N, C0, H0, W0 = x_nchw.shape
    # NCHW -> (N*H, W*C) lane-dense layout, zero-padded to the 256-lane block.
    x2d = jnp.transpose(x_nchw, (0, 2, 3, 1)).reshape(N * H0, W0 * C0)
    x2d = jnp.pad(x2d, ((0, 0), (0, _LANE_BLK - W0 * C0))).astype(jnp.bfloat16)

    # consts order: r1,g1, r2,g2,gam2,bet2,p2,pt2, r3,g3,..., r4,g4,..., w5t,csel
    assert consts[9].shape[0] == _KH * _LANE_BLK     # g3big
    assert consts[15].shape[0] == _KH * _LANE_BLK    # g4big
    n_inputs = 1 + len(consts)
    hbm_idx = (10, 16)   # overall arg indices of g3big / g4big (x is arg 0)
    in_specs = [pl.BlockSpec(memory_space=pl.ANY) if i in hbm_idx
                else pl.BlockSpec(memory_space=pltpu.MemorySpace.VMEM)
                for i in range(n_inputs)]

    out = pl.pallas_call(
        _disc_kernel,
        out_shape=jax.ShapeDtypeStruct((N, 1), jnp.float32),
        in_specs=in_specs,
        out_specs=pl.BlockSpec(memory_space=pltpu.MemorySpace.VMEM),
        scratch_shapes=[
            pltpu.VMEM((N * (H0 // 2), _KH * _LANE_BLK), jnp.bfloat16),  # im2row scratch
            pltpu.VMEM(consts[9].shape, jnp.bfloat16),                   # g3 landing buf
            pltpu.VMEM(consts[15].shape, jnp.bfloat16),                  # g4 landing buf
            pltpu.SemaphoreType.DMA((2,)),
        ],
    )(x2d, *consts)
    return out.reshape(N, 1, 1, 1)


# ---------------------------------------------------------------------------
# Pure-JAX reference (training-mode BN, same semantics as the PyTorch module).
# ---------------------------------------------------------------------------
def reference_forward(x, p):
    dn = ("NCHW", "OIHW", "NCHW")

    def conv(x, w, stride, pad):
        return jax.lax.conv_general_dilated(
            x, w, window_strides=(stride, stride),
            padding=[(pad, pad), (pad, pad)], dimension_numbers=dn,
            precision=jax.lax.Precision.HIGHEST)

    def bn_lrelu(x, g, b):
        mean = jnp.mean(x, axis=(0, 2, 3), keepdims=True)
        var = jnp.mean(jnp.square(x - mean), axis=(0, 2, 3), keepdims=True)
        y = (x - mean) * jax.lax.rsqrt(var + 1e-5) * g.reshape(1, -1, 1, 1) \
            + b.reshape(1, -1, 1, 1)
        return jnp.where(y >= 0.0, y, 0.2 * y)

    y = conv(x, p["w1"], 2, 1)
    y = jnp.where(y >= 0.0, y, 0.2 * y)
    y = bn_lrelu(conv(y, p["w2"], 2, 1), p["g2"], p["b2"])
    y = bn_lrelu(conv(y, p["w3"], 2, 1), p["g3"], p["b3"])
    y = bn_lrelu(conv(y, p["w4"], 2, 1), p["g4"], p["b4"])
    y = conv(y, p["w5"], 1, 0)
    return jax.nn.sigmoid(y)


def init_params(key, nc, ndf):
    ks = jax.random.split(key, 8)
    std = 0.02  # DCGAN init: conv N(0, 0.02); BN gamma N(1, 0.02), beta 0
    return {
        "w1": std * jax.random.normal(ks[0], (ndf, nc, 4, 4), jnp.float32),
        "w2": std * jax.random.normal(ks[1], (ndf * 2, ndf, 4, 4), jnp.float32),
        "w3": std * jax.random.normal(ks[2], (ndf * 4, ndf * 2, 4, 4), jnp.float32),
        "w4": std * jax.random.normal(ks[3], (ndf * 8, ndf * 4, 4, 4), jnp.float32),
        "w5": std * jax.random.normal(ks[4], (1, ndf * 8, 4, 4), jnp.float32),
        "g2": 1.0 + std * jax.random.normal(ks[5], (ndf * 2,), jnp.float32),
        "g3": 1.0 + std * jax.random.normal(ks[6], (ndf * 4,), jnp.float32),
        "g4": 1.0 + std * jax.random.normal(ks[7], (ndf * 8,), jnp.float32),
        "b2": jnp.zeros((ndf * 2,), jnp.float32),
        "b3": jnp.zeros((ndf * 4,), jnp.float32),
        "b4": jnp.zeros((ndf * 8,), jnp.float32),
    }


if __name__ == "__main__":
    nc, ndf = 3, 8
    batch, H, W = 2, 64, 64  # 64x64 input so the final 4x4/s1/p0 conv yields 1x1

    key = jax.random.PRNGKey(0)
    k_x, k_p = jax.random.split(key)
    x = jax.random.normal(k_x, (batch, nc, H, W), jnp.float32)  # NCHW, like PyTorch
    params = init_params(k_p, nc, ndf)

    # One-time constant folding (numpy, off the jitted hot path).
    consts = prepare_discriminator_constants(params, batch, image_hw=H)

    fwd = jax.jit(discriminator_forward)
    out = jax.block_until_ready(fwd(x, consts))
    assert out.shape == (batch, 1, 1, 1), out.shape

    ref = jax.block_until_ready(jax.jit(reference_forward)(x, params))
    max_err = float(jnp.max(jnp.abs(out - ref)))
    assert max_err < 1e-2, f"kernel/reference mismatch: max abs err = {max_err}"

    print("KERNEL_OK")
</pallas_src>

<mosaic_0001>
module attributes {stable_mosaic.version = 11 : i64} {
  func.func @_disc_kernel(%arg0: memref<128x256xbf16, #tpu.memory_space<vmem>>, %arg1: memref<256x128xbf16, #tpu.memory_space<vmem>>, %arg2: memref<1024x256xbf16, #tpu.memory_space<vmem>>, %arg3: memref<128x64xbf16, #tpu.memory_space<vmem>>, %arg4: memref<1024x256xbf16, #tpu.memory_space<vmem>>, %arg5: memref<1x16xf32, #tpu.memory_space<vmem>>, %arg6: memref<1x16xf32, #tpu.memory_space<vmem>>, %arg7: memref<512x32xf32, #tpu.memory_space<vmem>>, %arg8: memref<16x256xf32, #tpu.memory_space<vmem>>, %arg9: memref<64x32xbf16, #tpu.memory_space<vmem>>, %arg10: memref<1024x256xbf16, #tpu.memory_space<any>>, %arg11: memref<1x32xf32, #tpu.memory_space<vmem>>, %arg12: memref<1x32xf32, #tpu.memory_space<vmem>>, %arg13: memref<512x64xf32, #tpu.memory_space<vmem>>, %arg14: memref<32x256xf32, #tpu.memory_space<vmem>>, %arg15: memref<32x16xbf16, #tpu.memory_space<vmem>>, %arg16: memref<1024x256xbf16, #tpu.memory_space<any>>, %arg17: memref<1x64xf32, #tpu.memory_space<vmem>>, %arg18: memref<1x64xf32, #tpu.memory_space<vmem>>, %arg19: memref<512x128xf32, #tpu.memory_space<vmem>>, %arg20: memref<64x256xf32, #tpu.memory_space<vmem>>, %arg21: memref<8x256xf32, #tpu.memory_space<vmem>>, %arg22: memref<2x8xf32, #tpu.memory_space<vmem>>, %arg23: memref<2x1xf32, #tpu.memory_space<vmem>>, %arg24: memref<64x1024xbf16, #tpu.memory_space<vmem>>, %arg25: memref<1024x256xbf16, #tpu.memory_space<vmem>>, %arg26: memref<1024x256xbf16, #tpu.memory_space<vmem>>, %arg27: memref<2x!tpu.dma_semaphore, #tpu.memory_space<semaphore_mem>>) attributes {dimension_semantics = [], scalar_prefetch = 0 : i64, scratch_operands = 4 : i64, tpu.core_type = #tpu.core_type<tc>} {
    %c0_i32 = arith.constant 0 : i32
    %0 = tpu.memref_slice %arg27[%c0_i32] : memref<2x!tpu.dma_semaphore, #tpu.memory_space<semaphore_mem>> -> memref<1x!tpu.dma_semaphore, #tpu.memory_space<semaphore_mem>>
    %1 = tpu.memref_squeeze %0 : memref<1x!tpu.dma_semaphore, #tpu.memory_space<semaphore_mem>> -> memref<!tpu.dma_semaphore, #tpu.memory_space<semaphore_mem>>
    tpu.enqueue_dma source(%arg10 : memref<1024x256xbf16, #tpu.memory_space<any>>) target(%arg25 : memref<1024x256xbf16, #tpu.memory_space<vmem>>) target_semaphore(%1 : memref<!tpu.dma_semaphore, #tpu.memory_space<semaphore_mem>>)
    %c1_i32 = arith.constant 1 : i32
    %2 = tpu.memref_slice %arg27[%c1_i32] : memref<2x!tpu.dma_semaphore, #tpu.memory_space<semaphore_mem>> -> memref<1x!tpu.dma_semaphore, #tpu.memory_space<semaphore_mem>>
    %3 = tpu.memref_squeeze %2 : memref<1x!tpu.dma_semaphore, #tpu.memory_space<semaphore_mem>> -> memref<!tpu.dma_semaphore, #tpu.memory_space<semaphore_mem>>
    tpu.enqueue_dma source(%arg16 : memref<1024x256xbf16, #tpu.memory_space<any>>) target(%arg26 : memref<1024x256xbf16, #tpu.memory_space<vmem>>) target_semaphore(%3 : memref<!tpu.dma_semaphore, #tpu.memory_space<semaphore_mem>>)
    %c0 = arith.constant 0 : index
    %c0_0 = arith.constant 0 : index
    %4 = vector.load %arg0[%c0, %c0_0] : memref<128x256xbf16, #tpu.memory_space<vmem>>, vector<128x256xbf16>
    %c0_1 = arith.constant 0 : index
    %c0_2 = arith.constant 0 : index
    %5 = vector.load %arg2[%c0_1, %c0_2] : memref<1024x256xbf16, #tpu.memory_space<vmem>>, vector<1024x256xbf16>
    %c0_3 = arith.constant 0 : index
    %c0_4 = arith.constant 0 : index
    %6 = vector.load %arg1[%c0_3, %c0_4] : memref<256x128xbf16, #tpu.memory_space<vmem>>, vector<256x128xbf16>
    %cst = arith.constant dense<0.000000e+00> : vector<256x256xf32>
    %7 = tpu.matmul %6, %4, %cst {dimension_numbers = #tpu.dot_dimension_numbers<[1], [0], [0], [1], [0, 0, 1, 1], [], []>} : vector<256x128xbf16>, vector<128x256xbf16>, vector<256x256xf32> -> vector<256x256xf32>
    %8 = vector.extract_strided_slice %7 {offsets = [0, 0], sizes = [64, 256], strides = [1, 1]} : vector<256x256xf32> to vector<64x256xf32>
    %9 = arith.truncf %8 : vector<64x256xf32> to vector<64x256xbf16>
    %c0_5 = arith.constant 0 : index
    %c0_6 = arith.constant 0 : index
    %10 = vector.load %arg24[%c0_5, %c0_6] : memref<64x1024xbf16, #tpu.memory_space<vmem>>, vector<64x256xbf16>
    tpu.vector_store %arg24[%c0_5, %c0_6], %9 {strides = array<i32>} : memref<64x1024xbf16, #tpu.memory_space<vmem>>, vector<64x256xbf16>,
    %11 = vector.extract_strided_slice %7 {offsets = [64, 0], sizes = [64, 256], strides = [1, 1]} : vector<256x256xf32> to vector<64x256xf32>
    %12 = arith.truncf %11 : vector<64x256xf32> to vector<64x256xbf16>
    %c0_7 = arith.constant 0 : index
    %c256 = arith.constant 256 : index
    %13 = vector.load %arg24[%c0_7, %c256] : memref<64x1024xbf16, #tpu.memory_space<vmem>>, vector<64x256xbf16>
    tpu.vector_store %arg24[%c0_7, %c256], %12 {strides = array<i32>} : memref<64x1024xbf16, #tpu.memory_space<vmem>>, vector<64x256xbf16>,
    %14 = vector.extract_strided_slice %7 {offsets = [128, 0], sizes = [64, 256], strides = [1, 1]} : vector<256x256xf32> to vector<64x256xf32>
    %15 = arith.truncf %14 : vector<64x256xf32> to vector<64x256xbf16>
    %c0_8 = arith.constant 0 : index
    %c512 = arith.constant 512 : index
    %16 = vector.load %arg24[%c0_8, %c512] : memref<64x1024xbf16, #tpu.memory_space<vmem>>, vector<64x256xbf16>
    tpu.vector_store %arg24[%c0_8, %c512], %15 {strides = array<i32>} : memref<64x1024xbf16, #tpu.memory_space<vmem>>, vector<64x256xbf16>,
    %17 = vector.extract_strided_slice %7 {offsets = [192, 0], sizes = [64, 256], strides = [1, 1]} : vector<256x256xf32> to vector<64x256xf32>
    %18 = arith.truncf %17 : vector<64x256xf32> to vector<64x256xbf16>
    %c0_9 = arith.constant 0 : index
    %c768 = arith.constant 768 : index
    %19 = vector.load %arg24[%c0_9, %c768] : memref<64x1024xbf16, #tpu.memory_space<vmem>>, vector<64x256xbf16>
    tpu.vector_store %arg24[%c0_9, %c768], %18 {strides = array<i32>} : memref<64x1024xbf16, #tpu.memory_space<vmem>>, vector<64x256xbf16>,
    %c0_10 = arith.constant 0 : index
    %c0_11 = arith.constant 0 : index
    %20 = vector.load %arg24[%c0_10, %c0_11] : memref<64x1024xbf16, #tpu.memory_space<vmem>>, vector<64x1024xbf16>
    %cst_12 = arith.constant dense<0.000000e+00> : vector<64x256xf32>
    %21 = tpu.matmul %20, %5, %cst_12 {dimension_numbers = #tpu.dot_dimension_numbers<[1], [0], [0], [1], [0, 0, 1, 1], [], []>} : vector<64x1024xbf16>, vector<1024x256xbf16>, vector<64x256xf32> -> vector<64x256xf32>
    %cst_13 = arith.constant 0.000000e+00 : f32
    %22 = vector.broadcast %cst_13 : f32 to vector<64x256xf32>
    %23 = arith.cmpf oge, %21, %22 : vector<64x256xf32>
    %cst_14 = arith.constant 2.000000e-01 : f32
    %24 = vector.broadcast %cst_14 : f32 to vector<64x256xf32>
    %25 = arith.mulf %24, %21 : vector<64x256xf32>
    %26 = arith.select %23, %21, %25 : vector<64x256xi1>, vector<64x256xf32>
    %27 = arith.truncf %26 : vector<64x256xf32> to vector<64x256xbf16>
    %c0_15 = arith.constant 0 : index
    %c0_16 = arith.constant 0 : index
    %28 = vector.load %arg4[%c0_15, %c0_16] : memref<1024x256xbf16, #tpu.memory_space<vmem>>, vector<1024x256xbf16>
    %c0_17 = arith.constant 0 : index
    %c0_18 = arith.constant 0 : index
    %29 = vector.load %arg3[%c0_17, %c0_18] : memref<128x64xbf16, #tpu.memory_space<vmem>>, vector<128x64xbf16>
    %cst_19 = arith.constant dense<0.000000e+00> : vector<128x256xf32>
    %30 = tpu.matmul %29, %27, %cst_19 {dimension_numbers = #tpu.dot_dimension_numbers<[1], [0], [0], [1], [0, 0, 1, 1], [], []>} : vector<128x64xbf16>, vector<64x256xbf16>, vector<128x256xf32> -> vector<128x256xf32>
    %31 = vector.extract_strided_slice %30 {offsets = [0, 0], sizes = [32, 256], strides = [1, 1]} : vector<128x256xf32> to vector<32x256xf32>
    %32 = arith.truncf %31 : vector<32x256xf32> to vector<32x256xbf16>
    %c0_20 = arith.constant 0 : index
    %c0_21 = arith.constant 0 : index
    %33 = vector.load %arg24[%c0_20, %c0_21] : memref<64x1024xbf16, #tpu.memory_space<vmem>>, vector<32x256xbf16>
    tpu.vector_store %arg24[%c0_20, %c0_21], %32 {strides = array<i32>} : memref<64x1024xbf16, #tpu.memory_space<vmem>>, vector<32x256xbf16>,
    %34 = vector.extract_strided_slice %30 {offsets = [32, 0], sizes = [32, 256], strides = [1, 1]} : vector<128x256xf32> to vector<32x256xf32>
    %35 = arith.truncf %34 : vector<32x256xf32> to vector<32x256xbf16>
    %c0_22 = arith.constant 0 : index
    %c256_23 = arith.constant 256 : index
    %36 = vector.load %arg24[%c0_22, %c256_23] : memref<64x1024xbf16, #tpu.memory_space<vmem>>, vector<32x256xbf16>
    tpu.vector_store %arg24[%c0_22, %c256_23], %35 {strides = array<i32>} : memref<64x1024xbf16, #tpu.memory_space<vmem>>, vector<32x256xbf16>,
    %37 = vector.extract_strided_slice %30 {offsets = [64, 0], sizes = [32, 256], strides = [1, 1]} : vector<128x256xf32> to vector<32x256xf32>
    %38 = arith.truncf %37 : vector<32x256xf32> to vector<32x256xbf16>
    %c0_24 = arith.constant 0 : index
    %c512_25 = arith.constant 512 : index
    %39 = vector.load %arg24[%c0_24, %c512_25] : memref<64x1024xbf16, #tpu.memory_space<vmem>>, vector<32x256xbf16>
    tpu.vector_store %arg24[%c0_24, %c512_25], %38 {strides = array<i32>} : memref<64x1024xbf16, #tpu.memory_space<vmem>>, vector<32x256xbf16>,
    %40 = vector.extract_strided_slice %30 {offsets = [96, 0], sizes = [32, 256], strides = [1, 1]} : vector<128x256xf32> to vector<32x256xf32>
    %41 = arith.truncf %40 : vector<32x256xf32> to vector<32x256xbf16>
    %c0_26 = arith.constant 0 : index
    %c768_27 = arith.constant 768 : index
    %42 = vector.load %arg24[%c0_26, %c768_27] : memref<64x1024xbf16, #tpu.memory_space<vmem>>, vector<32x256xbf16>
    tpu.vector_store %arg24[%c0_26, %c768_27], %41 {strides = array<i32>} : memref<64x1024xbf16, #tpu.memory_space<vmem>>, vector<32x256xbf16>,
    %c0_28 = arith.constant 0 : index
    %c0_29 = arith.constant 0 : index
    %43 = vector.load %arg24[%c0_28, %c0_29] : memref<64x1024xbf16, #tpu.memory_space<vmem>>, vector<32x1024xbf16>
    %cst_30 = arith.constant dense<0.000000e+00> : vector<32x256xf32>
    %44 = tpu.matmul %43, %28, %cst_30 {dimension_numbers = #tpu.dot_dimension_numbers<[1], [0], [0], [1], [0, 0, 1, 1], [], []>} : vector<32x1024xbf16>, vector<1024x256xbf16>, vector<32x256xf32> -> vector<32x256xf32>
    %cst_31 = arith.constant 1.000000e+00 : f32
    %45 = vector.broadcast %cst_31 : f32 to vector<1x32xf32>
    %46 = arith.mulf %44, %44 : vector<32x256xf32>
    %47 = tpu.concatenate %44, %46 in 1 : vector<32x256xf32>, vector<32x256xf32> -> vector<32x512xf32>
    %cst_32 = arith.constant dense<0.000000e+00> : vector<1x512xf32>
    %48 = tpu.matmul %45, %47, %cst_32 {dimension_numbers = #tpu.dot_dimension_numbers<[1], [0], [0], [1], [0, 0, 1, 1], [], []>} : vector<1x32xf32>, vector<32x512xf32>, vector<1x512xf32> -> vector<1x512xf32>
    %c0_33 = arith.constant 0 : index
    %c0_34 = arith.constant 0 : index
    %49 = vector.load %arg7[%c0_33, %c0_34] : memref<512x32xf32, #tpu.memory_space<vmem>>, vector<512x32xf32>
    %cst_35 = arith.constant dense<0.000000e+00> : vector<1x32xf32>
    %50 = tpu.matmul %48, %49, %cst_35 {dimension_numbers = #tpu.dot_dimension_numbers<[1], [0], [0], [1], [0, 0, 1, 1], [], []>} : vector<1x512xf32>, vector<512x32xf32>, vector<1x32xf32> -> vector<1x32xf32>
    %cst_36 = arith.constant 0.001953125 : f32
    %51 = vector.broadcast %cst_36 : f32 to vector<1x32xf32>
    %52 = arith.mulf %50, %51 : vector<1x32xf32>
    %53 = vector.extract_strided_slice %52 {offsets = [0, 0], sizes = [1, 16], strides = [1, 1]} : vector<1x32xf32> to vector<1x16xf32>
    %54 = vector.extract_strided_slice %52 {offsets = [0, 16], sizes = [1, 16], strides = [1, 1]} : vector<1x32xf32> to vector<1x16xf32>
    %55 = arith.mulf %53, %53 : vector<1x16xf32>
    %56 = arith.subf %54, %55 : vector<1x16xf32>
    %c0_37 = arith.constant 0 : index
    %c0_38 = arith.constant 0 : index
    %57 = vector.load %arg5[%c0_37, %c0_38] : memref<1x16xf32, #tpu.memory_space<vmem>>, vector<1x16xf32>
    %cst_39 = arith.constant 9.99999974E-6 : f32
    %58 = vector.broadcast %cst_39 : f32 to vector<1x16xf32>
    %59 = arith.addf %56, %58 : vector<1x16xf32>
    %60 = math.rsqrt %59 : vector<1x16xf32>
    %61 = arith.mulf %57, %60 : vector<1x16xf32>
    %c0_40 = arith.constant 0 : index
    %c0_41 = arith.constant 0 : index
    %62 = vector.load %arg6[%c0_40, %c0_41] : memref<1x16xf32, #tpu.memory_space<vmem>>, vector<1x16xf32>
    %63 = arith.mulf %53, %61 : vector<1x16xf32>
    %64 = arith.subf %62, %63 : vector<1x16xf32>
    %65 = tpu.concatenate %61, %64 in 0 : vector<1x16xf32>, vector<1x16xf32> -> vector<2x16xf32>
    %c0_42 = arith.constant 0 : index
    %c0_43 = arith.constant 0 : index
    %66 = vector.load %arg8[%c0_42, %c0_43] : memref<16x256xf32, #tpu.memory_space<vmem>>, vector<16x256xf32>
    %cst_44 = arith.constant dense<0.000000e+00> : vector<2x256xf32>
    %67 = tpu.matmul %65, %66, %cst_44 {dimension_numbers = #tpu.dot_dimension_numbers<[1], [0], [0], [1], [0, 0, 1, 1], [], []>} : vector<2x16xf32>, vector<16x256xf32>, vector<2x256xf32> -> vector<2x256xf32>
    %68 = vector.extract_strided_slice %67 {offsets = [0, 0], sizes = [1, 256], strides = [1, 1]} : vector<2x256xf32> to vector<1x256xf32>
    %69 = vector.broadcast %68 : vector<1x256xf32> to vector<32x256xf32>
    %70 = arith.mulf %44, %69 : vector<32x256xf32>
    %71 = vector.extract_strided_slice %67 {offsets = [1, 0], sizes = [1, 256], strides = [1, 1]} : vector<2x256xf32> to vector<1x256xf32>
    %72 = vector.broadcast %71 : vector<1x256xf32> to vector<32x256xf32>
    %73 = arith.addf %70, %72 : vector<32x256xf32>
    %cst_45 = arith.constant 0.000000e+00 : f32
    %74 = vector.broadcast %cst_45 : f32 to vector<32x256xf32>
    %75 = arith.cmpf oge, %73, %74 : vector<32x256xf32>
    %cst_46 = arith.constant 2.000000e-01 : f32
    %76 = vector.broadcast %cst_46 : f32 to vector<32x256xf32>
    %77 = arith.mulf %76, %73 : vector<32x256xf32>
    %78 = arith.select %75, %73, %77 : vector<32x256xi1>, vector<32x256xf32>
    %c0_i32_47 = arith.constant 0 : i32
    %79 = tpu.memref_slice %arg27[%c0_i32_47] : memref<2x!tpu.dma_semaphore, #tpu.memory_space<semaphore_mem>> -> memref<1x!tpu.dma_semaphore, #tpu.memory_space<semaphore_mem>>
    %80 = tpu.memref_squeeze %79 : memref<1x!tpu.dma_semaphore, #tpu.memory_space<semaphore_mem>> -> memref<!tpu.dma_semaphore, #tpu.memory_space<semaphore_mem>>
    tpu.wait_dma2 semaphore(%80 : memref<!tpu.dma_semaphore, #tpu.memory_space<semaphore_mem>>) src(%arg10 : memref<1024x256xbf16, #tpu.memory_space<any>>) dst(%arg25 : memref<1024x256xbf16, #tpu.memory_space<vmem>>)
    %81 = arith.truncf %78 : vector<32x256xf32> to vector<32x256xbf16>
    %c0_48 = arith.constant 0 : index
    %c0_49 = arith.constant 0 : index
    %82 = vector.load %arg25[%c0_48, %c0_49] : memref<1024x256xbf16, #tpu.memory_space<vmem>>, vector<1024x256xbf16>
    %c0_50 = arith.constant 0 : index
    %c0_51 = arith.constant 0 : index
    %83 = vector.load %arg9[%c0_50, %c0_51] : memref<64x32xbf16, #tpu.memory_space<vmem>>, vector<64x32xbf16>
    %cst_52 = arith.constant dense<0.000000e+00> : vector<64x256xf32>
    %84 = tpu.matmul %83, %81, %cst_52 {dimension_numbers = #tpu.dot_dimension_numbers<[1], [0], [0], [1], [0, 0, 1, 1], [], []>} : vector<64x32xbf16>, vector<32x256xbf16>, vector<64x256xf32> -> vector<64x256xf32>
    %85 = vector.extract_strided_slice %84 {offsets = [0, 0], sizes = [16, 256], strides = [1, 1]} : vector<64x256xf32> to vector<16x256xf32>
    %86 = arith.truncf %85 : vector<16x256xf32> to vector<16x256xbf16>
    %c0_53 = arith.constant 0 : index
    %c0_54 = arith.constant 0 : index
    %87 = vector.load %arg24[%c0_53, %c0_54] : memref<64x1024xbf16, #tpu.memory_space<vmem>>, vector<16x256xbf16>
    tpu.vector_store %arg24[%c0_53, %c0_54], %86 {strides = array<i32>} : memref<64x1024xbf16, #tpu.memory_space<vmem>>, vector<16x256xbf16>,
    %88 = vector.extract_strided_slice %84 {offsets = [16, 0], sizes = [16, 256], strides = [1, 1]} : vector<64x256xf32> to vector<16x256xf32>
    %89 = arith.truncf %88 : vector<16x256xf32> to vector<16x256xbf16>
    %c0_55 = arith.constant 0 : index
    %c256_56 = arith.constant 256 : index
    %90 = vector.load %arg24[%c0_55, %c256_56] : memref<64x1024xbf16, #tpu.memory_space<vmem>>, vector<16x256xbf16>
    tpu.vector_store %arg24[%c0_55, %c256_56], %89 {strides = array<i32>} : memref<64x1024xbf16, #tpu.memory_space<vmem>>, vector<16x256xbf16>,
    %91 = vector.extract_strided_slice %84 {offsets = [32, 0], sizes = [16, 256], strides = [1, 1]} : vector<64x256xf32> to vector<16x256xf32>
    %92 = arith.truncf %91 : vector<16x256xf32> to vector<16x256xbf16>
    %c0_57 = arith.constant 0 : index
    %c512_58 = arith.constant 512 : index
    %93 = vector.load %arg24[%c0_57, %c512_58] : memref<64x1024xbf16, #tpu.memory_space<vmem>>, vector<16x256xbf16>
    tpu.vector_store %arg24[%c0_57, %c512_58], %92 {strides = array<i32>} : memref<64x1024xbf16, #tpu.memory_space<vmem>>, vector<16x256xbf16>,
    %94 = vector.extract_strided_slice %84 {offsets = [48, 0], sizes = [16, 256], strides = [1, 1]} : vector<64x256xf32> to vector<16x256xf32>
    %95 = arith.truncf %94 : vector<16x256xf32> to vector<16x256xbf16>
    %c0_59 = arith.constant 0 : index
    %c768_60 = arith.constant 768 : index
    %96 = vector.load %arg24[%c0_59, %c768_60] : memref<64x1024xbf16, #tpu.memory_space<vmem>>, vector<16x256xbf16>
    tpu.vector_store %arg24[%c0_59, %c768_60], %95 {strides = array<i32>} : memref<64x1024xbf16, #tpu.memory_space<vmem>>, vector<16x256xbf16>,
    %c0_61 = arith.constant 0 : index
    %c0_62 = arith.constant 0 : index
    %97 = vector.load %arg24[%c0_61, %c0_62] : memref<64x1024xbf16, #tpu.memory_space<vmem>>, vector<16x1024xbf16>
    %cst_63 = arith.constant dense<0.000000e+00> : vector<16x256xf32>
    %98 = tpu.matmul %97, %82, %cst_63 {dimension_numbers = #tpu.dot_dimension_numbers<[1], [0], [0], [1], [0, 0, 1, 1], [], []>} : vector<16x1024xbf16>, vector<1024x256xbf16>, vector<16x256xf32> -> vector<16x256xf32>
    %cst_64 = arith.constant 1.000000e+00 : f32
    %99 = vector.broadcast %cst_64 : f32 to vector<1x16xf32>
    %100 = arith.mulf %98, %98 : vector<16x256xf32>
    %101 = tpu.concatenate %98, %100 in 1 : vector<16x256xf32>, vector<16x256xf32> -> vector<16x512xf32>
    %cst_65 = arith.constant dense<0.000000e+00> : vector<1x512xf32>
    %102 = tpu.matmul %99, %101, %cst_65 {dimension_numbers = #tpu.dot_dimension_numbers<[1], [0], [0], [1], [0, 0, 1, 1], [], []>} : vector<1x16xf32>, vector<16x512xf32>, vector<1x512xf32> -> vector<1x512xf32>
    %c0_66 = arith.constant 0 : index
    %c0_67 = arith.constant 0 : index
    %103 = vector.load %arg13[%c0_66, %c0_67] : memref<512x64xf32, #tpu.memory_space<vmem>>, vector<512x64xf32>
    %cst_68 = arith.constant dense<0.000000e+00> : vector<1x64xf32>
    %104 = tpu.matmul %102, %103, %cst_68 {dimension_numbers = #tpu.dot_dimension_numbers<[1], [0], [0], [1], [0, 0, 1, 1], [], []>} : vector<1x512xf32>, vector<512x64xf32>, vector<1x64xf32> -> vector<1x64xf32>
    %cst_69 = arith.constant 7.812500e-03 : f32
    %105 = vector.broadcast %cst_69 : f32 to vector<1x64xf32>
    %106 = arith.mulf %104, %105 : vector<1x64xf32>
    %107 = vector.extract_strided_slice %106 {offsets = [0, 0], sizes = [1, 32], strides = [1, 1]} : vector<1x64xf32> to vector<1x32xf32>
    %108 = vector.extract_strided_slice %106 {offsets = [0, 32], sizes = [1, 32], strides = [1, 1]} : vector<1x64xf32> to vector<1x32xf32>
    %109 = arith.mulf %107, %107 : vector<1x32xf32>
    %110 = arith.subf %108, %109 : vector<1x32xf32>
    %c0_70 = arith.constant 0 : index
    %c0_71 = arith.constant 0 : index
    %111 = vector.load %arg11[%c0_70, %c0_71] : memref<1x32xf32, #tpu.memory_space<vmem>>, vector<1x32xf32>
    %cst_72 = arith.constant 9.99999974E-6 : f32
    %112 = vector.broadcast %cst_72 : f32 to vector<1x32xf32>
    %113 = arith.addf %110, %112 : vector<1x32xf32>
    %114 = math.rsqrt %113 : vector<1x32xf32>
    %115 = arith.mulf %111, %114 : vector<1x32xf32>
    %c0_73 = arith.constant 0 : index
    %c0_74 = arith.constant 0 : index
    %116 = vector.load %arg12[%c0_73, %c0_74] : memref<1x32xf32, #tpu.memory_space<vmem>>, vector<1x32xf32>
    %117 = arith.mulf %107, %115 : vector<1x32xf32>
    %118 = arith.subf %116, %117 : vector<1x32xf32>
    %119 = tpu.concatenate %115, %118 in 0 : vector<1x32xf32>, vector<1x32xf32> -> vector<2x32xf32>
    %c0_75 = arith.constant 0 : index
    %c0_76 = arith.constant 0 : index
    %120 = vector.load %arg14[%c0_75, %c0_76] : memref<32x256xf32, #tpu.memory_space<vmem>>, vector<32x256xf32>
    %cst_77 = arith.constant dense<0.000000e+00> : vector<2x256xf32>
    %121 = tpu.matmul %119, %120, %cst_77 {dimension_numbers = #tpu.dot_dimension_numbers<[1], [0], [0], [1], [0, 0, 1, 1], [], []>} : vector<2x32xf32>, vector<32x256xf32>, vector<2x256xf32> -> vector<2x256xf32>
    %122 = vector.extract_strided_slice %121 {offsets = [0, 0], sizes = [1, 256], strides = [1, 1]} : vector<2x256xf32> to vector<1x256xf32>
    %123 = vector.broadcast %122 : vector<1x256xf32> to vector<16x256xf32>
    %124 = arith.mulf %98, %123 : vector<16x256xf32>
    %125 = vector.extract_strided_slice %121 {offsets = [1, 0], sizes = [1, 256], strides = [1, 1]} : vector<2x256xf32> to vector<1x256xf32>
    %126 = vector.broadcast %125 : vector<1x256xf32> to vector<16x256xf32>
    %127 = arith.addf %124, %126 : vector<16x256xf32>
    %cst_78 = arith.constant 0.000000e+00 : f32
    %128 = vector.broadcast %cst_78 : f32 to vector<16x256xf32>
    %129 = arith.cmpf oge, %127, %128 : vector<16x256xf32>
    %cst_79 = arith.constant 2.000000e-01 : f32
    %130 = vector.broadcast %cst_79 : f32 to vector<16x256xf32>
    %131 = arith.mulf %130, %127 : vector<16x256xf32>
    %132 = arith.select %129, %127, %131 : vector<16x256xi1>, vector<16x256xf32>
    %c1_i32_80 = arith.constant 1 : i32
    %133 = tpu.memref_slice %arg27[%c1_i32_80] : memref<2x!tpu.dma_semaphore, #tpu.memory_space<semaphore_mem>> -> memref<1x!tpu.dma_semaphore, #tpu.memory_space<semaphore_mem>>
    %134 = tpu.memref_squeeze %133 : memref<1x!tpu.dma_semaphore, #tpu.memory_space<semaphore_mem>> -> memref<!tpu.dma_semaphore, #tpu.memory_space<semaphore_mem>>
    tpu.wait_dma2 semaphore(%134 : memref<!tpu.dma_semaphore, #tpu.memory_space<semaphore_mem>>) src(%arg16 : memref<1024x256xbf16, #tpu.memory_space<any>>) dst(%arg26 : memref<1024x256xbf16, #tpu.memory_space<vmem>>)
    %135 = arith.truncf %132 : vector<16x256xf32> to vector<16x256xbf16>
    %c0_81 = arith.constant 0 : index
    %c0_82 = arith.constant 0 : index
    %136 = vector.load %arg26[%c0_81, %c0_82] : memref<1024x256xbf16, #tpu.memory_space<vmem>>, vector<1024x256xbf16>
    %c0_83 = arith.constant 0 : index
    %c0_84 = arith.constant 0 : index
    %137 = vector.load %arg15[%c0_83, %c0_84] : memref<32x16xbf16, #tpu.memory_space<vmem>>, vector<32x16xbf16>
    %cst_85 = arith.constant dense<0.000000e+00> : vector<32x256xf32>
    %138 = tpu.matmul %137, %135, %cst_85 {dimension_numbers = #tpu.dot_dimension_numbers<[1], [0], [0], [1], [0, 0, 1, 1], [], []>} : vector<32x16xbf16>, vector<16x256xbf16>, vector<32x256xf32> -> vector<32x256xf32>
    %139 = vector.extract_strided_slice %138 {offsets = [0, 0], sizes = [8, 256], strides = [1, 1]} : vector<32x256xf32> to vector<8x256xf32>
    %140 = arith.truncf %139 : vector<8x256xf32> to vector<8x256xbf16>
    %c0_86 = arith.constant 0 : index
    %c0_87 = arith.constant 0 : index
    %141 = vector.load %arg24[%c0_86, %c0_87] : memref<64x1024xbf16, #tpu.memory_space<vmem>>, vector<8x256xbf16>
    tpu.vector_store %arg24[%c0_86, %c0_87], %140 {strides = array<i32>} : memref<64x1024xbf16, #tpu.memory_space<vmem>>, vector<8x256xbf16>,
    %142 = vector.extract_strided_slice %138 {offsets = [8, 0], sizes = [8, 256], strides = [1, 1]} : vector<32x256xf32> to vector<8x256xf32>
    %143 = arith.truncf %142 : vector<8x256xf32> to vector<8x256xbf16>
    %c0_88 = arith.constant 0 : index
    %c256_89 = arith.constant 256 : index
    %144 = vector.load %arg24[%c0_88, %c256_89] : memref<64x1024xbf16, #tpu.memory_space<vmem>>, vector<8x256xbf16>
    tpu.vector_store %arg24[%c0_88, %c256_89], %143 {strides = array<i32>} : memref<64x1024xbf16, #tpu.memory_space<vmem>>, vector<8x256xbf16>,
    %145 = vector.extract_strided_slice %138 {offsets = [16, 0], sizes = [8, 256], strides = [1, 1]} : vector<32x256xf32> to vector<8x256xf32>
    %146 = arith.truncf %145 : vector<8x256xf32> to vector<8x256xbf16>
    %c0_90 = arith.constant 0 : index
    %c512_91 = arith.constant 512 : index
    %147 = vector.load %arg24[%c0_90, %c512_91] : memref<64x1024xbf16, #tpu.memory_space<vmem>>, vector<8x256xbf16>
    tpu.vector_store %arg24[%c0_90, %c512_91], %146 {strides = array<i32>} : memref<64x1024xbf16, #tpu.memory_space<vmem>>, vector<8x256xbf16>,
    %148 = vector.extract_strided_slice %138 {offsets = [24, 0], sizes = [8, 256], strides = [1, 1]} : vector<32x256xf32> to vector<8x256xf32>
    %149 = arith.truncf %148 : vector<8x256xf32> to vector<8x256xbf16>
    %c0_92 = arith.constant 0 : index
    %c768_93 = arith.constant 768 : index
    %150 = vector.load %arg24[%c0_92, %c768_93] : memref<64x1024xbf16, #tpu.memory_space<vmem>>, vector<8x256xbf16>
    tpu.vector_store %arg24[%c0_92, %c768_93], %149 {strides = array<i32>} : memref<64x1024xbf16, #tpu.memory_space<vmem>>, vector<8x256xbf16>,
    %c0_94 = arith.constant 0 : index
    %c0_95 = arith.constant 0 : index
    %151 = vector.load %arg24[%c0_94, %c0_95] : memref<64x1024xbf16, #tpu.memory_space<vmem>>, vector<8x1024xbf16>
    %cst_96 = arith.constant dense<0.000000e+00> : vector<8x256xf32>
    %152 = tpu.matmul %151, %136, %cst_96 {dimension_numbers = #tpu.dot_dimension_numbers<[1], [0], [0], [1], [0, 0, 1, 1], [], []>} : vector<8x1024xbf16>, vector<1024x256xbf16>, vector<8x256xf32> -> vector<8x256xf32>
    %cst_97 = arith.constant 1.000000e+00 : f32
    %153 = vector.broadcast %cst_97 : f32 to vector<1x8xf32>
    %154 = arith.mulf %152, %152 : vector<8x256xf32>
    %155 = tpu.concatenate %152, %154 in 1 : vector<8x256xf32>, vector<8x256xf32> -> vector<8x512xf32>
    %cst_98 = arith.constant dense<0.000000e+00> : vector<1x512xf32>
    %156 = tpu.matmul %153, %155, %cst_98 {dimension_numbers = #tpu.dot_dimension_numbers<[1], [0], [0], [1], [0, 0, 1, 1], [], []>} : vector<1x8xf32>, vector<8x512xf32>, vector<1x512xf32> -> vector<1x512xf32>
    %c0_99 = arith.constant 0 : index
    %c0_100 = arith.constant 0 : index
    %157 = vector.load %arg19[%c0_99, %c0_100] : memref<512x128xf32, #tpu.memory_space<vmem>>, vector<512x128xf32>
    %cst_101 = arith.constant dense<0.000000e+00> : vector<1x128xf32>
    %158 = tpu.matmul %156, %157, %cst_101 {dimension_numbers = #tpu.dot_dimension_numbers<[1], [0], [0], [1], [0, 0, 1, 1], [], []>} : vector<1x512xf32>, vector<512x128xf32>, vector<1x128xf32> -> vector<1x128xf32>
    %cst_102 = arith.constant 3.125000e-02 : f32
    %159 = vector.broadcast %cst_102 : f32 to vector<1x128xf32>
    %160 = arith.mulf %158, %159 : vector<1x128xf32>
    %161 = vector.extract_strided_slice %160 {offsets = [0, 0], sizes = [1, 64], strides = [1, 1]} : vector<1x128xf32> to vector<1x64xf32>
    %162 = vector.extract_strided_slice %160 {offsets = [0, 64], sizes = [1, 64], strides = [1, 1]} : vector<1x128xf32> to vector<1x64xf32>
    %163 = arith.mulf %161, %161 : vector<1x64xf32>
    %164 = arith.subf %162, %163 : vector<1x64xf32>
    %c0_103 = arith.constant 0 : index
    %c0_104 = arith.constant 0 : index
    %165 = vector.load %arg17[%c0_103, %c0_104] : memref<1x64xf32, #tpu.memory_space<vmem>>, vector<1x64xf32>
    %cst_105 = arith.constant 9.99999974E-6 : f32
    %166 = vector.broadcast %cst_105 : f32 to vector<1x64xf32>
    %167 = arith.addf %164, %166 : vector<1x64xf32>
    %168 = math.rsqrt %167 : vector<1x64xf32>
    %169 = arith.mulf %165, %168 : vector<1x64xf32>
    %c0_106 = arith.constant 0 : index
    %c0_107 = arith.constant 0 : index
    %170 = vector.load %arg18[%c0_106, %c0_107] : memref<1x64xf32, #tpu.memory_space<vmem>>, vector<1x64xf32>
    %171 = arith.mulf %161, %169 : vector<1x64xf32>
    %172 = arith.subf %170, %171 : vector<1x64xf32>
    %173 = tpu.concatenate %169, %172 in 0 : vector<1x64xf32>, vector<1x64xf32> -> vector<2x64xf32>
    %c0_108 = arith.constant 0 : index
    %c0_109 = arith.constant 0 : index
    %174 = vector.load %arg20[%c0_108, %c0_109] : memref<64x256xf32, #tpu.memory_space<vmem>>, vector<64x256xf32>
    %cst_110 = arith.constant dense<0.000000e+00> : vector<2x256xf32>
    %175 = tpu.matmul %173, %174, %cst_110 {dimension_numbers = #tpu.dot_dimension_numbers<[1], [0], [0], [1], [0, 0, 1, 1], [], []>} : vector<2x64xf32>, vector<64x256xf32>, vector<2x256xf32> -> vector<2x256xf32>
    %176 = vector.extract_strided_slice %175 {offsets = [0, 0], sizes = [1, 256], strides = [1, 1]} : vector<2x256xf32> to vector<1x256xf32>
    %177 = vector.broadcast %176 : vector<1x256xf32> to vector<8x256xf32>
    %178 = arith.mulf %152, %177 : vector<8x256xf32>
    %179 = vector.extract_strided_slice %175 {offsets = [1, 0], sizes = [1, 256], strides = [1, 1]} : vector<2x256xf32> to vector<1x256xf32>
    %180 = vector.broadcast %179 : vector<1x256xf32> to vector<8x256xf32>
    %181 = arith.addf %178, %180 : vector<8x256xf32>
    %cst_111 = arith.constant 0.000000e+00 : f32
    %182 = vector.broadcast %cst_111 : f32 to vector<8x256xf32>
    %183 = arith.cmpf oge, %181, %182 : vector<8x256xf32>
    %cst_112 = arith.constant 2.000000e-01 : f32
    %184 = vector.broadcast %cst_112 : f32 to vector<8x256xf32>
    %185 = arith.mulf %184, %181 : vector<8x256xf32>
    %186 = arith.select %183, %181, %185 : vector<8x256xi1>, vector<8x256xf32>
    %c0_113 = arith.constant 0 : index
    %c0_114 = arith.constant 0 : index
    %187 = vector.load %arg21[%c0_113, %c0_114] : memref<8x256xf32, #tpu.memory_space<vmem>>, vector<8x256xf32>
    %188 = arith.mulf %186, %187 : vector<8x256xf32>
    %c0_115 = arith.constant 0 : index
    %c0_116 = arith.constant 0 : index
    %189 = vector.load %arg22[%c0_115, %c0_116] : memref<2x8xf32, #tpu.memory_space<vmem>>, vector<2x8xf32>
    %cst_117 = arith.constant dense<0.000000e+00> : vector<2x256xf32>
    %190 = tpu.matmul %189, %188, %cst_117 {dimension_numbers = #tpu.dot_dimension_numbers<[1], [0], [0], [1], [0, 0, 1, 1], [], []>} : vector<2x8xf32>, vector<8x256xf32>, vector<2x256xf32> -> vector<2x256xf32>
    %cst_118 = arith.constant dense<0.000000e+00> : vector<2xf32>
    %191 = vector.multi_reduction <add>, %190, %cst_118 [1] : vector<2x256xf32> to vector<2xf32>
    %192 = vector.shape_cast %191 : vector<2xf32> to vector<2x1xf32>
    %cst_119 = arith.constant 0.000000e+00 : f32
    %193 = vector.broadcast %cst_119 : f32 to vector<2x1xf32>
    %194 = arith.subf %193, %192 : vector<2x1xf32>
    %195 = math.exp %194 : vector<2x1xf32>
    %cst_120 = arith.constant 1.000000e+00 : f32
    %196 = vector.broadcast %cst_120 : f32 to vector<2x1xf32>
    %197 = arith.addf %196, %195 : vector<2x1xf32>
    %cst_121 = arith.constant 1.000000e+00 : f32
    %198 = vector.broadcast %cst_121 : f32 to vector<2x1xf32>
    %199 = arith.divf %198, %197 : vector<2x1xf32>
    %c0_122 = arith.constant 0 : index
    %c0_123 = arith.constant 0 : index
    %200 = vector.load %arg23[%c0_122, %c0_123] : memref<2x1xf32, #tpu.memory_space<vmem>>, vector<2x1xf32>
    tpu.vector_store %arg23[%c0_122, %c0_123], %199 {strides = array<i32>} : memref<2x1xf32, #tpu.memory_space<vmem>>, vector<2x1xf32>,
    return
  }
}

</mosaic_0001>

<bundles_post_ra>
// kernel: discriminator_forward.1
= control target key start
LH: loop header
LB: loop body
LE: loop exit
PB: predicated region body
PF: predicated region fallthrough
CT: control target
= control target key end

     0   :  { %s12444_s0 = inlined_call_operand.vmem [shape: bf16[128,256], index: 0, kind: input, shape index: {}]   ;;  %s12445_s1 = inlined_call_operand.hbm [shape: bf16[256,128], index: 1, kind: input, shape index: {}]   ;;  %s12446_s2 = inlined_call_operand.vmem [shape: bf16[1024,256], index: 2, kind: input, shape index: {}]   ;;  %s12447_s3 = inlined_call_operand.vmem [shape: bf16[128,64], index: 3, kind: input, shape index: {}]   ;;  %s12448_s4 = inlined_call_operand.vmem [shape: bf16[1024,256], index: 4, kind: input, shape index: {}]   ;;  %s12449_s5 = inlined_call_operand.hbm [shape: f32[1,16], index: 5, kind: input, shape index: {}]   ;;  %s12450_s6 = inlined_call_operand.vmem [shape: f32[1,16], index: 6, kind: input, shape index: {}]   ;;  %s12451_s7 = inlined_call_operand.vmem [shape: f32[512,32], index: 7, kind: input, shape index: {}]   ;;  %s12452_s8 = inlined_call_operand.hbm [shape: f32[16,256], index: 8, kind: input, shape index: {}]   ;;  %s12453_s9 = inlined_call_operand.vmem [shape: bf16[64,32], index: 9, kind: input, shape index: {}]   ;;  %s12454_s10 = inlined_call_operand.vmem [shape: bf16[1024,256], index: 10, kind: input, shape index: {}]   ;;  %s12455_s11 = inlined_call_operand.hbm [shape: f32[1,32], index: 11, kind: input, shape index: {}]   ;;  %s12456_s12 = inlined_call_operand.hbm [shape: f32[1,32], index: 12, kind: input, shape index: {}]   ;;  %s12457_s13 = inlined_call_operand.vmem [shape: f32[512,64], index: 13, kind: input, shape index: {}]   ;;  %s12458_s14 = inlined_call_operand.vmem [shape: f32[32,256], index: 14, kind: input, shape index: {}]   ;;  %s12459_s15 = inlined_call_operand.vmem [shape: bf16[32,16], index: 15, kind: input, shape index: {}]   ;;  %s12460_s16 = inlined_call_operand.hbm [shape: bf16[1024,256], index: 16, kind: input, shape index: {}]   ;;  %s12461_s17 = inlined_call_operand.hbm [shape: f32[1,64], index: 17, kind: input, shape index: {}]   ;;  %s12462_s18 = inlined_call_operand.hbm [shape: f32[1,64], index: 18, kind: input, shape index: {}]   ;;  %s12463_s19 = inlined_call_operand.hbm [shape: f32[512,128], index: 19, kind: input, shape index: {}]   ;;  %s12464_s20 = inlined_call_operand.hbm [shape: f32[64,256], index: 20, kind: input, shape index: {}]   ;;  %s12465_s21 = inlined_call_operand.hbm [shape: f32[8,256], index: 21, kind: input, shape index: {}]   ;;  %s12466_s22 = inlined_call_operand.hbm [shape: f32[2,8], index: 22, kind: input, shape index: {}]   ;;  %s12467_s23 = inlined_call_operand.vmem [shape: f32[2,1], index: 23, kind: output, shape index: {}]  }
   0x1   :  { %12592 = sst [smem:[#allocation153_spill]] %s12444_s0 }
   0x2   :  { %12593 = sst [smem:[#allocation154_spill]] %s12445_s1 }
   0x3   :  { %12594 = sst [smem:[#allocation155_spill]] %s12446_s2 }
   0x4   :  { %12595 = sst [smem:[#allocation156_spill]] %s12447_s3 }
   0x5   :  { %12596 = sst [smem:[#allocation157_spill]] %s12448_s4 }
   0x6   :  { %12597 = sst [smem:[#allocation158_spill]] %s12449_s5 }
   0x7   :  { %12598 = sst [smem:[#allocation159_spill]] %s12450_s6 }
   0x8   :  { %12599 = sst [smem:[#allocation160_spill]] %s12451_s7 }
   0x9   :  { %28 = vsyncpa [#allocation7], 0 }
   0xa   :  { %29 = vsyncpa [#allocation9], 0 }
   0xb   :  { %30 = vsyncpa [#allocation12], 0 }
   0xc   :  { %31 = vsyncpa [#allocation15], 0 }
   0xd   :  { %32 = vsyncpa [#allocation18], 0 }
   0xe   :  { %33 = vsyncpa [#allocation21], 0  ;;  %s9723_s4 = smov [#allocation8]   ;;  %s9724_s24 = smov [#allocation11]  }
   0xf   :  { %s60_s30 = sshll.u32 %s9723_s4, 4  ;;  %s88_s25 = sshll.u32 %s9724_s24, 4  ;;  %s61_s30 = int_to_ptr.vmem [resolvable:$true] %s60_s30  ;;  %s89_s25 = int_to_ptr.vmem [resolvable:$true] %s88_s25 }
  0x10   :  { %s9475_s5 = scalar_lea.vmem %s61_s30, 16  ;;  %s9479_s1 = scalar_lea.vmem %s61_s30, 32 }
  0x11   :  { %p9476_p0 = scmp.ne.s32.totalorder %s61_s30, %s9475_s5  ;;  %p9480_p1 = scmp.lt.s32.totalorder %s61_s30, %s61_s30 }
  0x12   :  { %p9481_p2 = scmp.lt.s32.totalorder %s9479_s1, %s9475_s5 }
  0x14   :  { %p9482_p3 = por %p9481_p2, %p9480_p1 }
  0x16   :  { %p9483_p4 = pnand %p9482_p3, %p9476_p0 }
  0x18   :  { %9486 = shalt.err (!%p9483_p4)
}
  0x19   :  { %s12600_s6 = sld [smem:[#allocation158_spill]]  ;;  %s9495_s27 = scalar_lea.vmem %s89_s25, 16 }
  0x1a   :  { %p9496_p5 = scmp.ne.s32.totalorder %s89_s25, %s9495_s27  ;;  %s9499_s7 = scalar_lea.vmem %s89_s25, 32 }
  0x1b   :  { %p9500_p6 = scmp.lt.s32.totalorder %s89_s25, %s89_s25  ;;  %p9501_p7 = scmp.lt.s32.totalorder %s9499_s7, %s9495_s27 }
  0x1d   :  { %p9502_p8 = por %p9501_p7, %p9500_p6 }
  0x1f   :  { %63 = dma.hbm_to_vmem [thread:$0]  %s12600_s6, 16, %s61_s30, [#allocation9]  }
  0x20   :  { %p9503_p9 = pnand %p9502_p8, %p9496_p5 }
  0x22   :  { %9506 = shalt.err (!%p9503_p9)
}
  0x23   :  { %91 = dma.hbm_to_vmem [thread:$0]  %s12455_s11, 16, %s89_s25, [#allocation12]  }
  0x24   :  { %s9725_s3 = smov [#allocation14]   ;;  %s9726_s4 = smov [#allocation17]  }
  0x25   :  { %s114_s0 = sshll.u32 %s9725_s3, 4  ;;  %s133_s24 = sshll.u32 %s9726_s4, 4  ;;  %s115_s0 = int_to_ptr.vmem [resolvable:$true] %s114_s0  ;;  %s134_s24 = int_to_ptr.vmem [resolvable:$true] %s133_s24 }
  0x26   :  { %s9515_s5 = scalar_lea.vmem %s115_s0, 16  ;;  %s9519_s30 = scalar_lea.vmem %s115_s0, 32 }
  0x27   :  { %p9516_p10 = scmp.ne.s32.totalorder %s115_s0, %s9515_s5  ;;  %p9520_p11 = scmp.lt.s32.totalorder %s115_s0, %s115_s0 }
  0x28   :  { %p9521_p12 = scmp.lt.s32.totalorder %s9519_s30, %s9515_s5 }
  0x2a   :  { %p9522_p13 = por %p9521_p12, %p9520_p11 }
  0x2c   :  { %p9523_p0 = pnand %p9522_p13, %p9516_p10 }
  0x2e   :  { %9526 = shalt.err (!%p9523_p0)
}
  0x2f   :  { %117 = dma.hbm_to_vmem [thread:$0]  %s12461_s17, 16, %s115_s0, [#allocation15]  }
  0x30   :  { %s9535_s2 = scalar_lea.vmem %s134_s24, 8192  ;;  %p9540_p2 = scmp.lt.s32.totalorder %s134_s24, %s134_s24 }
  0x31   :  { %p9536_p1 = scmp.ne.s32.totalorder %s134_s24, %s9535_s2  ;;  %p9541_p3 = scmp.lt.s32.totalorder %s9535_s2, %s9535_s2 }
  0x33   :  { %p9542_p4 = por %p9541_p3, %p9540_p2 }
  0x35   :  { %p9543_p5 = pnand %p9542_p4, %p9536_p1 }
  0x37   :  { %9546 = shalt.err (!%p9543_p5)
}
  0x38   :  { %s9727_s11 = smov 128   ;;  %s9728_s25 = smov 8  }
  0x39   :  { %139 = dma.hbm_to_vmem [thread:$0]  %s12463_s19, 8192, %s134_s24, [#allocation18], %s9727_s11, %s9727_s11, %s9728_s25  }
  0x3a   :  { %s9729_s7 = smov [#allocation20]   ;;  %s9730_s29 = smov [#allocation6]  }
  0x3b   :  { %s158_s28 = sshll.u32 %s9729_s7, 4  ;;  %s41_s3 = sshll.u32 %s9730_s29, 4  ;;  %s159_s28 = int_to_ptr.vmem [resolvable:$true] %s158_s28  ;;  %s42_s3 = int_to_ptr.vmem [resolvable:$true] %s41_s3 }
  0x3c   :  { %s9555_s17 = scalar_lea.vmem %s159_s28, 256  ;;  %p9560_p7 = scmp.lt.s32.totalorder %s159_s28, %s159_s28 }
  0x3d   :  { %p9556_p6 = scmp.ne.s32.totalorder %s159_s28, %s9555_s17  ;;  %p9561_p8 = scmp.lt.s32.totalorder %s9555_s17, %s9555_s17 }
  0x3f   :  { %p9562_p9 = por %p9561_p8, %p9560_p7 }
  0x41   :  { %p9563_p10 = pnand %p9562_p9, %p9556_p6 }
  0x43   :  { %9566 = shalt.err (!%p9563_p10)
}
  0x44   :  { %161 = dma.hbm_to_vmem [thread:$0]  %s12465_s21, 256, %s159_s28, [#allocation21]  }
  0x45   :  { %s9575_s5 = scalar_lea.vmem %s42_s3, 2048  ;;  %p9580_p12 = scmp.lt.s32.totalorder %s42_s3, %s42_s3 }
  0x46   :  { %p9576_p11 = scmp.ne.s32.totalorder %s42_s3, %s9575_s5  ;;  %p9581_p13 = scmp.lt.s32.totalorder %s9575_s5, %s9575_s5 }
  0x48   :  { %p9582_p0 = por %p9581_p13, %p9580_p12 }
  0x4a   :  { %p9583_p1 = pnand %p9582_p0, %p9576_p11 }
  0x4c   :  { %9586 = shalt.err (!%p9583_p1)
}
  0x4d   :  { %s9731_s19 = smov 64   ;;  %s9732_s24 = smov 4  }
  0x4e   :  { %s12601_s26 = sld [smem:[#allocation154_spill]]  ;;  %s9733_s2 = smov [#allocation10]  }
  0x4f   :  { %s73_s11 = sshll.u32 %s9733_s2, 4  ;;  %s74_s11 = int_to_ptr.vmem [resolvable:$true] %s73_s11 }
  0x50   :  { %s9595_s25 = scalar_lea.vmem %s74_s11, 512  ;;  %p9600_p3 = scmp.lt.s32.totalorder %s74_s11, %s74_s11 }
  0x51   :  { %p9596_p2 = scmp.ne.s32.totalorder %s74_s11, %s9595_s25  ;;  %p9601_p4 = scmp.lt.s32.totalorder %s9595_s25, %s9595_s25 }
  0x53   :  { %p9602_p5 = por %p9601_p4, %p9600_p3 }
  0x54   :  { %47 = dma.hbm_to_vmem [thread:$0]  %s12601_s26, 2048, %s42_s3, [#allocation7], %s9731_s19, %s9731_s19, %s9732_s24  }
  0x55   :  { %p9603_p6 = pnand %p9602_p5, %p9596_p2 }
  0x57   :  { %9606 = shalt.err (!%p9603_p6)
}
  0x58   :  { %s9734_s21 = smov 256   ;;  %s9735_s6 = smov 16  }
  0x59   :  { %79 = dma.hbm_to_vmem [thread:$0]  %s12452_s8, 512, %s74_s11, [#allocation9], %s9734_s21, %s9734_s21, %s9735_s6  }
  0x5a   :  { %s9736_s28 = smov [#allocation13]   ;;  %s9737_s3 = smov [#allocation16]  }
  0x5b   :  { %s98_s29 = sshll.u32 %s9736_s28, 4  ;;  %s124_s17 = sshll.u32 %s9737_s3, 4  ;;  %s99_s29 = int_to_ptr.vmem [resolvable:$true] %s98_s29  ;;  %s125_s17 = int_to_ptr.vmem [resolvable:$true] %s124_s17 }
  0x5c   :  { %s9615_s0 = scalar_lea.vmem %s99_s29, 16  ;;  %s9619_s4 = scalar_lea.vmem %s99_s29, 32 }
  0x5d   :  { %p9616_p7 = scmp.ne.s32.totalorder %s99_s29, %s9615_s0  ;;  %p9620_p8 = scmp.lt.s32.totalorder %s99_s29, %s99_s29 }
  0x5e   :  { %p9621_p9 = scmp.lt.s32.totalorder %s9619_s4, %s9615_s0 }
  0x60   :  { %p9622_p10 = por %p9621_p9, %p9620_p8 }
  0x62   :  { %p9623_p11 = pnand %p9622_p10, %p9616_p7 }
  0x64   :  { %9626 = shalt.err (!%p9623_p11)
}
  0x65   :  { %101 = dma.hbm_to_vmem [thread:$0]  %s12456_s12, 16, %s99_s29, [#allocation12]  }
  0x66   :  { %s9635_s30 = scalar_lea.vmem %s125_s17, 16  ;;  %s9639_s8 = scalar_lea.vmem %s125_s17, 32 }
  0x67   :  { %p9636_p12 = scmp.ne.s32.totalorder %s125_s17, %s9635_s30  ;;  %p9640_p13 = scmp.lt.s32.totalorder %s125_s17, %s125_s17 }
  0x68   :  { %p9641_p0 = scmp.lt.s32.totalorder %s9639_s8, %s9635_s30 }
  0x6a   :  { %p9642_p1 = por %p9641_p0, %p9640_p13 }
  0x6c   :  { %p9643_p2 = pnand %p9642_p1, %p9636_p12 }
  0x6e   :  { %9646 = shalt.err (!%p9643_p2)
}
  0x6f   :  { %127 = dma.hbm_to_vmem [thread:$0]  %s12462_s18, 16, %s125_s17, [#allocation15]  }
  0x70   :  { %s9738_s2 = smov [#allocation19]   ;;  %s9739_s25 = smov [#allocation22]  }
  0x71   :  { %s145_s11 = sshll.u32 %s9738_s2, 4  ;;  %s168_s27 = sshll.u32 %s9739_s25, 4  ;;  %s146_s11 = int_to_ptr.vmem [resolvable:$true] %s145_s11  ;;  %s169_s27 = int_to_ptr.vmem [resolvable:$true] %s168_s27 }
  0x72   :  { %s9655_s7 = scalar_lea.vmem %s146_s11, 2048  ;;  %p9660_p4 = scmp.lt.s32.totalorder %s146_s11, %s146_s11 }
  0x73   :  { %p9656_p3 = scmp.ne.s32.totalorder %s146_s11, %s9655_s7  ;;  %p9661_p5 = scmp.lt.s32.totalorder %s9655_s7, %s9655_s7 }
  0x75   :  { %p9662_p6 = por %p9661_p5, %p9660_p4 }
  0x77   :  { %p9663_p7 = pnand %p9662_p6, %p9656_p3 }
  0x79   :  { %9666 = shalt.err (!%p9663_p7)
}
  0x7a   :  { %151 = dma.hbm_to_vmem [thread:$0]  %s12464_s20, 2048, %s146_s11, [#allocation18], %s9734_s21, %s9734_s21, %s9735_s6  }
  0x7b   :  { %s9675_s18 = scalar_lea.vmem %s169_s27, 32  ;;  %p9680_p9 = scmp.lt.s32.totalorder %s169_s27, %s169_s27 }
  0x7c   :  { %p9676_p8 = scmp.ne.s32.totalorder %s169_s27, %s9675_s18  ;;  %p9681_p10 = scmp.lt.s32.totalorder %s9675_s18, %s9675_s18 }
  0x7e   :  { %p9682_p11 = por %p9681_p10, %p9680_p9 }
  0x80   :  { %p9683_p12 = pnand %p9682_p11, %p9676_p8 }
  0x82   :  { %9686 = shalt.err (!%p9683_p12)
}
  0x83   :  { %171 = dma.hbm_to_vmem [thread:$0]  %s12466_s22, 32, %s169_s27, [#allocation21]  }
  0x84   :  { %9707 = dma.done.wait [#allocation7], 2048  }
  0x85   :  { %9708 = vsyncadd [#allocation7], 4294965248 }
  0x86   :  { %9709 = dma.done.wait [#allocation9], 528  }
  0x87   :  { %9710 = vsyncadd [#allocation9], 4294966768 }
  0x88   :  { %9711 = dma.done.wait [#allocation12], 32  }
  0x89   :  { %9712 = vsyncadd [#allocation12], 4294967264 }
  0x8a   :  { %9713 = dma.done.wait [#allocation15], 32  }
  0x8b   :  { %9714 = vsyncadd [#allocation15], 4294967264 }
  0x8c   :  { %9715 = dma.done.wait [#allocation18], 10240  }
  0x8d   :  { %9716 = vsyncadd [#allocation18], 4294957056 }
  0x8e   :  { %9717 = dma.done.wait [#allocation21], 288  }
  0x8f   :  { %9718 = vsyncadd [#allocation21], 4294967008  ;;  %v9912_v0 = vld [vmem:[%s12454_s10] sm:$0xff]  ;;  %v9917_v1 = vld [vmem:[%s12454_s10 + $0x8] sm:$0xff]  ;;  %s12719_s7 = sld [smem:[#allocation153_spill]] }
  0x90   :  { %12602 = vst [vmem:[#allocation36_spill] sm:$0xff] %v9912_v0  ;;  %12603 = vst [vmem:[#allocation37_spill] sm:$0xff] %v9917_v1  ;;  %v9922_v2 = vld [vmem:[%s12454_s10 + $0x10] sm:$0xff]  ;;  %v9927_v3 = vld [vmem:[%s12454_s10 + $0x18] sm:$0xff]  ;;  %s12720_s22 = sld [smem:[#allocation155_spill]] }
  0x91   :  { %12604 = vst [vmem:[#allocation38_spill] sm:$0xff] %v9922_v2  ;;  %12605 = vst [vmem:[#allocation39_spill] sm:$0xff] %v9927_v3  ;;  %v9932_v4 = vld [vmem:[%s12454_s10 + $0x20] sm:$0xff]  ;;  %v9937_v5 = vld [vmem:[%s12454_s10 + $0x28] sm:$0xff] }
  0x92   :  { %12606 = vst [vmem:[#allocation40_spill] sm:$0xff] %v9932_v4  ;;  %12607 = vst [vmem:[#allocation41_spill] sm:$0xff] %v9937_v5  ;;  %v9942_v6 = vld [vmem:[%s12454_s10 + $0x30] sm:$0xff]  ;;  %v9947_v7 = vld [vmem:[%s12454_s10 + $0x38] sm:$0xff] }
  0x93   :  { %12608 = vst [vmem:[#allocation42_spill] sm:$0xff] %v9942_v6  ;;  %12609 = vst [vmem:[#allocation43_spill] sm:$0xff] %v9947_v7  ;;  %v9952_v8 = vld [vmem:[%s12454_s10 + $0x40] sm:$0xff]  ;;  %v9957_v9 = vld [vmem:[%s12454_s10 + $0x48] sm:$0xff] }
  0x94   :  { %12610 = vst [vmem:[#allocation44_spill] sm:$0xff] %v9952_v8  ;;  %v9962_v10 = vld [vmem:[%s12454_s10 + $0x50] sm:$0xff]  ;;  %v9967_v11 = vld [vmem:[%s12454_s10 + $0x58] sm:$0xff]  ;;  %v9972_v12 = vld [vmem:[%s12454_s10 + $0x60] sm:$0xff] }
  0x95   :  { %v9977_v13 = vld [vmem:[%s12454_s10 + $0x68] sm:$0xff]  ;;  %v9982_v14 = vld [vmem:[%s12454_s10 + $0x70] sm:$0xff]  ;;  %v9987_v15 = vld [vmem:[%s12454_s10 + $0x78] sm:$0xff] }
  0x96   :  { %v9992_v16 = vld [vmem:[%s12454_s10 + $0x80] sm:$0xff]  ;;  %v9997_v17 = vld [vmem:[%s12454_s10 + $0x88] sm:$0xff]  ;;  %v10002_v18 = vld [vmem:[%s12454_s10 + $0x90] sm:$0xff] }
  0x97   :  { %12611 = vst [vmem:[#allocation45_spill] sm:$0xff] %v9992_v16  ;;  %12612 = vst [vmem:[#allocation46_spill] sm:$0xff] %v9997_v17  ;;  %v10007_v19 = vld [vmem:[%s12454_s10 + $0x98] sm:$0xff]  ;;  %v10012_v20 = vld [vmem:[%s12454_s10 + $0xa0] sm:$0xff] }
  0x98   :  { %12613 = vst [vmem:[#allocation47_spill] sm:$0xff] %v10002_v18  ;;  %12614 = vst [vmem:[#allocation48_spill] sm:$0xff] %v10007_v19  ;;  %v10017_v21 = vld [vmem:[%s12454_s10 + $0xa8] sm:$0xff]  ;;  %v10022_v22 = vld [vmem:[%s12454_s10 + $0xb0] sm:$0xff] }
  0x99   :  { %12615 = vst [vmem:[#allocation49_spill] sm:$0xff] %v10012_v20  ;;  %12616 = vst [vmem:[#allocation50_spill] sm:$0xff] %v10017_v21  ;;  %v10027_v23 = vld [vmem:[%s12454_s10 + $0xb8] sm:$0xff]  ;;  %v10032_v24 = vld [vmem:[%s12454_s10 + $0xc0] sm:$0xff] }
  0x9a   :  { %12617 = vst [vmem:[#allocation51_spill] sm:$0xff] %v10022_v22  ;;  %12618 = vst [vmem:[#allocation52_spill] sm:$0xff] %v10027_v23  ;;  %v10037_v25 = vld [vmem:[%s12454_s10 + $0xc8] sm:$0xff]  ;;  %v10042_v26 = vld [vmem:[%s12454_s10 + $0xd0] sm:$0xff] }
  0x9b   :  { %12619 = vst [vmem:[#allocation53_spill] sm:$0xff] %v10032_v24  ;;  %12620 = vst [vmem:[#allocation54_spill] sm:$0xff] %v10037_v25  ;;  %v10047_v27 = vld [vmem:[%s12454_s10 + $0xd8] sm:$0xff]  ;;  %v10052_v28 = vld [vmem:[%s12454_s10 + $0xe0] sm:$0xff] }
  0x9c   :  { %12621 = vst [vmem:[#allocation55_spill] sm:$0xff] %v10042_v26  ;;  %12622 = vst [vmem:[#allocation56_spill] sm:$0xff] %v10047_v27  ;;  %v10057_v29 = vld [vmem:[%s12454_s10 + $0xe8] sm:$0xff]  ;;  %v10062_v30 = vld [vmem:[%s12454_s10 + $0xf0] sm:$0xff] }
  0x9d   :  { %12623 = vst [vmem:[#allocation57_spill] sm:$0xff] %v10052_v28  ;;  %12624 = vst [vmem:[#allocation58_spill] sm:$0xff] %v10057_v29  ;;  %v10067_v31 = vld [vmem:[%s12454_s10 + $0xf8] sm:$0xff]  ;;  %v10072_v32 = vld [vmem:[%s12454_s10 + $0x100] sm:$0xff] }
  0x9e   :  { %12625 = vst [vmem:[#allocation59_spill] sm:$0xff] %v10062_v30  ;;  %12626 = vst [vmem:[#allocation60_spill] sm:$0xff] %v10067_v31  ;;  %v10077_v33 = vld [vmem:[%s12454_s10 + $0x108] sm:$0xff]  ;;  %v10082_v34 = vld [vmem:[%s12454_s10 + $0x110] sm:$0xff] }
  0x9f   :  { %12627 = vst [vmem:[#allocation61_spill] sm:$0xff] %v10072_v32  ;;  %12628 = vst [vmem:[#allocation62_spill] sm:$0xff] %v10077_v33  ;;  %v10087_v35 = vld [vmem:[%s12454_s10 + $0x118] sm:$0xff]  ;;  %v10092_v36 = vld [vmem:[%s12454_s10 + $0x120] sm:$0xff] }
  0xa0   :  { %12629 = vst [vmem:[#allocation63_spill] sm:$0xff] %v10082_v34  ;;  %12630 = vst [vmem:[#allocation64_spill] sm:$0xff] %v10087_v35  ;;  %v10097_v37 = vld [vmem:[%s12454_s10 + $0x128] sm:$0xff]  ;;  %v10102_v38 = vld [vmem:[%s12454_s10 + $0x130] sm:$0xff] }
  0xa1   :  { %12631 = vst [vmem:[#allocation65_spill] sm:$0xff] %v10092_v36  ;;  %12632 = vst [vmem:[#allocation66_spill] sm:$0xff] %v10097_v37  ;;  %v10107_v39 = vld [vmem:[%s12454_s10 + $0x138] sm:$0xff]  ;;  %v10112_v40 = vld [vmem:[%s12454_s10 + $0x140] sm:$0xff] }
  0xa2   :  { %12633 = vst [vmem:[#allocation67_spill] sm:$0xff] %v10102_v38  ;;  %12634 = vst [vmem:[#allocation68_spill] sm:$0xff] %v10107_v39  ;;  %v10117_v41 = vld [vmem:[%s12454_s10 + $0x148] sm:$0xff]  ;;  %v10122_v42 = vld [vmem:[%s12454_s10 + $0x150] sm:$0xff] }
  0xa3   :  { %12635 = vst [vmem:[#allocation69_spill] sm:$0xff] %v10112_v40  ;;  %12636 = vst [vmem:[#allocation70_spill] sm:$0xff] %v10117_v41  ;;  %v10127_v43 = vld [vmem:[%s12454_s10 + $0x158] sm:$0xff]  ;;  %v10132_v44 = vld [vmem:[%s12454_s10 + $0x160] sm:$0xff] }
  0xa4   :  { %12637 = vst [vmem:[#allocation71_spill] sm:$0xff] %v10122_v42  ;;  %12638 = vst [vmem:[#allocation72_spill] sm:$0xff] %v10127_v43  ;;  %v10137_v45 = vld [vmem:[%s12454_s10 + $0x168] sm:$0xff]  ;;  %v10142_v46 = vld [vmem:[%s12454_s10 + $0x170] sm:$0xff] }
  0xa5   :  { %v10147_v47 = vld [vmem:[%s12454_s10 + $0x178] sm:$0xff]  ;;  %v10152_v48 = vld [vmem:[%s12454_s10 + $0x180] sm:$0xff]  ;;  %v10157_v49 = vld [vmem:[%s12454_s10 + $0x188] sm:$0xff] }
  0xa6   :  { %12639 = vst [vmem:[#allocation73_spill] sm:$0xff] %v10152_v48  ;;  %12640 = vst [vmem:[#allocation74_spill] sm:$0xff] %v10157_v49  ;;  %v10162_v50 = vld [vmem:[%s12454_s10 + $0x190] sm:$0xff]  ;;  %v10167_v51 = vld [vmem:[%s12454_s10 + $0x198] sm:$0xff] }
  0xa7   :  { %12641 = vst [vmem:[#allocation75_spill] sm:$0xff] %v10162_v50  ;;  %12642 = vst [vmem:[#allocation76_spill] sm:$0xff] %v10167_v51  ;;  %v10172_v52 = vld [vmem:[%s12454_s10 + $0x1a0] sm:$0xff]  ;;  %v10177_v53 = vld [vmem:[%s12454_s10 + $0x1a8] sm:$0xff] }
  0xa8   :  { %12643 = vst [vmem:[#allocation77_spill] sm:$0xff] %v10172_v52  ;;  %12644 = vst [vmem:[#allocation78_spill] sm:$0xff] %v10177_v53  ;;  %v10182_v54 = vld [vmem:[%s12454_s10 + $0x1b0] sm:$0xff]  ;;  %v10187_v55 = vld [vmem:[%s12454_s10 + $0x1b8] sm:$0xff]  ;;  %v12543_v53 = vmov 0  }
  0xa9   :  { %12645 = vst [vmem:[#allocation79_spill] sm:$0xff] %v10182_v54  ;;  %12646 = vst [vmem:[#allocation80_spill] sm:$0xff] %v10187_v55  ;;  %v10192_v56 = vld [vmem:[%s12454_s10 + $0x1c0] sm:$0xff]  ;;  %v10197_v57 = vld [vmem:[%s12454_s10 + $0x1c8] sm:$0xff]  ;;  %899 = vmatprep.mubr.bf16.mxu0 %v12543_v53 }
  0xaa   :  { %12647 = vst [vmem:[#allocation81_spill] sm:$0xff] %v10192_v56  ;;  %12648 = vst [vmem:[#allocation82_spill] sm:$0xff] %v10197_v57  ;;  %v10202_v58 = vld [vmem:[%s12454_s10 + $0x1d0] sm:$0xff]  ;;  %v10207_v59 = vld [vmem:[%s12454_s10 + $0x1d8] sm:$0xff] }
  0xab   :  { %12649 = vst [vmem:[#allocation83_spill] sm:$0xff] %v10202_v58  ;;  %12650 = vst [vmem:[#allocation84_spill] sm:$0xff] %v10207_v59  ;;  %v10212_v60 = vld [vmem:[%s12454_s10 + $0x1e0] sm:$0xff]  ;;  %v10217_v61 = vld [vmem:[%s12454_s10 + $0x1e8] sm:$0xff] }
  0xac   :  { %12651 = vst [vmem:[#allocation85_spill] sm:$0xff] %v10212_v60  ;;  %12652 = vst [vmem:[#allocation86_spill] sm:$0xff] %v10217_v61  ;;  %v10222_v62 = vld [vmem:[%s12454_s10 + $0x1f0] sm:$0xff]  ;;  %v10227_v63 = vld [vmem:[%s12454_s10 + $0x1f8] sm:$0xff] }
  0xad   :  { %12653 = vst [vmem:[#allocation87_spill] sm:$0xff] %v10222_v62  ;;  %12654 = vst [vmem:[#allocation88_spill] sm:$0xff] %v10227_v63  ;;  %v10232_v48 = vld [vmem:[%s12454_s10 + $0x200] sm:$0xff]  ;;  %v10237_v49 = vld [vmem:[%s12454_s10 + $0x208] sm:$0xff] }
  0xae   :  { %12655 = vst [vmem:[#allocation89_spill] sm:$0xff] %v10232_v48  ;;  %12656 = vst [vmem:[#allocation90_spill] sm:$0xff] %v10237_v49  ;;  %v10242_v50 = vld [vmem:[%s12454_s10 + $0x210] sm:$0xff]  ;;  %v10247_v51 = vld [vmem:[%s12454_s10 + $0x218] sm:$0xff] }
  0xaf   :  { %12657 = vst [vmem:[#allocation91_spill] sm:$0xff] %v10242_v50  ;;  %12658 = vst [vmem:[#allocation92_spill] sm:$0xff] %v10247_v51  ;;  %v10252_v52 = vld [vmem:[%s12454_s10 + $0x220] sm:$0xff]  ;;  %v10257_v48 = vld [vmem:[%s12454_s10 + $0x228] sm:$0xff] }
  0xb0   :  { %12659 = vst [vmem:[#allocation93_spill] sm:$0xff] %v10252_v52  ;;  %12660 = vst [vmem:[#allocation94_spill] sm:$0xff] %v10257_v48  ;;  %v10262_v49 = vld [vmem:[%s12454_s10 + $0x230] sm:$0xff]  ;;  %v10267_v50 = vld [vmem:[%s12454_s10 + $0x238] sm:$0xff] }
  0xb1   :  { %12661 = vst [vmem:[#allocation95_spill] sm:$0xff] %v10262_v49  ;;  %12662 = vst [vmem:[#allocation96_spill] sm:$0xff] %v10267_v50  ;;  %v10272_v51 = vld [vmem:[%s12454_s10 + $0x240] sm:$0xff]  ;;  %v10277_v52 = vld [vmem:[%s12454_s10 + $0x248] sm:$0xff] }
  0xb2   :  { %12663 = vst [vmem:[#allocation97_spill] sm:$0xff] %v10272_v51  ;;  %12664 = vst [vmem:[#allocation98_spill] sm:$0xff] %v10277_v52  ;;  %v10282_v48 = vld [vmem:[%s12454_s10 + $0x250] sm:$0xff]  ;;  %v10287_v49 = vld [vmem:[%s12454_s10 + $0x258] sm:$0xff] }
  0xb3   :  { %12665 = vst [vmem:[#allocation99_spill] sm:$0xff] %v10282_v48  ;;  %12666 = vst [vmem:[#allocation100_spill] sm:$0xff] %v10287_v49  ;;  %v10292_v50 = vld [vmem:[%s12454_s10 + $0x260] sm:$0xff]  ;;  %v10297_v51 = vld [vmem:[%s12454_s10 + $0x268] sm:$0xff] }
  0xb4   :  { %12667 = vst [vmem:[#allocation101_spill] sm:$0xff] %v10292_v50  ;;  %12668 = vst [vmem:[#allocation102_spill] sm:$0xff] %v10297_v51  ;;  %v10302_v52 = vld [vmem:[%s12454_s10 + $0x270] sm:$0xff]  ;;  %v10307_v48 = vld [vmem:[%s12454_s10 + $0x278] sm:$0xff] }
  0xb5   :  { %12669 = vst [vmem:[#allocation103_spill] sm:$0xff] %v10302_v52  ;;  %12670 = vst [vmem:[#allocation104_spill] sm:$0xff] %v10307_v48  ;;  %v10312_v49 = vld [vmem:[%s12454_s10 + $0x280] sm:$0xff]  ;;  %v10317_v50 = vld [vmem:[%s12454_s10 + $0x288] sm:$0xff] }
  0xb6   :  { %12671 = vst [vmem:[#allocation105_spill] sm:$0xff] %v10312_v49  ;;  %12672 = vst [vmem:[#allocation106_spill] sm:$0xff] %v10317_v50  ;;  %v10322_v51 = vld [vmem:[%s12454_s10 + $0x290] sm:$0xff]  ;;  %v10327_v52 = vld [vmem:[%s12454_s10 + $0x298] sm:$0xff] }
  0xb7   :  { %12673 = vst [vmem:[#allocation107_spill] sm:$0xff] %v10322_v51  ;;  %12674 = vst [vmem:[#allocation108_spill] sm:$0xff] %v10327_v52  ;;  %v10332_v48 = vld [vmem:[%s12454_s10 + $0x2a0] sm:$0xff]  ;;  %v10337_v49 = vld [vmem:[%s12454_s10 + $0x2a8] sm:$0xff] }
  0xb8   :  { %12675 = vst [vmem:[#allocation109_spill] sm:$0xff] %v10332_v48  ;;  %12676 = vst [vmem:[#allocation110_spill] sm:$0xff] %v10337_v49  ;;  %v10342_v50 = vld [vmem:[%s12454_s10 + $0x2b0] sm:$0xff]  ;;  %v10347_v51 = vld [vmem:[%s12454_s10 + $0x2b8] sm:$0xff] }
  0xb9   :  { %12677 = vst [vmem:[#allocation111_spill] sm:$0xff] %v10342_v50  ;;  %12678 = vst [vmem:[#allocation112_spill] sm:$0xff] %v10347_v51  ;;  %v10352_v52 = vld [vmem:[%s12454_s10 + $0x2c0] sm:$0xff]  ;;  %v10357_v48 = vld [vmem:[%s12454_s10 + $0x2c8] sm:$0xff] }
  0xba   :  { %12679 = vst [vmem:[#allocation113_spill] sm:$0xff] %v10352_v52  ;;  %12680 = vst [vmem:[#allocation114_spill] sm:$0xff] %v10357_v48  ;;  %v10362_v49 = vld [vmem:[%s12454_s10 + $0x2d0] sm:$0xff]  ;;  %v10367_v50 = vld [vmem:[%s12454_s10 + $0x2d8] sm:$0xff] }
  0xbb   :  { %12681 = vst [vmem:[#allocation115_spill] sm:$0xff] %v10362_v49  ;;  %12682 = vst [vmem:[#allocation116_spill] sm:$0xff] %v10367_v50  ;;  %v10372_v51 = vld [vmem:[%s12454_s10 + $0x2e0] sm:$0xff]  ;;  %v10377_v52 = vld [vmem:[%s12454_s10 + $0x2e8] sm:$0xff] }
  0xbc   :  { %12683 = vst [vmem:[#allocation117_spill] sm:$0xff] %v10372_v51  ;;  %12684 = vst [vmem:[#allocation118_spill] sm:$0xff] %v10377_v52  ;;  %v10382_v48 = vld [vmem:[%s12454_s10 + $0x2f0] sm:$0xff]  ;;  %v10387_v49 = vld [vmem:[%s12454_s10 + $0x2f8] sm:$0xff] }
  0xbd   :  { %12685 = vst [vmem:[#allocation119_spill] sm:$0xff] %v10382_v48  ;;  %12686 = vst [vmem:[#allocation120_spill] sm:$0xff] %v10387_v49  ;;  %v10392_v50 = vld [vmem:[%s12454_s10 + $0x300] sm:$0xff]  ;;  %v10397_v51 = vld [vmem:[%s12454_s10 + $0x308] sm:$0xff] }
  0xbe   :  { %12687 = vst [vmem:[#allocation121_spill] sm:$0xff] %v10392_v50  ;;  %12688 = vst [vmem:[#allocation122_spill] sm:$0xff] %v10397_v51  ;;  %v10402_v52 = vld [vmem:[%s12454_s10 + $0x310] sm:$0xff]  ;;  %v10407_v48 = vld [vmem:[%s12454_s10 + $0x318] sm:$0xff] }
  0xbf   :  { %12689 = vst [vmem:[#allocation123_spill] sm:$0xff] %v10402_v52  ;;  %12690 = vst [vmem:[#allocation124_spill] sm:$0xff] %v10407_v48  ;;  %v10412_v49 = vld [vmem:[%s12454_s10 + $0x320] sm:$0xff]  ;;  %v10417_v50 = vld [vmem:[%s12454_s10 + $0x328] sm:$0xff] }
  0xc0   :  { %12691 = vst [vmem:[#allocation125_spill] sm:$0xff] %v10412_v49  ;;  %12692 = vst [vmem:[#allocation126_spill] sm:$0xff] %v10417_v50  ;;  %v10422_v51 = vld [vmem:[%s12454_s10 + $0x330] sm:$0xff]  ;;  %v10427_v52 = vld [vmem:[%s12454_s10 + $0x338] sm:$0xff] }
  0xc1   :  { %12693 = vst [vmem:[#allocation127_spill] sm:$0xff] %v10422_v51  ;;  %12694 = vst [vmem:[#allocation128_spill] sm:$0xff] %v10427_v52  ;;  %v10432_v48 = vld [vmem:[%s12454_s10 + $0x340] sm:$0xff]  ;;  %v10437_v49 = vld [vmem:[%s12454_s10 + $0x348] sm:$0xff] }
  0xc2   :  { %12695 = vst [vmem:[#allocation129_spill] sm:$0xff] %v10432_v48  ;;  %12696 = vst [vmem:[#allocation130_spill] sm:$0xff] %v10437_v49  ;;  %v10442_v50 = vld [vmem:[%s12454_s10 + $0x350] sm:$0xff]  ;;  %v10447_v51 = vld [vmem:[%s12454_s10 + $0x358] sm:$0xff] }
  0xc3   :  { %12697 = vst [vmem:[#allocation131_spill] sm:$0xff] %v10442_v50  ;;  %12698 = vst [vmem:[#allocation132_spill] sm:$0xff] %v10447_v51  ;;  %v10452_v52 = vld [vmem:[%s12454_s10 + $0x360] sm:$0xff]  ;;  %v10457_v48 = vld [vmem:[%s12454_s10 + $0x368] sm:$0xff] }
  0xc4   :  { %12699 = vst [vmem:[#allocation133_spill] sm:$0xff] %v10452_v52  ;;  %12700 = vst [vmem:[#allocation134_spill] sm:$0xff] %v10457_v48  ;;  %v10462_v49 = vld [vmem:[%s12454_s10 + $0x370] sm:$0xff]  ;;  %v10467_v50 = vld [vmem:[%s12454_s10 + $0x378] sm:$0xff] }
  0xc5   :  { %12701 = vst [vmem:[#allocation135_spill] sm:$0xff] %v10462_v49  ;;  %12702 = vst [vmem:[#allocation136_spill] sm:$0xff] %v10467_v50  ;;  %v10472_v51 = vld [vmem:[%s12454_s10 + $0x380] sm:$0xff]  ;;  %v10477_v52 = vld [vmem:[%s12454_s10 + $0x388] sm:$0xff] }
  0xc6   :  { %12703 = vst [vmem:[#allocation137_spill] sm:$0xff] %v10472_v51  ;;  %12704 = vst [vmem:[#allocation138_spill] sm:$0xff] %v10477_v52  ;;  %v10482_v48 = vld [vmem:[%s12454_s10 + $0x390] sm:$0xff]  ;;  %v10487_v49 = vld [vmem:[%s12454_s10 + $0x398] sm:$0xff] }
  0xc7   :  { %12705 = vst [vmem:[#allocation139_spill] sm:$0xff] %v10482_v48  ;;  %12706 = vst [vmem:[#allocation140_spill] sm:$0xff] %v10487_v49  ;;  %v10492_v50 = vld [vmem:[%s12454_s10 + $0x3a0] sm:$0xff]  ;;  %v10497_v51 = vld [vmem:[%s12454_s10 + $0x3a8] sm:$0xff] }
  0xc8   :  { %12707 = vst [vmem:[#allocation141_spill] sm:$0xff] %v10492_v50  ;;  %12708 = vst [vmem:[#allocation142_spill] sm:$0xff] %v10497_v51  ;;  %v10502_v52 = vld [vmem:[%s12454_s10 + $0x3b0] sm:$0xff]  ;;  %v10507_v48 = vld [vmem:[%s12454_s10 + $0x3b8] sm:$0xff] }
  0xc9   :  { %12709 = vst [vmem:[#allocation143_spill] sm:$0xff] %v10502_v52  ;;  %12710 = vst [vmem:[#allocation144_spill] sm:$0xff] %v10507_v48  ;;  %v10512_v49 = vld [vmem:[%s12454_s10 + $0x3c0] sm:$0xff]  ;;  %v10517_v50 = vld [vmem:[%s12454_s10 + $0x3c8] sm:$0xff] }
  0xca   :  { %12711 = vst [vmem:[#allocation145_spill] sm:$0xff] %v10512_v49  ;;  %12712 = vst [vmem:[#allocation146_spill] sm:$0xff] %v10517_v50  ;;  %v10522_v51 = vld [vmem:[%s12454_s10 + $0x3d0] sm:$0xff]  ;;  %v10527_v52 = vld [vmem:[%s12454_s10 + $0x3d8] sm:$0xff] }
  0xcb   :  { %12713 = vst [vmem:[#allocation147_spill] sm:$0xff] %v10522_v51  ;;  %12714 = vst [vmem:[#allocation148_spill] sm:$0xff] %v10527_v52  ;;  %v10532_v48 = vld [vmem:[%s12454_s10 + $0x3e0] sm:$0xff]  ;;  %v10537_v49 = vld [vmem:[%s12454_s10 + $0x3e8] sm:$0xff] }
  0xcc   :  { %12715 = vst [vmem:[#allocation149_spill] sm:$0xff] %v10532_v48  ;;  %12716 = vst [vmem:[#allocation150_spill] sm:$0xff] %v10537_v49  ;;  %v10542_v50 = vld [vmem:[%s12454_s10 + $0x3f0] sm:$0xff]  ;;  %v10547_v51 = vld [vmem:[%s12454_s10 + $0x3f8] sm:$0xff] }
  0xcd   :  { %12717 = vst [vmem:[#allocation151_spill] sm:$0xff] %v10542_v50  ;;  %12718 = vst [vmem:[#allocation152_spill] sm:$0xff] %v10547_v51  ;;  %v8827_v52 = vld [vmem:[%s12719_s7 + $0x74] ss:$8 sps:$4 sm:$0xff]   ;;  %v8829_v48 = vld [vmem:[%s12719_s7 + $0x70] ss:$8 sps:$4 sm:$0xff]  }
  0xce   :  { %867 = vmatprep.subr.bf16.mxu0 %v8827_v52  ;;  %v8830_v49 = vld [vmem:[%s12719_s7 + $0x64] ss:$8 sps:$4 sm:$0xff]   ;;  %v8832_v50 = vld [vmem:[%s12719_s7 + $0x60] ss:$8 sps:$4 sm:$0xff]   ;;  %v8833_v51 = vld [vmem:[%s12719_s7 + $0x54] ss:$8 sps:$4 sm:$0xff]  }
  0xcf   :  { %868 = vmatpush1.bf16.msra.mxu0 %v8829_v48  ;;  %v8835_v53 = vld [vmem:[%s12719_s7 + $0x50] ss:$8 sps:$4 sm:$0xff]   ;;  %v8836_v52 = vld [vmem:[%s12719_s7 + $0x44] ss:$8 sps:$4 sm:$0xff]   ;;  %v8838_v48 = vld [vmem:[%s12719_s7 + $0x40] ss:$8 sps:$4 sm:$0xff]  }
  0xd0   :  { %869 = vmatprep.subr.bf16.mxu0 %v8830_v49  ;;  %v8839_v49 = vld [vmem:[%s12719_s7 + $0x34] ss:$8 sps:$4 sm:$0xff]   ;;  %v8871_v16 = vld [vmem:[%s12720_s22 + $0x60] ss:$8 sps:$4 sm:$0xff]   ;;  %v8893_v55 = vld [vmem:[%s12720_s22 + $0xf0] ss:$8 sps:$4 sm:$0xff]  }
  0xd1   :  { %v8851_v17 = vld [vmem:[#allocation6] sm:$0xff]   ;;  %v8873_v54 = vld [vmem:[%s12720_s22 + $0x54] ss:$8 sps:$4 sm:$0xff]  }
  0xd3   :  { %870 = vmatpush1.bf16.msra.mxu0 %v8832_v50  ;;  %v8841_v50 = vld [vmem:[%s12719_s7 + $0x30] ss:$8 sps:$4 sm:$0xff]  }
  0xd4   :  { %871 = vmatprep.subr.bf16.mxu0 %v8833_v51  ;;  %v8842_v51 = vld [vmem:[%s12719_s7 + $0x24] ss:$8 sps:$4 sm:$0xff]  }
  0xd7   :  { %872 = vmatpush1.bf16.msra.mxu0 %v8835_v53  ;;  %v8844_v53 = vld [vmem:[%s12719_s7 + $0x20] ss:$8 sps:$4 sm:$0xff]  }
  0xd8   :  { %873 = vmatprep.subr.bf16.mxu0 %v8836_v52  ;;  %v8845_v52 = vld [vmem:[%s12719_s7 + $0x14] ss:$8 sps:$4 sm:$0xff]  }
  0xdb   :  { %874 = vmatpush1.bf16.msra.mxu0 %v8838_v48  ;;  %v8847_v48 = vld [vmem:[%s12719_s7 + $0x10] ss:$8 sps:$4 sm:$0xff]  }
  0xdc   :  { %875 = vmatprep.subr.bf16.mxu0 %v8839_v49  ;;  %v8848_v49 = vld [vmem:[%s12719_s7 + $0x4] ss:$8 sps:$4 sm:$0xff]  }
  0xdf   :  { %876 = vmatpush1.bf16.msra.mxu0 %v8841_v50  ;;  %v8850_v50 = vld [vmem:[%s12719_s7] ss:$8 sps:$4 sm:$0xff]  }
  0xe0   :  { %877 = vmatprep.subr.bf16.mxu0 %v8842_v51  ;;  %v8866_v51 = vld [vmem:[%s12720_s22 + $0x74] ss:$8 sps:$4 sm:$0xff]  }
  0xe1   :  { %2116 = vmatprep.subr.bf16.mxu1 %v8866_v51  ;;  %v12721_v51 = vmov 0  }
  0xe3   :  { %878 = vmatpush1.bf16.msra.mxu0 %v8844_v53  ;;  %v8868_v53 = vld [vmem:[%s12720_s22 + $0x70] ss:$8 sps:$4 sm:$0xff]  }
  0xe4   :  { %879 = vmatprep.subr.bf16.mxu0 %v8845_v52  ;;  %v8869_v52 = vld [vmem:[%s12720_s22 + $0x64] ss:$8 sps:$4 sm:$0xff]   ;;  %2117 = vmatpush1.bf16.msra.mxu1 %v8868_v53  ;;  %v8878_v53 = vld [vmem:[%s12720_s22 + $0x40] ss:$8 sps:$4 sm:$0xff]  }
  0xe5   :  { %2118 = vmatprep.subr.bf16.mxu1 %v8869_v52  ;;  %v8852_v52 = vld [vmem:[#allocation6 + $0x8] sm:$0xff]  }
  0xe7   :  { %880 = vmatpush1.bf16.msra.mxu0 %v8847_v48  ;;  %v8875_v48 = vld [vmem:[%s12720_s22 + $0x50] ss:$8 sps:$4 sm:$0xff]  }
  0xe8   :  { %881 = vmatprep.subr.bf16.mxu0 %v8848_v49  ;;  %2119 = vmatpush1.bf16.msra.mxu1 %v8871_v16  ;;  %v8876_v49 = vld [vmem:[%s12720_s22 + $0x44] ss:$8 sps:$4 sm:$0xff]   ;;  %v8879_v16 = vld [vmem:[%s12720_s22 + $0x34] ss:$8 sps:$4 sm:$0xff]  }
  0xe9   :  { %2120 = vmatprep.subr.bf16.mxu1 %v8873_v54  ;;  %v8882_v54 = vld [vmem:[%s12720_s22 + $0x24] ss:$8 sps:$4 sm:$0xff]  }
  0xeb   :  { %882 = vmatpush1.bf16.msra.mxu0 %v8850_v50  ;;  %v8853_v50 = vld [vmem:[#allocation6 + $0x10] sm:$0xff]  }
  0xec   :  { %2121 = vmatpush1.bf16.msra.mxu1 %v8875_v48  ;;  %v8884_v48 = vld [vmem:[%s12720_s22 + $0x20] ss:$8 sps:$4 sm:$0xff]  }
  0xed   :  { %2122 = vmatprep.subr.bf16.mxu1 %v8876_v49  ;;  %v8885_v49 = vld [vmem:[%s12720_s22 + $0x14] ss:$8 sps:$4 sm:$0xff]  }
  0xee   :  { %900 = vmatmul.mubr.bf16.vlgmr.msra.gmra.mxu0 %v8851_v17  ;;  %v8881_v17 = vld [vmem:[%s12720_s22 + $0x30] ss:$8 sps:$4 sm:$0xff]  }
  0xef   :  { %909 = vmatprep.mubr.bf16.mxu0 %v12721_v51 }
  0xf0   :  { %2123 = vmatpush1.bf16.msra.mxu1 %v8878_v53  ;;  %v8887_v53 = vld [vmem:[%s12720_s22 + $0x10] ss:$8 sps:$4 sm:$0xff]  }
  0xf1   :  { %2124 = vmatprep.subr.bf16.mxu1 %v8879_v16  ;;  %v8890_v16 = vld [vmem:[%s12720_s22] ss:$8 sps:$4 sm:$0xff]  }
  0xf4   :  { %2125 = vmatpush1.bf16.msra.mxu1 %v8881_v17  ;;  %v8854_v17 = vld [vmem:[#allocation6 + $0x18] sm:$0xff]  }
  0xf5   :  { %2126 = vmatprep.subr.bf16.mxu1 %v8882_v54  ;;  %v8891_v54 = vld [vmem:[%s12720_s22 + $0xf4] ss:$8 sps:$4 sm:$0xff]  }
  0xf6   :  { %910 = vmatmul.mubr.bf16.gmra.mxu0 %v8852_v52  ;;  %v8888_v52 = vld [vmem:[%s12720_s22 + $0x4] ss:$8 sps:$4 sm:$0xff]  }
  0xf7   :  { %919 = vmatprep.mubr.bf16.mxu0 %v12721_v51 }
  0xf8   :  { %2127 = vmatpush1.bf16.msra.mxu1 %v8884_v48  ;;  %v8896_v48 = vld [vmem:[%s12720_s22 + $0xe0] ss:$8 sps:$4 sm:$0xff]  }
  0xf9   :  { %2128 = vmatprep.subr.bf16.mxu1 %v8885_v49  ;;  %v8855_v49 = vld [vmem:[#allocation6 + $0x20] sm:$0xff]  }
  0xfc   :  { %2129 = vmatpush1.bf16.msra.mxu1 %v8887_v53  ;;  %v8897_v53 = vld [vmem:[%s12720_s22 + $0xd4] ss:$8 sps:$4 sm:$0xff]  }
  0xfd   :  { %2130 = vmatprep.subr.bf16.mxu1 %v8888_v52  ;;  %v8899_v52 = vld [vmem:[%s12720_s22 + $0xd0] ss:$8 sps:$4 sm:$0xff]  }
  0xfe   :  { %920 = vmatmul.mubr.bf16.gmra.mxu0 %v8853_v50  ;;  %v8894_v50 = vld [vmem:[%s12720_s22 + $0xe4] ss:$8 sps:$4 sm:$0xff]  }
  0xff   :  { %929 = vmatprep.mubr.bf16.mxu0 %v12721_v51 }
 0x100   :  { %2131 = vmatpush1.bf16.msra.mxu1 %v8890_v16  ;;  %v8900_v16 = vld [vmem:[%s12720_s22 + $0xc4] ss:$8 sps:$4 sm:$0xff]  }
 0x101   :  { %2132 = vmatprep.subr.bf16.mxu1 %v8891_v54  ;;  %v8856_v54 = vld [vmem:[#allocation6 + $0x28] sm:$0xff]  }
 0x104   :  { %2133 = vmatpush2.bf16.msra.mxu1 %v8893_v55  ;;  %v8903_v55 = vld [vmem:[%s12720_s22 + $0xb4] ss:$8 sps:$4 sm:$0xff]  }
 0x105   :  { %2134 = vmatprep.subr.bf16.mxu1 %v8894_v50  ;;  %v8905_v50 = vld [vmem:[%s12720_s22 + $0xb0] ss:$8 sps:$4 sm:$0xff]  }
 0x106   :  { %930 = vmatmul.mubr.bf16.gmra.mxu0 %v8854_v17  ;;  %v8902_v17 = vld [vmem:[%s12720_s22 + $0xc0] ss:$8 sps:$4 sm:$0xff]  }
 0x107   :  { %939 = vmatprep.mubr.bf16.mxu0 %v12721_v51 }
 0x108   :  { %2135 = vmatpush2.bf16.msra.mxu1 %v8896_v48  ;;  %v8906_v48 = vld [vmem:[%s12720_s22 + $0xa4] ss:$8 sps:$4 sm:$0xff]  }
 0x109   :  { %2136 = vmatprep.subr.bf16.mxu1 %v8897_v53  ;;  %v8857_v53 = vld [vmem:[#allocation6 + $0x30] sm:$0xff]  }
 0x10c   :  { %2137 = vmatpush2.bf16.msra.mxu1 %v8899_v52  ;;  %v8858_v52 = vld [vmem:[#allocation6 + $0x38] sm:$0xff]  }
 0x10d   :  { %2138 = vmatprep.subr.bf16.mxu1 %v8900_v16  ;;  %v8859_v16 = vld [vmem:[#allocation6 + $0x40] sm:$0xff]  }
 0x10e   :  { %940 = vmatmul.mubr.bf16.gmra.mxu0 %v8855_v49  ;;  %v8908_v49 = vld [vmem:[%s12720_s22 + $0xa0] ss:$8 sps:$4 sm:$0xff]  }
 0x10f   :  { %949 = vmatprep.mubr.bf16.mxu0 %v12721_v51 }
 0x110   :  { %2139 = vmatpush2.bf16.msra.mxu1 %v8902_v17  ;;  %v8909_v17 = vld [vmem:[%s12720_s22 + $0x94] ss:$8 sps:$4 sm:$0xff]  }
 0x111   :  { %2140 = vmatprep.subr.bf16.mxu1 %v8903_v55  ;;  %v8860_v55 = vld [vmem:[#allocation6 + $0x48] sm:$0xff]  }
 0x114   :  { %2141 = vmatpush2.bf16.msra.mxu1 %v8905_v50  ;;  %v8912_v50 = vld [vmem:[%s12720_s22 + $0x84] ss:$8 sps:$4 sm:$0xff]  }
 0x115   :  { %2142 = vmatprep.subr.bf16.mxu1 %v8906_v48  ;;  %v8914_v48 = vld [vmem:[%s12720_s22 + $0x80] ss:$8 sps:$4 sm:$0xff]  }
 0x116   :  { %950 = vmatmul.mubr.bf16.gmra.mxu0 %v8856_v54  ;;  %v8911_v54 = vld [vmem:[%s12720_s22 + $0x90] ss:$8 sps:$4 sm:$0xff]  }
 0x117   :  { %959 = vmatprep.mubr.bf16.mxu0 %v12721_v51 }
 0x118   :  { %2143 = vmatpush2.bf16.msra.mxu1 %v8908_v49  ;;  %v8917_v49 = vld [vmem:[%s12720_s22 + $0x174] ss:$8 sps:$4 sm:$0xff]  }
 0x119   :  { %2144 = vmatprep.subr.bf16.mxu1 %v8909_v17  ;;  %v8926_v17 = vld [vmem:[%s12720_s22 + $0x264] ss:$8 sps:$4 sm:$0xff]  }
 0x11c   :  { %2145 = vmatpush2.bf16.msra.mxu1 %v8911_v54  ;;  %v8924_v54 = vld [vmem:[%s12720_s22 + $0x260] ss:$8 sps:$4 sm:$0xff]  }
 0x11d   :  { %2146 = vmatprep.subr.bf16.mxu1 %v8912_v50  ;;  %v8930_v50 = vld [vmem:[%s12720_s22 + $0x250] ss:$8 sps:$4 sm:$0xff]  }
 0x11e   :  { %960 = vmatmul.mubr.bf16.gmra.mxu0 %v8857_v53  ;;  %v8920_v53 = vld [vmem:[%s12720_s22 + $0x274] ss:$8 sps:$4 sm:$0xff]  }
 0x11f   :  { %969 = vmatprep.mubr.bf16.mxu0 %v12721_v51  ;;  %2262 = vmatprep.subr.bf16.mxu0 %v8920_v53  ;;  %v8936_v53 = vld [vmem:[%s12720_s22 + $0x240] ss:$8 sps:$4 sm:$0xff]  }
 0x120   :  { %2147 = vmatpush2.bf16.msra.mxu1 %v8914_v48  ;;  %v8862_v48 = vld [vmem:[#allocation6 + $0x58] sm:$0xff]  }
 0x121   :  { %2189 = vmatprep.subr.bf16.mxu1 %v8917_v49  ;;  %v8938_v49 = vld [vmem:[%s12720_s22 + $0x244] ss:$8 sps:$4 sm:$0xff]  }
 0x126   :  { %970 = vmatmul.mubr.bf16.gmra.mxu0 %v8858_v52  ;;  %v8918_v52 = vld [vmem:[%s12720_s22 + $0x270] ss:$8 sps:$4 sm:$0xff]  }
 0x127   :  { %979 = vmatprep.mubr.bf16.mxu0 %v12721_v51  ;;  %2263 = vmatpush1.bf16.msra.mxu0 %v8918_v52  ;;  %v8944_v52 = vld [vmem:[%s12720_s22 + $0x234] ss:$8 sps:$4 sm:$0xff]  }
 0x128   :  { %2264 = vmatprep.subr.bf16.mxu0 %v8926_v17  ;;  %v8863_v17 = vld [vmem:[#allocation6 + $0x60] sm:$0xff]  }
 0x12b   :  { %2265 = vmatpush1.bf16.msra.mxu0 %v8924_v54  ;;  %v8950_v54 = vld [vmem:[%s12720_s22 + $0x224] ss:$8 sps:$4 sm:$0xff]  }
 0x12e   :  { %980 = vmatmul.mubr.bf16.gmra.mxu0 %v8859_v16  ;;  %v8861_v16 = vld [vmem:[#allocation6 + $0x50] sm:$0xff]  }
 0x12f   :  { %989 = vmatprep.mubr.bf16.mxu0 %v12721_v51 }
 0x136   :  { %990 = vmatmul.mubr.bf16.gmra.mxu0 %v8860_v55  ;;  %v8932_v55 = vld [vmem:[%s12720_s22 + $0x254] ss:$8 sps:$4 sm:$0xff]  }
 0x137   :  { %999 = vmatprep.mubr.bf16.mxu0 %v12721_v51  ;;  %2266 = vmatprep.subr.bf16.mxu0 %v8932_v55  ;;  %v8948_v55 = vld [vmem:[%s12720_s22 + $0x220] ss:$8 sps:$4 sm:$0xff]  }
 0x138   :  { %2267 = vmatpush1.bf16.msra.mxu0 %v8930_v50  ;;  %v8956_v50 = vld [vmem:[%s12720_s22 + $0x214] ss:$8 sps:$4 sm:$0xff]  }
 0x139   :  { %2268 = vmatprep.subr.bf16.mxu0 %v8938_v49  ;;  %v8864_v49 = vld [vmem:[#allocation6 + $0x68] sm:$0xff]  }
 0x13c   :  { %2269 = vmatpush1.bf16.msra.mxu0 %v8936_v53  ;;  %v8962_v53 = vld [vmem:[%s12720_s22 + $0x204] ss:$8 sps:$4 sm:$0xff]  }
 0x13d   :  { %2270 = vmatprep.subr.bf16.mxu0 %v8944_v52  ;;  %v8960_v52 = vld [vmem:[%s12720_s22 + $0x200] ss:$8 sps:$4 sm:$0xff]  }
 0x13e   :  { %1000 = vmatmul.mubr.bf16.gmra.mxu0 %v8861_v16  ;;  %v8942_v16 = vld [vmem:[%s12720_s22 + $0x230] ss:$8 sps:$4 sm:$0xff]  }
 0x13f   :  { %1009 = vmatprep.mubr.bf16.mxu0 %v12721_v51 }
 0x140   :  { %2271 = vmatpush1.bf16.msra.mxu0 %v8942_v16 }
 0x141   :  { %2272 = vmatprep.subr.bf16.mxu0 %v8950_v54 }
 0x144   :  { %2273 = vmatpush1.bf16.msra.mxu0 %v8948_v55 }
 0x145   :  { %2274 = vmatprep.subr.bf16.mxu0 %v8956_v50 }
 0x146   :  { %1010 = vmatmul.mubr.bf16.gmra.mxu0 %v8862_v48  ;;  %v8954_v48 = vld [vmem:[%s12720_s22 + $0x210] ss:$8 sps:$4 sm:$0xff]  }
 0x147   :  { %1019 = vmatprep.mubr.bf16.mxu0 %v12721_v51 }
 0x148   :  { %2275 = vmatpush1.bf16.msra.mxu0 %v8954_v48 }
 0x149   :  { %2276 = vmatprep.subr.bf16.mxu0 %v8962_v53 }
 0x14c   :  { %2277 = vmatpush1.bf16.msra.mxu0 %v8960_v52 }
 0x14e   :  { %1020 = vmatmul.mubr.bf16.gmra.mxu0 %v8863_v17 }
 0x14f   :  { %1029 = vmatprep.mubr.bf16.mxu0 %v12721_v51 }
 0x156   :  { %1030 = vmatmul.mubr.bf16.gmra.mxu0 %v8864_v49 }
 0x157   :  { %1039 = vmatprep.mubr.bf16.mxu0 %v12721_v51 }
 0x158   :  { %502 = vsyncadd [#allocation5], 16384  ;;  %v8968_v16 = vld [vmem:[%s12720_s22 + $0x2f4] ss:$8 sps:$4 sm:$0xff]   ;;  %v8966_v17 = vld [vmem:[%s12720_s22 + $0x2f0] ss:$8 sps:$4 sm:$0xff]  }
 0x159   :  { %v8865_v54 = vld [vmem:[#allocation6 + $0x70] sm:$0xff]   ;;  %2278 = vmatprep.subr.bf16.mxu0 %v8968_v16  ;;  %v8974_v55 = vld [vmem:[%s12720_s22 + $0x2e4] ss:$8 sps:$4 sm:$0xff]   ;;  %v8972_v50 = vld [vmem:[%s12720_s22 + $0x2e0] ss:$8 sps:$4 sm:$0xff]   ;;  %s12722_s28 = sld [smem:[#allocation157_spill]] }
 0x15a   :  { %2279 = vmatpush2.bf16.msra.mxu0 %v8966_v17  ;;  %v8980_v48 = vld [vmem:[%s12720_s22 + $0x2d4] ss:$8 sps:$4 sm:$0xff]   ;;  %v8978_v49 = vld [vmem:[%s12720_s22 + $0x2d0] ss:$8 sps:$4 sm:$0xff]   ;;  %v8986_v52 = vld [vmem:[%s12720_s22 + $0x2c4] ss:$8 sps:$4 sm:$0xff]  }
 0x15b   :  { %2280 = vmatprep.subr.bf16.mxu0 %v8974_v55  ;;  %v8872_v53 = vld [vmem:[#allocation6 + $0x78] sm:$0xff]   ;;  %v8984_v16 = vld [vmem:[%s12720_s22 + $0x2c0] ss:$8 sps:$4 sm:$0xff]   ;;  %v8998_v55 = vld [vmem:[%s12720_s22 + $0x2a4] ss:$8 sps:$4 sm:$0xff]   ;;  %s12724_s30 = sld [smem:[#allocation160_spill]] }
 0x15c   :  { %v8992_v17 = vld [vmem:[%s12720_s22 + $0x2b4] ss:$8 sps:$4 sm:$0xff]   ;;  %v8923_v19 = vld [vmem:[%s12720_s22 + $0x164] ss:$8 sps:$4 sm:$0xff]   ;;  %v9011_v62 = vld [vmem:[%s12720_s22 + $0x370] ss:$8 sps:$4 sm:$0xff]  }
 0x15d   :  { %s12725_s0 = sld [smem:[#allocation159_spill]]  ;;  %s9745_s4 = smov [#allocation4]  }
 0x15e   :  { %1040 = vmatmul.mubr.bf16.gmra.mxu0 %v8865_v54  ;;  %v8990_v54 = vld [vmem:[%s12720_s22 + $0x2b0] ss:$8 sps:$4 sm:$0xff]   ;;  %s511_s5 = sshll.u32 %s9745_s4, 4  ;;  %s512_s5 = int_to_ptr.vmem [resolvable:$true] %s511_s5 }
 0x15f   :  { %1049 = vmatprep.mubr.bf16.mxu0 %v12721_v51  ;;  %2281 = vmatpush2.bf16.msra.mxu0 %v8972_v50  ;;  %v8996_v50 = vld [vmem:[%s12720_s22 + $0x2a0] ss:$8 sps:$4 sm:$0xff]   ;;  %v9090_v35 = vld [vmem:[%s12722_s28 + $0x164] ss:$8 sps:$4 sm:$0xff]   ;;  %v9096_v1 = vld [vmem:[%s12722_s28 + $0x154] ss:$8 sps:$4 sm:$0xff]   ;;  %p9700_p0 = scmp.lt.s32.totalorder %s512_s5, %s512_s5 }
 0x160   :  { %2282 = vmatprep.subr.bf16.mxu0 %v8980_v48  ;;  %v9004_v48 = vld [vmem:[%s12720_s22 + $0x294] ss:$8 sps:$4 sm:$0xff]   ;;  %v9088_v0 = vld [vmem:[%s12722_s28 + $0x160] ss:$8 sps:$4 sm:$0xff]  }
 0x161   :  { %v9100_v3 = vld [vmem:[%s12722_s28 + $0x140] ss:$8 sps:$4 sm:$0xff]  }
 0x163   :  { %2283 = vmatpush2.bf16.msra.mxu0 %v8978_v49  ;;  %v9002_v49 = vld [vmem:[%s12720_s22 + $0x290] ss:$8 sps:$4 sm:$0xff]  }
 0x164   :  { %2284 = vmatprep.subr.bf16.mxu0 %v8986_v52  ;;  %v9008_v52 = vld [vmem:[%s12720_s22 + $0x280] ss:$8 sps:$4 sm:$0xff]  }
 0x166   :  { %1050 = vmatmul.mubr.bf16.gmra.mxu0 %v8872_v53  ;;  %v9010_v53 = vld [vmem:[%s12720_s22 + $0x284] ss:$8 sps:$4 sm:$0xff]  }
 0x167   :  { %2285 = vmatpush2.bf16.msra.mxu0 %v8984_v16 }
 0x168   :  { %2286 = vmatprep.subr.bf16.mxu0 %v8992_v17 }
 0x16b   :  { %2287 = vmatpush2.bf16.msra.mxu0 %v8990_v54 }
 0x16c   :  { %2288 = vmatprep.subr.bf16.mxu0 %v8998_v55 }
 0x16f   :  { %2289 = vmatpush2.bf16.msra.mxu0 %v8996_v50 }
 0x170   :  { %2290 = vmatprep.subr.bf16.mxu0 %v9004_v48  ;;  %v8915_v48 = vld [vmem:[%s12720_s22 + $0x170] ss:$8 sps:$4 sm:$0xff]  }
 0x173   :  { %2291 = vmatpush2.bf16.msra.mxu0 %v9002_v49 }
 0x174   :  { %2292 = vmatprep.subr.bf16.mxu0 %v9010_v53  ;;  %v8921_v53 = vld [vmem:[%s12720_s22 + $0x160] ss:$8 sps:$4 sm:$0xff]  }
 0x177   :  { %2293 = vmatpush2.bf16.msra.mxu0 %v9008_v52 }
 0x1ae   :  { %v901_v16 = vpop.f32.mrf.mxu0 }
 0x1b0   :  { %v903_v17 = vpop.f32.mrf.mxu0 }
 0x1b2   :  { %v905_v54 = vpop.f32.mrf.mxu0 }
 0x1b3   :  { %v8528_v49 = vpack.c.bf16 %v905_v54, %v901_v16 }
 0x1b4   :  { %v907_v55 = vpop.f32.mrf.mxu0 }
 0x1b5   :  { %v8529_v50 = vpack.c.bf16 %v907_v55, %v903_v17  ;;  %v8929_v17 = vld [vmem:[%s12720_s22 + $0x154] ss:$8 sps:$4 sm:$0xff]  }
 0x1b6   :  { %v911_v18 = vpop.f32.mrf.mxu0 }
 0x1b7   :  { %2148 = vmatprep.mubr.bf16.mxu1 %v8529_v50  ;;  %v8927_v50 = vld [vmem:[%s12720_s22 + $0x150] ss:$8 sps:$4 sm:$0xff]  }
 0x1b8   :  { %2149 = vmatmul.mubr.bf16.vlgmr.msra.gmra.mxu1 %v8528_v49  ;;  %v913_v20 = vpop.f32.mrf.mxu0 }
 0x1b9   :  { %2190 = vmatpush1.bf16.msra.mxu1 %v8915_v48  ;;  %v8935_v48 = vld [vmem:[%s12720_s22 + $0x144] ss:$8 sps:$4 sm:$0xff]  }
 0x1ba   :  { %v915_v52 = vpop.f32.mrf.mxu0  ;;  %2191 = vmatprep.subr.bf16.mxu1 %v8923_v19 }
 0x1bb   :  { %v8536_v16 = vpack.c.bf16 %v915_v52, %v911_v18  ;;  %v8933_v18 = vld [vmem:[%s12720_s22 + $0x140] ss:$8 sps:$4 sm:$0xff]  }
 0x1bc   :  { %v917_v54 = vpop.f32.mrf.mxu0 }
 0x1bd   :  { %2192 = vmatpush1.bf16.msra.mxu1 %v8921_v53  ;;  %v8537_v55 = vpack.c.bf16 %v917_v54, %v913_v20  ;;  %v8941_v20 = vld [vmem:[%s12720_s22 + $0x134] ss:$8 sps:$4 sm:$0xff]  }
 0x1be   :  { %v921_v49 = vpop.f32.mrf.mxu0  ;;  %2193 = vmatprep.subr.bf16.mxu1 %v8929_v17 }
 0x1bf   :  { %2158 = vmatprep.mubr.bf16.mxu1 %v8537_v55  ;;  %v8939_v55 = vld [vmem:[%s12720_s22 + $0x130] ss:$8 sps:$4 sm:$0xff]  }
 0x1c0   :  { %v923_v19 = vpop.f32.mrf.mxu0  ;;  %2159 = vmatmul.mubr.bf16.gmra.mxu1 %v8536_v16 }
 0x1c1   :  { %2194 = vmatpush1.bf16.msra.mxu1 %v8927_v50  ;;  %v8947_v50 = vld [vmem:[%s12720_s22 + $0x124] ss:$8 sps:$4 sm:$0xff]  }
 0x1c2   :  { %v925_v53 = vpop.f32.mrf.mxu0  ;;  %2195 = vmatprep.subr.bf16.mxu1 %v8935_v48 }
 0x1c3   :  { %v8544_v52 = vpack.c.bf16 %v925_v53, %v921_v49  ;;  %v8945_v49 = vld [vmem:[%s12720_s22 + $0x120] ss:$8 sps:$4 sm:$0xff]  }
 0x1c4   :  { %v927_v17 = vpop.f32.mrf.mxu0 }
 0x1c5   :  { %2196 = vmatpush1.bf16.msra.mxu1 %v8933_v18  ;;  %v8545_v54 = vpack.c.bf16 %v927_v17, %v923_v19  ;;  %v8953_v19 = vld [vmem:[%s12720_s22 + $0x114] ss:$8 sps:$4 sm:$0xff]  }
 0x1c6   :  { %v931_v16 = vpop.f32.mrf.mxu0  ;;  %2197 = vmatprep.subr.bf16.mxu1 %v8941_v20 }
 0x1c7   :  { %2168 = vmatprep.mubr.bf16.mxu1 %v8545_v54  ;;  %v8951_v54 = vld [vmem:[%s12720_s22 + $0x110] ss:$8 sps:$4 sm:$0xff]  }
 0x1c8   :  { %v933_v48 = vpop.f32.mrf.mxu0  ;;  %2169 = vmatmul.mubr.bf16.gmra.mxu1 %v8544_v52 }
 0x1c9   :  { %2198 = vmatpush1.bf16.msra.mxu1 %v8939_v55  ;;  %v8959_v55 = vld [vmem:[%s12720_s22 + $0x104] ss:$8 sps:$4 sm:$0xff]  }
 0x1ca   :  { %v935_v18 = vpop.f32.mrf.mxu0  ;;  %2199 = vmatprep.subr.bf16.mxu1 %v8947_v50 }
 0x1cb   :  { %v8552_v53 = vpack.c.bf16 %v935_v18, %v931_v16  ;;  %v8957_v16 = vld [vmem:[%s12720_s22 + $0x100] ss:$8 sps:$4 sm:$0xff]  }
 0x1cc   :  { %v937_v20 = vpop.f32.mrf.mxu0 }
 0x1cd   :  { %2200 = vmatpush1.bf16.msra.mxu1 %v8945_v49  ;;  %v8553_v17 = vpack.c.bf16 %v937_v20, %v933_v48  ;;  %v8965_v49 = vld [vmem:[%s12720_s22 + $0x1f4] ss:$8 sps:$4 sm:$0xff]   ;;  %v8963_v20 = vld [vmem:[%s12720_s22 + $0x1f0] ss:$8 sps:$4 sm:$0xff]  }
 0x1ce   :  { %v10847_v52 = vpop.f32.mrf.mxu0  ;;  %2201 = vmatprep.subr.bf16.mxu1 %v8953_v19 }
 0x1cf   :  { %2178 = vmatprep.mubr.bf16.mxu1 %v8553_v17  ;;  %v8971_v17 = vld [vmem:[%s12720_s22 + $0x1e4] ss:$8 sps:$4 sm:$0xff]  }
 0x1d0   :  { %v943_v50 = vpop.f32.mrf.mxu0  ;;  %2179 = vmatmul.mubr.bf16.gmra.mxu1 %v8552_v53 }
 0x1d1   :  { %2202 = vmatpush1.bf16.msra.mxu1 %v8951_v54 }
 0x1d2   :  { %v10855_v48 = vpop.f32.mrf.mxu0  ;;  %2203 = vmatprep.subr.bf16.mxu1 %v8959_v55  ;;  %v8969_v55 = vld [vmem:[%s12720_s22 + $0x1e0] ss:$8 sps:$4 sm:$0xff]  }
 0x1d4   :  { %v947_v18 = vpop.f32.mrf.mxu0 }
 0x1d5   :  { %2204 = vmatpush1.bf16.msra.mxu1 %v8957_v16  ;;  %v8531_v19 = vpack.c.bf16 %v947_v18, %v943_v50  ;;  %v8977_v50 = vld [vmem:[%s12720_s22 + $0x1d4] ss:$8 sps:$4 sm:$0xff]  }
 0x1d6   :  { %v10863_v53 = vpop.f32.mrf.mxu0  ;;  %2205 = vmatprep.subr.bf16.mxu1 %v8965_v49  ;;  %v8975_v49 = vld [vmem:[%s12720_s22 + $0x1d0] ss:$8 sps:$4 sm:$0xff]  }
 0x1d7   :  { %2221 = vmatprep.mubr.bf16.mxu1 %v8531_v19 }
 0x1d8   :  { %v953_v54 = vpop.f32.mrf.mxu0 }
 0x1d9   :  { %2206 = vmatpush2.bf16.msra.mxu1 %v8963_v20  ;;  %v8983_v20 = vld [vmem:[%s12720_s22 + $0x1c4] ss:$8 sps:$4 sm:$0xff]  }
 0x1da   :  { %v10871_v16 = vpop.f32.mrf.mxu0  ;;  %2207 = vmatprep.subr.bf16.mxu1 %v8971_v17  ;;  %v8981_v17 = vld [vmem:[%s12720_s22 + $0x1c0] ss:$8 sps:$4 sm:$0xff]  }
 0x1dc   :  { %v957_v18 = vpop.f32.mrf.mxu0 }
 0x1dd   :  { %2208 = vmatpush2.bf16.msra.mxu1 %v8969_v55  ;;  %v8989_v55 = vld [vmem:[%s12720_s22 + $0x1b4] ss:$8 sps:$4 sm:$0xff]   ;;  %v8539_v27 = vpack.c.bf16 %v957_v18, %v953_v54 }
 0x1de   :  { %v10879_v19 = vpop.f32.mrf.mxu0  ;;  %2209 = vmatprep.subr.bf16.mxu1 %v8977_v50  ;;  %v8987_v50 = vld [vmem:[%s12720_s22 + $0x1b0] ss:$8 sps:$4 sm:$0xff]  }
 0x1e0   :  { %v10884_v21 = vpop.f32.mrf.mxu0 }
 0x1e1   :  { %2210 = vmatpush2.bf16.msra.mxu1 %v8975_v49  ;;  %v8995_v49 = vld [vmem:[%s12720_s22 + $0x1a4] ss:$8 sps:$4 sm:$0xff]  }
 0x1e2   :  { %v10889_v56 = vpop.f32.mrf.mxu0  ;;  %2211 = vmatprep.subr.bf16.mxu1 %v8983_v20  ;;  %v8993_v20 = vld [vmem:[%s12720_s22 + $0x1a0] ss:$8 sps:$4 sm:$0xff]  }
 0x1e4   :  { %v967_v57 = vpop.f32.mrf.mxu0 }
 0x1e5   :  { %2212 = vmatpush2.bf16.msra.mxu1 %v8981_v17  ;;  %v9001_v17 = vld [vmem:[%s12720_s22 + $0x194] ss:$8 sps:$4 sm:$0xff]   ;;  %v8547_v54 = vpack.c.bf16 %v967_v57, %v10884_v21  ;;  %v9020_v21 = vld [vmem:[%s12720_s22 + $0x340] ss:$8 sps:$4 sm:$0xff]  }
 0x1e6   :  { %v10897_v22 = vpop.f32.mrf.mxu0  ;;  %2213 = vmatprep.subr.bf16.mxu1 %v8989_v55  ;;  %v8999_v55 = vld [vmem:[%s12720_s22 + $0x190] ss:$8 sps:$4 sm:$0xff]  }
 0x1e8   :  { %v10902_v23 = vpop.f32.mrf.mxu0 }
 0x1e9   :  { %2214 = vmatpush2.bf16.msra.mxu1 %v8987_v50  ;;  %v9007_v50 = vld [vmem:[%s12720_s22 + $0x184] ss:$8 sps:$4 sm:$0xff]  }
 0x1ea   :  { %v10907_v58 = vpop.f32.mrf.mxu0  ;;  %2215 = vmatprep.subr.bf16.mxu1 %v8995_v49  ;;  %v9005_v49 = vld [vmem:[%s12720_s22 + $0x180] ss:$8 sps:$4 sm:$0xff]  }
 0x1ec   :  { %v10912_v59 = vpop.f32.mrf.mxu0 }
 0x1ed   :  { %2216 = vmatpush2.bf16.msra.mxu1 %v8993_v20  ;;  %v9013_v20 = vld [vmem:[%s12720_s22 + $0x374] ss:$8 sps:$4 sm:$0xff]  }
 0x1ee   :  { %v981_v24 = vpop.f32.mrf.mxu0  ;;  %2217 = vmatprep.subr.bf16.mxu1 %v9001_v17 }
 0x1f0   :  { %v983_v25 = vpop.f32.mrf.mxu0 }
 0x1f1   :  { %2218 = vmatpush2.bf16.msra.mxu1 %v8999_v55  ;;  %v8530_v55 = vpack.c.bf16 %v10855_v48, %v10847_v52 }
 0x1f2   :  { %v985_v60 = vpop.f32.mrf.mxu0  ;;  %2219 = vmatprep.subr.bf16.mxu1 %v9007_v50  ;;  %v9016_v50 = vld [vmem:[%s12720_s22 + $0x364] ss:$8 sps:$4 sm:$0xff]  }
 0x1f3   :  { %v8532_v61 = vpack.c.bf16 %v985_v60, %v981_v24  ;;  %v9019_v60 = vld [vmem:[%s12720_s22 + $0x354] ss:$8 sps:$4 sm:$0xff]  }
 0x1f4   :  { %v987_v26 = vpop.f32.mrf.mxu0 }
 0x1f5   :  { %2220 = vmatpush2.bf16.msra.mxu1 %v9005_v49  ;;  %v8533_v17 = vpack.c.bf16 %v987_v26, %v983_v25  ;;  %v9014_v25 = vld [vmem:[%s12720_s22 + $0x360] ss:$8 sps:$4 sm:$0xff]   ;;  %v9022_v49 = vld [vmem:[%s12720_s22 + $0x344] ss:$8 sps:$4 sm:$0xff]  }
 0x1f6   :  { %v991_v63 = vpop.f32.mrf.mxu0  ;;  %2335 = vmatprep.subr.bf16.mxu1 %v9013_v20 }
 0x1f7   :  { %2294 = vmatprep.mubr.bf16.mxu0 %v8533_v17  ;;  %v8555_v17 = vpack.c.bf16 %v10912_v59, %v10902_v23  ;;  %v9026_v23 = vld [vmem:[%s12720_s22 + $0x320] ss:$8 sps:$4 sm:$0xff]  }
 0x1f8   :  { %2222 = vmatmul.mubr.bf16.vlgmr.msra.gmra.mxu1 %v8530_v55  ;;  %v993_v24 = vpop.f32.mrf.mxu0  ;;  %2295 = vmatmul.mubr.bf16.vlgmr.msra.gmra.mxu0 %v8532_v61  ;;  %v8538_v61 = vpack.c.bf16 %v10871_v16, %v10863_v53  ;;  %v9025_v53 = vld [vmem:[%s12720_s22 + $0x334] ss:$8 sps:$4 sm:$0xff]  }
 0x1f9   :  { %2231 = vmatprep.mubr.bf16.mxu1 %v8539_v27  ;;  %2336 = vmatpush1.bf16.msra.mxu1 %v9011_v62  ;;  %v9017_v27 = vld [vmem:[%s12720_s22 + $0x350] ss:$8 sps:$4 sm:$0xff]  }
 0x1fa   :  { %v995_v26 = vpop.f32.mrf.mxu0  ;;  %2337 = vmatprep.subr.bf16.mxu1 %v9016_v50  ;;  %v9023_v50 = vld [vmem:[%s12720_s22 + $0x330] ss:$8 sps:$4 sm:$0xff]  }
 0x1fb   :  { %v8540_v52 = vpack.c.bf16 %v995_v26, %v991_v63  ;;  %v9028_v26 = vld [vmem:[%s12720_s22 + $0x324] ss:$8 sps:$4 sm:$0xff]  }
 0x1fc   :  { %v997_v48 = vpop.f32.mrf.mxu0 }
 0x1fd   :  { %2338 = vmatpush1.bf16.msra.mxu1 %v9014_v25  ;;  %v8541_v18 = vpack.c.bf16 %v997_v48, %v993_v24  ;;  %v8546_v24 = vpack.c.bf16 %v10889_v56, %v10879_v19  ;;  %v9031_v56 = vld [vmem:[%s12720_s22 + $0x314] ss:$8 sps:$4 sm:$0xff]  }
 0x1fe   :  { %v1001_v62 = vpop.f32.mrf.mxu0  ;;  %2339 = vmatprep.subr.bf16.mxu1 %v9019_v60 }
 0x1ff   :  { %2304 = vmatprep.mubr.bf16.mxu0 %v8541_v18  ;;  %v8554_v18 = vpack.c.bf16 %v10907_v58, %v10897_v22  ;;  %v9037_v22 = vld [vmem:[%s12720_s22 + $0x3f4] ss:$8 sps:$4 sm:$0xff]  }
 0x200   :  { %2232 = vmatmul.mubr.bf16.gmra.mxu1 %v8538_v61  ;;  %v1003_v63 = vpop.f32.mrf.mxu0  ;;  %2305 = vmatmul.mubr.bf16.gmra.mxu0 %v8540_v52 }
 0x201   :  { %2241 = vmatprep.mubr.bf16.mxu1 %v8547_v54  ;;  %2340 = vmatpush1.bf16.msra.mxu1 %v9017_v27  ;;  %v9029_v54 = vld [vmem:[%s12720_s22 + $0x310] ss:$8 sps:$4 sm:$0xff]   ;;  %v9034_v27 = vld [vmem:[%s12720_s22 + $0x304] ss:$8 sps:$4 sm:$0xff]  }
 0x202   :  { %v1005_v57 = vpop.f32.mrf.mxu0  ;;  %2341 = vmatprep.subr.bf16.mxu1 %v9022_v49  ;;  %v9032_v49 = vld [vmem:[%s12720_s22 + $0x300] ss:$8 sps:$4 sm:$0xff]  }
 0x203   :  { %v8548_v16 = vpack.c.bf16 %v1005_v57, %v1001_v62 }
 0x204   :  { %v1007_v20 = vpop.f32.mrf.mxu0 }
 0x205   :  { %2342 = vmatpush1.bf16.msra.mxu1 %v9020_v21  ;;  %v8549_v55 = vpack.c.bf16 %v1007_v20, %v1003_v63  ;;  %v9035_v21 = vld [vmem:[%s12720_s22 + $0x3f0] ss:$8 sps:$4 sm:$0xff]   ;;  %v9038_v20 = vld [vmem:[%s12720_s22 + $0x3e0] ss:$8 sps:$4 sm:$0xff]  }
 0x206   :  { %v1011_v25 = vpop.f32.mrf.mxu0  ;;  %2343 = vmatprep.subr.bf16.mxu1 %v9025_v53  ;;  %v9040_v53 = vld [vmem:[%s12720_s22 + $0x3e4] ss:$8 sps:$4 sm:$0xff]  }
 0x207   :  { %2314 = vmatprep.mubr.bf16.mxu0 %v8549_v55 }
 0x208   :  { %2242 = vmatmul.mubr.bf16.gmra.mxu1 %v8546_v24  ;;  %v1013_v60 = vpop.f32.mrf.mxu0  ;;  %2315 = vmatmul.mubr.bf16.gmra.mxu0 %v8548_v16  ;;  %v9046_v24 = vld [vmem:[%s12720_s22 + $0x3c4] ss:$8 sps:$4 sm:$0xff]  }
 0x209   :  { %2251 = vmatprep.mubr.bf16.mxu1 %v8555_v17  ;;  %2344 = vmatpush1.bf16.msra.mxu1 %v9023_v50  ;;  %v9043_v17 = vld [vmem:[%s12720_s22 + $0x3d4] ss:$8 sps:$4 sm:$0xff]   ;;  %v9041_v50 = vld [vmem:[%s12720_s22 + $0x3d0] ss:$8 sps:$4 sm:$0xff]  }
 0x20a   :  { %v1015_v59 = vpop.f32.mrf.mxu0  ;;  %2345 = vmatprep.subr.bf16.mxu1 %v9028_v26  ;;  %v9044_v26 = vld [vmem:[%s12720_s22 + $0x3c0] ss:$8 sps:$4 sm:$0xff]  }
 0x20b   :  { %v8556_v19 = vpack.c.bf16 %v1015_v59, %v1011_v25  ;;  %v9047_v59 = vld [vmem:[%s12720_s22 + $0x3b0] ss:$8 sps:$4 sm:$0xff]  }
 0x20c   :  { %v1017_v52 = vpop.f32.mrf.mxu0 }
 0x20d   :  { %2346 = vmatpush1.bf16.msra.mxu1 %v9026_v23  ;;  %v8557_v48 = vpack.c.bf16 %v1017_v52, %v1013_v60  ;;  %v9049_v60 = vld [vmem:[%s12720_s22 + $0x3b4] ss:$8 sps:$4 sm:$0xff]   ;;  %v9050_v52 = vld [vmem:[%s12720_s22 + $0x3a0] ss:$8 sps:$4 sm:$0xff]  }
 0x20e   :  { %2347 = vmatprep.subr.bf16.mxu1 %v9031_v56  ;;  %v1021_v61 = vpop.f32.mrf.mxu0  ;;  %v9052_v56 = vld [vmem:[%s12720_s22 + $0x3a4] ss:$8 sps:$4 sm:$0xff]  }
 0x20f   :  { %2324 = vmatprep.mubr.bf16.mxu0 %v8557_v48  ;;  %v9055_v48 = vld [vmem:[%s12720_s22 + $0x394] ss:$8 sps:$4 sm:$0xff]  }
 0x210   :  { %2252 = vmatmul.mubr.bf16.gmra.mxu1 %v8554_v18  ;;  %2325 = vmatmul.mubr.bf16.gmra.mxu0 %v8556_v19  ;;  %v1023_v62 = vpop.f32.mrf.mxu0  ;;  %v9053_v18 = vld [vmem:[%s12720_s22 + $0x390] ss:$8 sps:$4 sm:$0xff]  }
 0x211   :  { %2348 = vmatpush1.bf16.msra.mxu1 %v9029_v54  ;;  %2705 = vmatprep.mubr.bf16.mxu0 %v12721_v51 }
 0x212   :  { %2349 = vmatprep.subr.bf16.mxu1 %v9034_v27  ;;  %v1025_v58 = vpop.f32.mrf.mxu0  ;;  %v9058_v27 = vld [vmem:[%s12720_s22 + $0x384] ss:$8 sps:$4 sm:$0xff]  }
 0x214   :  { %v1027_v63 = vpop.f32.mrf.mxu0 }
 0x215   :  { %2350 = vmatpush1.bf16.msra.mxu1 %v9032_v49  ;;  %v8535_v57 = vpack.c.bf16 %v1027_v63, %v1023_v62  ;;  %v9056_v49 = vld [vmem:[%s12720_s22 + $0x380] ss:$8 sps:$4 sm:$0xff]   ;;  %s12723_s22 = sld [smem:[#allocation156_spill]] }
 0x216   :  { %2351 = vmatprep.subr.bf16.mxu1 %v9037_v22  ;;  %v1031_v16 = vpop.f32.mrf.mxu0 }
 0x217   :  { %2367 = vmatprep.mubr.bf16.mxu1 %v8535_v57 }
 0x218   :  { %v1033_v55 = vpop.f32.mrf.mxu0 }
 0x219   :  { %2352 = vmatpush2.bf16.msra.mxu1 %v9035_v21  ;;  %v8534_v21 = vpack.c.bf16 %v1025_v58, %v1021_v61 }
 0x21a   :  { %2353 = vmatprep.subr.bf16.mxu1 %v9040_v53  ;;  %v1035_v25 = vpop.f32.mrf.mxu0 }
 0x21c   :  { %v1037_v23 = vpop.f32.mrf.mxu0 }
 0x21d   :  { %2354 = vmatpush2.bf16.msra.mxu1 %v9038_v20  ;;  %v8543_v63 = vpack.c.bf16 %v1037_v23, %v1033_v55 }
 0x21e   :  { %2355 = vmatprep.subr.bf16.mxu1 %v9043_v17  ;;  %v1041_v19 = vpop.f32.mrf.mxu0  ;;  %v8542_v17 = vpack.c.bf16 %v1035_v25, %v1031_v16 }
 0x220   :  { %v1043_v54 = vpop.f32.mrf.mxu0 }
 0x221   :  { %2356 = vmatpush2.bf16.msra.mxu1 %v9041_v50 }
 0x222   :  { %2357 = vmatprep.subr.bf16.mxu1 %v9046_v24  ;;  %v1045_v62 = vpop.f32.mrf.mxu0 }
 0x224   :  { %v1047_v22 = vpop.f32.mrf.mxu0 }
 0x225   :  { %2358 = vmatpush2.bf16.msra.mxu1 %v9044_v26  ;;  %v8551_v20 = vpack.c.bf16 %v1047_v22, %v1043_v54 }
 0x226   :  { %2359 = vmatprep.subr.bf16.mxu1 %v9049_v60  ;;  %v1051_v57 = vpop.f32.mrf.mxu0  ;;  %v8550_v60 = vpack.c.bf16 %v1045_v62, %v1041_v19 }
 0x228   :  { %v1053_v53 = vpop.f32.mrf.mxu0 }
 0x229   :  { %2360 = vmatpush2.bf16.msra.mxu1 %v9047_v59 }
 0x22a   :  { %2361 = vmatprep.subr.bf16.mxu1 %v9052_v56  ;;  %v1055_v50 = vpop.f32.mrf.mxu0 }
 0x22b   :  { %v8558_v59 = vpack.c.bf16 %v1055_v50, %v1051_v57 }
 0x22c   :  { %v1057_v24 = vpop.f32.mrf.mxu0 }
 0x22d   :  { %2362 = vmatpush2.bf16.msra.mxu1 %v9050_v52  ;;  %v8559_v26 = vpack.c.bf16 %v1057_v24, %v1053_v53 }
 0x22e   :  { %2363 = vmatprep.subr.bf16.mxu1 %v9055_v48 }
 0x231   :  { %2364 = vmatpush2.bf16.msra.mxu1 %v9053_v18 }
 0x232   :  { %2365 = vmatprep.subr.bf16.mxu1 %v9058_v27 }
 0x235   :  { %2366 = vmatpush2.bf16.msra.mxu1 %v9056_v49 }
 0x238   :  { %2368 = vmatmul.mubr.bf16.vlgmr.msra.gmra.mxu1 %v8534_v21 }
 0x239   :  { %2377 = vmatprep.mubr.bf16.mxu1 %v8543_v63 }
 0x240   :  { %2378 = vmatmul.mubr.bf16.gmra.mxu1 %v8542_v17 }
 0x241   :  { %2387 = vmatprep.mubr.bf16.mxu1 %v8551_v20 }
 0x248   :  { %2388 = vmatmul.mubr.bf16.gmra.mxu1 %v8550_v60 }
 0x249   :  { %2397 = vmatprep.mubr.bf16.mxu1 %v8559_v26 }
 0x250   :  { %2398 = vmatmul.mubr.bf16.gmra.mxu1 %v8558_v59 }
 0x278   :  { %v2150_v56 = vpop.f32.mrf.mxu1 }
 0x27a   :  { %v2152_v52 = vpop.f32.mrf.mxu1 }
 0x27c   :  { %v2154_v55 = vpop.f32.mrf.mxu1 }
 0x27e   :  { %v2156_v61 = vpop.f32.mrf.mxu1 }
 0x280   :  { %v11031_v58 = vpop.f32.mrf.mxu1 }
 0x282   :  { %v11033_v23 = vpop.f32.mrf.mxu1 }
 0x284   :  { %v11035_v48 = vpop.f32.mrf.mxu1 }
 0x286   :  { %v11037_v16 = vpop.f32.mrf.mxu1 }
 0x288   :  { %v11039_v25 = vpop.f32.mrf.mxu1 }
 0x28a   :  { %v11041_v54 = vpop.f32.mrf.mxu1 }
 0x28c   :  { %v11043_v19 = vpop.f32.mrf.mxu1 }
 0x28e   :  { %v11045_v18 = vpop.f32.mrf.mxu1 }
 0x290   :  { %v11047_v27 = vpop.f32.mrf.mxu1 }
 0x292   :  { %v11049_v62 = vpop.f32.mrf.mxu1 }
 0x294   :  { %v11051_v49 = vpop.f32.mrf.mxu1 }
 0x296   :  { %v11053_v22 = vpop.f32.mrf.mxu1 }
 0x2b8   :  { %v2223_v63 = vpop.f32.mrf.mxu1  ;;  %v2296_v59 = vpop.f32.mrf.mxu0 }
 0x2b9   :  { %v2224_v21 = vadd.f32 %v2223_v63, %v2150_v56  ;;  %v9084_v63 = vld [vmem:[%s12722_s28 + $0x174] ss:$8 sps:$4 sm:$0xff]  }
 0x2ba   :  { %v2225_v57 = vpop.f32.mrf.mxu1  ;;  %v2298_v29 = vpop.f32.mrf.mxu0  ;;  %3687 = vmatprep.subr.bf16.mxu1 %v9084_v63  ;;  %v9094_v63 = vld [vmem:[%s12722_s28 + $0x150] ss:$8 sps:$4 sm:$0xff]  }
 0x2bb   :  { %v2226_v53 = vadd.f32 %v2225_v57, %v2152_v52  ;;  %v2297_v39 = vadd.f32 %v2296_v59, %v2224_v21 }
 0x2bc   :  { %v2227_v20 = vpop.f32.mrf.mxu1  ;;  %v2300_v33 = vpop.f32.mrf.mxu0 }
 0x2bd   :  { %v2228_v17 = vadd.f32 %v2227_v20, %v2154_v55  ;;  %v9082_v55 = vld [vmem:[%s12722_s28 + $0x170] ss:$8 sps:$4 sm:$0xff]   ;;  %v2299_v5 = vadd.f32 %v2298_v29, %v2226_v53 }
 0x2be   :  { %v2229_v50 = vpop.f32.mrf.mxu1  ;;  %v2302_v31 = vpop.f32.mrf.mxu0  ;;  %3688 = vmatpush1.bf16.msra.mxu1 %v9082_v55  ;;  %v9102_v55 = vld [vmem:[%s12722_s28 + $0x144] ss:$8 sps:$4 sm:$0xff]  }
 0x2bf   :  { %3689 = vmatprep.subr.bf16.mxu1 %v9090_v35  ;;  %v2230_v40 = vadd.f32 %v2229_v50, %v2156_v61  ;;  %v2301_v43 = vadd.f32 %v2300_v33, %v2228_v17  ;;  %v9120_v61 = vld [vmem:[%s12722_s28 + $0x114] ss:$8 sps:$4 sm:$0xff]  }
 0x2c0   :  { %v2233_v24 = vpop.f32.mrf.mxu1  ;;  %v2306_v56 = vpop.f32.mrf.mxu0 }
 0x2c1   :  { %v2234_v6 = vadd.f32 %v2233_v24, %v11031_v58  ;;  %v2303_v29 = vadd.f32 %v2302_v31, %v2230_v40 }
 0x2c2   :  { %v2235_v26 = vpop.f32.mrf.mxu1  ;;  %v2308_v57 = vpop.f32.mrf.mxu0  ;;  %3690 = vmatpush1.bf16.msra.mxu1 %v9088_v0  ;;  %v9108_v0 = vld [vmem:[%s12722_s28 + $0x134] ss:$8 sps:$4 sm:$0xff]  }
 0x2c3   :  { %3691 = vmatprep.subr.bf16.mxu1 %v9096_v1  ;;  %v2307_v58 = vadd.f32 %v2306_v56, %v2234_v6  ;;  %v9118_v6 = vld [vmem:[%s12722_s28 + $0x110] ss:$8 sps:$4 sm:$0xff]  }
 0x2c4   :  { %v2237_v60 = vpop.f32.mrf.mxu1  ;;  %v11082_v36 = vpop.f32.mrf.mxu0 }
 0x2c6   :  { %v11055_v28 = vpop.f32.mrf.mxu1  ;;  %v11092_v2 = vpop.f32.mrf.mxu0  ;;  %3692 = vmatpush1.bf16.msra.mxu1 %v9094_v63  ;;  %v9106_v63 = vld [vmem:[%s12722_s28 + $0x130] ss:$8 sps:$4 sm:$0xff]  }
 0x2c7   :  { %3693 = vmatprep.subr.bf16.mxu1 %v9102_v55  ;;  %v9114_v55 = vld [vmem:[%s12722_s28 + $0x124] ss:$8 sps:$4 sm:$0xff]   ;;  %v2240_v31 = vadd.f32 %v11055_v28, %v11037_v16 }
 0x2c8   :  { %v11057_v32 = vpop.f32.mrf.mxu1  ;;  %v11102_v38 = vpop.f32.mrf.mxu0 }
 0x2c9   :  { %v2244_v28 = vadd.f32 %v11057_v32, %v11039_v25  ;;  %v9124_v25 = vld [vmem:[%s12722_s28 + $0x100] ss:$8 sps:$4 sm:$0xff]  }
 0x2ca   :  { %v11059_v30 = vpop.f32.mrf.mxu1  ;;  %3694 = vmatpush1.bf16.msra.mxu1 %v9100_v3  ;;  %v2318_v7 = vpop.f32.mrf.mxu0  ;;  %v2236_v3 = vadd.f32 %v2235_v26, %v11033_v23  ;;  %v9126_v26 = vld [vmem:[%s12722_s28 + $0x104] ss:$8 sps:$4 sm:$0xff]  }
 0x2cb   :  { %3695 = vmatprep.subr.bf16.mxu1 %v9108_v0 }
 0x2cc   :  { %v11061_v34 = vpop.f32.mrf.mxu1  ;;  %v2320_v33 = vpop.f32.mrf.mxu0  ;;  %v2309_v50 = vadd.f32 %v2308_v57, %v2236_v3 }
 0x2ce   :  { %v11063_v52 = vpop.f32.mrf.mxu1  ;;  %3696 = vmatpush1.bf16.msra.mxu1 %v9106_v63 }
 0x2cf   :  { %3697 = vmatprep.subr.bf16.mxu1 %v9114_v55  ;;  %v2246_v55 = vadd.f32 %v11059_v30, %v11041_v54  ;;  %v2317_v30 = vadd.f32 %v11102_v38, %v2244_v28  ;;  %v2248_v54 = vadd.f32 %v11061_v34, %v11043_v19  ;;  %v9130_v38 = vld [vmem:[%s12722_s28 + $0x1f0] ss:$8 sps:$4 sm:$0xff]  }
 0x2d0   :  { %v11071_v20 = vpop.f32.mrf.mxu1 }
 0x2d2   :  { %v11084_v37 = vpop.f32.mrf.mxu1 }
 0x2d4   :  { %v11094_v35 = vpop.f32.mrf.mxu1 }
 0x2d6   :  { %v11104_v1 = vpop.f32.mrf.mxu1 }
 0x2f8   :  { %v2369_v4 = vpop.f32.mrf.mxu1 }
 0x2f9   :  { %v2370_v41 = vadd.f32 %v2369_v4, %v2297_v39  ;;  %v9112_v4 = vld [vmem:[%s12722_s28 + $0x120] ss:$8 sps:$4 sm:$0xff]  }
 0x2fa   :  { %v2371_v42 = vpop.f32.mrf.mxu1  ;;  %3698 = vmatpush1.bf16.msra.mxu1 %v9112_v4  ;;  %v9132_v4 = vld [vmem:[%s12722_s28 + $0x1f4] ss:$8 sps:$4 sm:$0xff]  }
 0x2fb   :  { %v2372_v21 = vadd.f32 %v2371_v42, %v2299_v5  ;;  %v2424_v59 = vmul.f32 0.2, %v2370_v41  ;;  %vm2408_vm0 = vcmp.ge.f32.partialorder %v2370_v41, 0.0  ;;  %v2238_v5 = vadd.f32 %v2237_v60, %v11035_v48  ;;  %3699 = vmatprep.subr.bf16.mxu1 %v9120_v61 }
 0x2fc   :  { %v2373_v8 = vpop.f32.mrf.mxu1 }
 0x2fd   :  { %v2374_v39 = vadd.f32 %v2373_v8, %v2301_v43  ;;  %v2425_v23 = vmul.f32 0.2, %v2372_v21  ;;  %v11123_v40 = vsel %vm2408_vm0, %v2370_v41, %v2424_v59  ;;  %vm2409_vm2 = vcmp.ge.f32.partialorder %v2372_v21, 0.0  ;;  %v2322_v41 = vpop.f32.mrf.mxu0 }
 0x2fe   :  { %v2375_v42 = vpop.f32.mrf.mxu1  ;;  %v2311_v56 = vadd.f32 %v11082_v36, %v2238_v5  ;;  %3700 = vmatpush1.bf16.msra.mxu1 %v9118_v6  ;;  %v2313_v36 = vadd.f32 %v11092_v2, %v2240_v31  ;;  %v2250_v2 = vadd.f32 %v11063_v52, %v11045_v18  ;;  %v2321_v31 = vadd.f32 %v2320_v33, %v2248_v54 }
 0x2ff   :  { %vm2410_vm1 = vcmp.ge.f32.partialorder %v2374_v39, 0.0  ;;  %v2426_v53 = vmul.f32 0.2, %v2374_v39  ;;  %v2376_v17 = vadd.f32 %v2375_v42, %v2303_v29  ;;  %v11139_v0 = vsel %vm2409_vm2, %v2372_v21, %v2425_v23  ;;  %3701 = vmatprep.subr.bf16.mxu1 %v9126_v26  ;;  %v2326_v29 = vpop.f32.mrf.mxu0 }
 0x300   :  { %v2379_v8 = vpop.f32.mrf.mxu1  ;;  %v2319_v42 = vadd.f32 %v2318_v7, %v2246_v55  ;;  %v9138_v7 = vld [vmem:[%s12722_s28 + $0x1e4] ss:$8 sps:$4 sm:$0xff]   ;;  %v2254_v33 = vadd.f32 %v11071_v20, %v11047_v27  ;;  %vm2648_vm0 = vcmask 523264   ;;  %vm4242_vm2 = vcmask 1040384  }
 0x301   :  { %v11128_v43 = vsel %vm2410_vm1, %v2374_v39, %v2426_v53  ;;  %vm2411_vm3 = vcmp.ge.f32.partialorder %v2376_v17, 0.0  ;;  %v2427_v48 = vmul.f32 0.2, %v2376_v17  ;;  %v2380_v24 = vadd.f32 %v2379_v8, %v2307_v58  ;;  %v2328_v18 = vpop.f32.mrf.mxu0 }
 0x302   :  { %v2456_v16 = vpack.c.bf16 %v11128_v43, %v11123_v40  ;;  %v2381_v60 = vpop.f32.mrf.mxu1  ;;  %3702 = vmatpush1.bf16.msra.mxu1 %v9124_v25  ;;  %v2327_v20 = vadd.f32 %v2326_v29, %v2254_v33  ;;  %v9070_v40 = vld [vmem:[%s12722_s28 + $0x60] ss:$8 sps:$4 sm:$0xff]   ;;  %v9075_v43 = vld [vmem:[%s12722_s28 + $0x54] ss:$8 sps:$4 sm:$0xff]   ;;  %vm3854_vm1 = vcmask 261120  }
 0x303   :  { %v2382_v57 = vadd.f32 %v2381_v60, %v2309_v50  ;;  %v11141_v63 = vsel %vm2411_vm3, %v2376_v17, %v2427_v48  ;;  %v2428_v3 = vmul.f32 0.2, %v2380_v24  ;;  %vm2412_vm4 = vcmp.ge.f32.partialorder %v2380_v24, 0.0  ;;  %3703 = vmatprep.subr.bf16.mxu1 %v9132_v4  ;;  %v9136_v60 = vld [vmem:[%s12722_s28 + $0x1e0] ss:$8 sps:$4 sm:$0xff]  }
 0x304   :  { %v2383_v59 = vpop.f32.mrf.mxu1  ;;  %v2457_v32 = vpack.c.bf16 %v11141_v63, %v11139_v0  ;;  %v9072_v0 = vld [vmem:[%s12722_s28 + $0x64] ss:$8 sps:$4 sm:$0xff]   ;;  %v9073_v63 = vld [vmem:[%s12722_s28 + $0x50] ss:$8 sps:$4 sm:$0xff]   ;;  %v9085_v33 = vld [vmem:[%s12722_s28 + $0x20] ss:$8 sps:$4 sm:$0xff]  }
 0x305   :  { %v2384_v21 = vadd.f32 %v2383_v59, %v2311_v56  ;;  %v2429_v61 = vmul.f32 0.2, %v2382_v57  ;;  %v11159_v23 = vsel %vm2412_vm4, %v2380_v24, %v2428_v3  ;;  %vm2413_vm6 = vcmp.ge.f32.partialorder %v2382_v57, 0.0  ;;  %v2330_v59 = vpop.f32.mrf.mxu0 }
 0x306   :  { %v2385_v39 = vpop.f32.mrf.mxu1  ;;  %v2256_v24 = vadd.f32 %v11084_v37, %v11049_v62  ;;  %3704 = vmatpush2.bf16.msra.mxu1 %v9130_v38  ;;  %v2323_v56 = vadd.f32 %v2322_v41, %v2250_v2  ;;  %v2260_v41 = vadd.f32 %v11104_v1, %v11053_v22  ;;  %vm4248_vm3 = vcmask 130048  }
 0x307   :  { %vm2414_vm5 = vcmp.ge.f32.partialorder %v2384_v21, 0.0  ;;  %v2430_v58 = vmul.f32 0.2, %v2384_v21  ;;  %v2386_v5 = vadd.f32 %v2385_v39, %v2313_v36  ;;  %v2445_v6 = vsel %vm2413_vm6, %v2382_v57, %v2429_v61  ;;  %3705 = vmatprep.subr.bf16.mxu1 %v9138_v7 }
 0x308   :  { %v2389_v53 = vpop.f32.mrf.mxu1  ;;  %v2258_v57 = vadd.f32 %v11094_v35, %v11051_v49  ;;  %v2332_v49 = vpop.f32.mrf.mxu0 }
 0x309   :  { %v11164_v34 = vsel %vm2414_vm5, %v2384_v21, %v2430_v58  ;;  %vm2415_vm7 = vcmp.ge.f32.partialorder %v2386_v5, 0.0  ;;  %v2431_v19 = vmul.f32 0.2, %v2386_v5  ;;  %v2390_v17 = vadd.f32 %v2389_v53, %v2317_v30 }
 0x30a   :  { %v2458_v52 = vpack.c.bf16 %v11164_v34, %v11159_v23  ;;  %v2391_v50 = vpop.f32.mrf.mxu1  ;;  %v2329_v21 = vadd.f32 %v2328_v18, %v2256_v24  ;;  %3706 = vmatpush2.bf16.msra.mxu1 %v9136_v60  ;;  %v2331_v61 = vadd.f32 %v2330_v59, %v2258_v57  ;;  %v9069_v60 = vld [vmem:[%s12722_s28 + $0x74] ss:$8 sps:$4 sm:$0xff]   ;;  %v9067_v23 = vld [vmem:[%s12722_s28 + $0x70] ss:$8 sps:$4 sm:$0xff]   ;;  %v9076_v34 = vld [vmem:[%s12722_s28 + $0x40] ss:$8 sps:$4 sm:$0xff]  }
 0x30b   :  { %v2392_v8 = vadd.f32 %v2391_v50, %v2319_v42  ;;  %v2447_v48 = vsel %vm2415_vm7, %v2386_v5, %v2431_v19  ;;  %v2432_v55 = vmul.f32 0.2, %v2390_v17  ;;  %vm2416_vm8 = vcmp.ge.f32.partialorder %v2390_v17, 0.0  ;;  %v9093_v57 = vld [vmem:[%s12722_s28 + $0x14] ss:$8 sps:$4 sm:$0xff]  }
 0x30c   :  { %v2393_v26 = vpop.f32.mrf.mxu1  ;;  %v2459_v28 = vpack.c.bf16 %v2447_v48, %v2445_v6  ;;  %v2333_v19 = vadd.f32 %v2332_v49, %v2260_v41  ;;  %v9062_v59 = vld [vmem:[%s12723_s22 + $0x18] sm:$0xff]   ;;  %v9123_v49 = vld [vmem:[%s12722_s28 + $0xc4] ss:$8 sps:$4 sm:$0xff]  }
 0x30d   :  { %v2394_v3 = vadd.f32 %v2393_v26, %v2321_v31  ;;  %v2433_v62 = vmul.f32 0.2, %v2392_v8  ;;  %vm2417_vm10 = vcmp.ge.f32.partialorder %v2392_v8, 0.0  ;;  %v2448_v30 = vsel %vm2416_vm8, %v2390_v17, %v2432_v55  ;;  %v9079_v55 = vld [vmem:[%s12722_s28 + $0x30] ss:$8 sps:$4 sm:$0xff]  }
 0x30e   :  { %v2395_v37 = vpop.f32.mrf.mxu1  ;;  %v9103_v41 = vld [vmem:[%s12722_s28 + $0xf0] ss:$8 sps:$4 sm:$0xff]  }
 0x30f   :  { %vm2418_vm9 = vcmp.ge.f32.partialorder %v2394_v3, 0.0  ;;  %v2434_v25 = vmul.f32 0.2, %v2394_v3  ;;  %v2396_v36 = vadd.f32 %v2395_v37, %v2323_v56  ;;  %v2449_v5 = vsel %vm2417_vm10, %v2392_v8, %v2433_v62  ;;  %v9059_v56 = vld [vmem:[%s12723_s22] sm:$0xff]   ;;  %v9091_v37 = vld [vmem:[%s12722_s28 + $0x10] ss:$8 sps:$4 sm:$0xff]  }
 0x310   :  { %v2399_v4 = vpop.f32.mrf.mxu1  ;;  %v9099_v62 = vld [vmem:[%s12722_s28 + $0x4] ss:$8 sps:$4 sm:$0xff]  }
 0x311   :  { %v2450_v54 = vsel %vm2418_vm9, %v2394_v3, %v2434_v25  ;;  %vm2419_vm11 = vcmp.ge.f32.partialorder %v2396_v36, 0.0  ;;  %v2435_v27 = vmul.f32 0.2, %v2396_v36  ;;  %v2400_v2 = vadd.f32 %v2399_v4, %v2327_v20  ;;  %v9087_v3 = vld [vmem:[%s12722_s28 + $0x24] ss:$8 sps:$4 sm:$0xff]  }
 0x312   :  { %v2460_v35 = vpack.c.bf16 %v2450_v54, %v2448_v30  ;;  %v2401_v39 = vpop.f32.mrf.mxu1  ;;  %v9097_v25 = vld [vmem:[%s12722_s28] ss:$8 sps:$4 sm:$0xff]   ;;  %v9111_v4 = vld [vmem:[%s12722_s28 + $0xe4] ss:$8 sps:$4 sm:$0xff]   ;;  %v9117_v54 = vld [vmem:[%s12722_s28 + $0xd4] ss:$8 sps:$4 sm:$0xff]  }
 0x313   :  { %v2402_v58 = vadd.f32 %v2401_v39, %v2329_v21  ;;  %v2451_v42 = vsel %vm2419_vm11, %v2396_v36, %v2435_v27  ;;  %v2436_v50 = vmul.f32 0.2, %v2400_v2  ;;  %vm2420_vm14 = vcmp.ge.f32.partialorder %v2400_v2, 0.0  ;;  %v9105_v36 = vld [vmem:[%s12722_s28 + $0xf4] ss:$8 sps:$4 sm:$0xff]   ;;  %v9063_v21 = vld [vmem:[%s12723_s22 + $0x20] sm:$0xff]  }
 0x314   :  { %v2403_v53 = vpop.f32.mrf.mxu1  ;;  %v2461_v38 = vpack.c.bf16 %v2451_v42, %v2449_v5  ;;  %v9109_v30 = vld [vmem:[%s12722_s28 + $0xe0] ss:$8 sps:$4 sm:$0xff]   ;;  %v9115_v20 = vld [vmem:[%s12722_s28 + $0xd0] ss:$8 sps:$4 sm:$0xff]   ;;  %v9129_v39 = vld [vmem:[%s12722_s28 + $0xb4] ss:$8 sps:$4 sm:$0xff]  }
 0x315   :  { %v2404_v22 = vadd.f32 %v2403_v53, %v2331_v61  ;;  %v2437_v7 = vmul.f32 0.2, %v2402_v58  ;;  %vm2421_vm13 = vcmp.ge.f32.partialorder %v2402_v58, 0.0  ;;  %v2452_v8 = vsel %vm2420_vm14, %v2400_v2, %v2436_v50  ;;  %v9064_v27 = vld [vmem:[%s12723_s22 + $0x28] sm:$0xff]   ;;  %v9065_v61 = vld [vmem:[%s12723_s22 + $0x30] sm:$0xff]   ;;  %v9066_v2 = vld [vmem:[%s12723_s22 + $0x38] sm:$0xff]  }
 0x316   :  { %v2405_v1 = vpop.f32.mrf.mxu1  ;;  %v9135_v5 = vld [vmem:[%s12722_s28 + $0xa4] ss:$8 sps:$4 sm:$0xff]   ;;  %v9133_v42 = vld [vmem:[%s12722_s28 + $0xa0] ss:$8 sps:$4 sm:$0xff]   ;;  %v9141_v53 = vld [vmem:[%s12722_s28 + $0x94] ss:$8 sps:$4 sm:$0xff]  }
 0x317   :  { %vm2422_vm12 = vcmp.ge.f32.partialorder %v2404_v22, 0.0  ;;  %v2438_v17 = vmul.f32 0.2, %v2404_v22  ;;  %v2406_v18 = vadd.f32 %v2405_v1, %v2333_v19  ;;  %v2453_v6 = vsel %vm2421_vm13, %v2402_v58, %v2437_v7  ;;  %v9127_v58 = vld [vmem:[%s12722_s28 + $0xb0] ss:$8 sps:$4 sm:$0xff]  }
 0x318   :  { %v9139_v19 = vld [vmem:[%s12722_s28 + $0x90] ss:$8 sps:$4 sm:$0xff]   ;;  %v9147_v1 = vld [vmem:[%s12722_s28 + $0x84] ss:$8 sps:$4 sm:$0xff]   ;;  %v9153_v50 = vld [vmem:[%s12722_s28 + $0x1b4] ss:$8 sps:$4 sm:$0xff]  }
 0x319   :  { %vm2423_vm15 = vcmp.ge.f32.partialorder %v2406_v18, 0.0  ;;  %v2439_v29 = vmul.f32 0.2, %v2406_v18  ;;  %v2454_v31 = vsel %vm2422_vm12, %v2404_v22, %v2438_v17  ;;  %v9142_v22 = vld [vmem:[%s12722_s28 + $0x1d0] ss:$8 sps:$4 sm:$0xff]  }
 0x31a   :  { %v2462_v26 = vpack.c.bf16 %v2454_v31, %v2452_v8  ;;  %v9150_v7 = vld [vmem:[%s12722_s28 + $0x1c4] ss:$8 sps:$4 sm:$0xff]   ;;  %v9145_v17 = vld [vmem:[%s12722_s28 + $0x80] ss:$8 sps:$4 sm:$0xff]   ;;  %v9151_v31 = vld [vmem:[%s12722_s28 + $0x1b0] ss:$8 sps:$4 sm:$0xff]  }
 0x31b   :  { %v2455_v48 = vsel %vm2423_vm15, %v2406_v18, %v2439_v29  ;;  %v9148_v18 = vld [vmem:[%s12722_s28 + $0x1c0] ss:$8 sps:$4 sm:$0xff]   ;;  %v9156_v29 = vld [vmem:[%s12722_s28 + $0x274] ss:$8 sps:$4 sm:$0xff]  }
 0x31c   :  { %v2463_v24 = vpack.c.bf16 %v2455_v48, %v2453_v6  ;;  %v9159_v6 = vld [vmem:[%s12722_s28 + $0x1a4] ss:$8 sps:$4 sm:$0xff]   ;;  %v9157_v48 = vld [vmem:[%s12722_s28 + $0x1a0] ss:$8 sps:$4 sm:$0xff]   ;;  %v9165_v8 = vld [vmem:[%s12722_s28 + $0x194] ss:$8 sps:$4 sm:$0xff]  }
 0x31e   :  { %2681 = vmatprep.subr.bf16.mxu0 %v2463_v24  ;;  %v9163_v24 = vld [vmem:[%s12722_s28 + $0x190] ss:$8 sps:$4 sm:$0xff]  }
 0x31f   :  { %2682 = vmatpush1.bf16.msra.mxu0 %v2462_v26  ;;  %v9171_v26 = vld [vmem:[%s12722_s28 + $0x184] ss:$8 sps:$4 sm:$0xff]  }
 0x320   :  { %2683 = vmatprep.subr.bf16.mxu0 %v2461_v38  ;;  %v9144_v38 = vld [vmem:[%s12722_s28 + $0x1d4] ss:$8 sps:$4 sm:$0xff]  }
 0x321   :  { %3707 = vmatprep.subr.bf16.mxu1 %v9144_v38  ;;  %v9189_v38 = vld [vmem:[%s12722_s28 + $0x214] ss:$8 sps:$4 sm:$0xff]  }
 0x322   :  { %3708 = vmatpush2.bf16.msra.mxu1 %v9142_v22 }
 0x323   :  { %2684 = vmatpush1.bf16.msra.mxu0 %v2460_v35  ;;  %v9121_v35 = vld [vmem:[%s12722_s28 + $0xc0] ss:$8 sps:$4 sm:$0xff]   ;;  %3709 = vmatprep.subr.bf16.mxu1 %v9150_v7 }
 0x324   :  { %2685 = vmatprep.subr.bf16.mxu0 %v2459_v28  ;;  %v9061_v28 = vld [vmem:[%s12723_s22 + $0x10] sm:$0xff]  }
 0x326   :  { %3710 = vmatpush2.bf16.msra.mxu1 %v9148_v18  ;;  %v9190_v18 = vld [vmem:[%s12722_s28 + $0x350] ss:$8 sps:$4 sm:$0xff]  }
 0x327   :  { %2686 = vmatpush1.bf16.msra.mxu0 %v2458_v52  ;;  %v9081_v52 = vld [vmem:[%s12722_s28 + $0x34] ss:$8 sps:$4 sm:$0xff]   ;;  %3711 = vmatprep.subr.bf16.mxu1 %v9153_v50  ;;  %v9195_v50 = vld [vmem:[%s12722_s28 + $0x204] ss:$8 sps:$4 sm:$0xff]  }
 0x328   :  { %2687 = vmatprep.subr.bf16.mxu0 %v2457_v32  ;;  %v9078_v32 = vld [vmem:[%s12722_s28 + $0x44] ss:$8 sps:$4 sm:$0xff]  }
 0x32a   :  { %3712 = vmatpush2.bf16.msra.mxu1 %v9151_v31 }
 0x32b   :  { %2688 = vmatpush1.bf16.msra.mxu0 %v2456_v16  ;;  %v9060_v16 = vld [vmem:[%s12723_s22 + $0x8] sm:$0xff]   ;;  %3713 = vmatprep.subr.bf16.mxu1 %v9159_v6 }
 0x32c   :  { %3634 = vmatprep.subr.bf16.mxu0 %v9069_v60  ;;  %v9169_v60 = vld [vmem:[%s12722_s28 + $0x180] ss:$8 sps:$4 sm:$0xff]  }
 0x32e   :  { %7992 = vmatmul.mubr.msk.bf16.vlgmr.msra.gmra.mxu0 %vm2648_vm0, %v9059_v56  ;;  %3714 = vmatpush2.bf16.msra.mxu1 %v9157_v48  ;;  %v9180_v56 = vld [vmem:[%s12722_s28 + $0x374] ss:$8 sps:$4 sm:$0xff]   ;;  %v9193_v48 = vld [vmem:[%s12722_s28 + $0x200] ss:$8 sps:$4 sm:$0xff]  }
 0x32f   :  { %2715 = vmatprep.mubr.bf16.mxu0 %v12721_v51  ;;  %3635 = vmatpush1.bf16.msra.mxu0 %v9067_v23 }
 0x330   :  { %3636 = vmatprep.subr.bf16.mxu0 %v9072_v0  ;;  %3715 = vmatprep.subr.bf16.mxu1 %v9165_v8  ;;  %v9196_v8 = vld [vmem:[%s12722_s28 + $0x340] ss:$8 sps:$4 sm:$0xff]  }
 0x332   :  { %3716 = vmatpush2.bf16.msra.mxu1 %v9163_v24  ;;  %v9201_v24 = vld [vmem:[%s12722_s28 + $0x2f4] ss:$8 sps:$4 sm:$0xff]  }
 0x333   :  { %3637 = vmatpush1.bf16.msra.mxu0 %v9070_v40  ;;  %3717 = vmatprep.subr.bf16.mxu1 %v9171_v26  ;;  %v9204_v26 = vld [vmem:[%s12722_s28 + $0x334] ss:$8 sps:$4 sm:$0xff]  }
 0x334   :  { %3638 = vmatprep.subr.bf16.mxu0 %v9075_v43 }
 0x336   :  { %7993 = vmatmul.mubr.msk.bf16.gmra.mxu0 %vm2648_vm0, %v9060_v16  ;;  %3718 = vmatpush2.bf16.msra.mxu1 %v9169_v60 }
 0x337   :  { %2725 = vmatprep.mubr.bf16.mxu0 %v12721_v51  ;;  %3639 = vmatpush1.bf16.msra.mxu0 %v9073_v63  ;;  %v9154_v63 = vld [vmem:[%s12722_s28 + $0x270] ss:$8 sps:$4 sm:$0xff]  }
 0x338   :  { %3640 = vmatprep.subr.bf16.mxu0 %v9078_v32  ;;  %3793 = vmatprep.subr.bf16.mxu1 %v9180_v56 }
 0x33b   :  { %3641 = vmatpush1.bf16.msra.mxu0 %v9076_v34 }
 0x33c   :  { %3642 = vmatprep.subr.bf16.mxu0 %v9081_v52  ;;  %v9162_v52 = vld [vmem:[%s12722_s28 + $0x264] ss:$8 sps:$4 sm:$0xff]  }
 0x33e   :  { %7994 = vmatmul.mubr.msk.bf16.gmra.mxu0 %vm2648_vm0, %v9061_v28 }
 0x33f   :  { %2735 = vmatprep.mubr.bf16.mxu0 %v12721_v51  ;;  %3643 = vmatpush1.bf16.msra.mxu0 %v9079_v55  ;;  %v9160_v55 = vld [vmem:[%s12722_s28 + $0x260] ss:$8 sps:$4 sm:$0xff]  }
 0x340   :  { %3644 = vmatprep.subr.bf16.mxu0 %v9087_v3 }
 0x343   :  { %3645 = vmatpush1.bf16.msra.mxu0 %v9085_v33  ;;  %v9168_v33 = vld [vmem:[%s12722_s28 + $0x254] ss:$8 sps:$4 sm:$0xff]  }
 0x344   :  { %3646 = vmatprep.subr.bf16.mxu0 %v9093_v57 }
 0x346   :  { %7995 = vmatmul.mubr.msk.bf16.gmra.mxu0 %vm2648_vm0, %v9062_v59 }
 0x347   :  { %2745 = vmatprep.mubr.bf16.mxu0 %v12721_v51  ;;  %3647 = vmatpush1.bf16.msra.mxu0 %v9091_v37  ;;  %v9166_v37 = vld [vmem:[%s12722_s28 + $0x250] ss:$8 sps:$4 sm:$0xff]  }
 0x348   :  { %3648 = vmatprep.subr.bf16.mxu0 %v9099_v62 }
 0x34b   :  { %3649 = vmatpush1.bf16.msra.mxu0 %v9097_v25 }
 0x34c   :  { %3650 = vmatprep.subr.bf16.mxu0 %v9105_v36  ;;  %v9174_v36 = vld [vmem:[%s12722_s28 + $0x244] ss:$8 sps:$4 sm:$0xff]  }
 0x34e   :  { %7996 = vmatmul.mubr.msk.bf16.gmra.mxu0 %vm2648_vm0, %v9063_v21 }
 0x34f   :  { %2755 = vmatprep.mubr.bf16.mxu0 %v12721_v51  ;;  %3651 = vmatpush2.bf16.msra.mxu0 %v9103_v41  ;;  %v9172_v41 = vld [vmem:[%s12722_s28 + $0x240] ss:$8 sps:$4 sm:$0xff]  }
 0x350   :  { %3652 = vmatprep.subr.bf16.mxu0 %v9111_v4 }
 0x353   :  { %3653 = vmatpush2.bf16.msra.mxu0 %v9109_v30  ;;  %v9177_v30 = vld [vmem:[%s12722_s28 + $0x234] ss:$8 sps:$4 sm:$0xff]  }
 0x354   :  { %3654 = vmatprep.subr.bf16.mxu0 %v9117_v54 }
 0x356   :  { %7997 = vmatmul.mubr.msk.bf16.gmra.mxu0 %vm2648_vm0, %v9064_v27 }
 0x357   :  { %2765 = vmatprep.mubr.bf16.mxu0 %v12721_v51  ;;  %3655 = vmatpush2.bf16.msra.mxu0 %v9115_v20  ;;  %v9175_v20 = vld [vmem:[%s12722_s28 + $0x230] ss:$8 sps:$4 sm:$0xff]  }
 0x358   :  { %3656 = vmatprep.subr.bf16.mxu0 %v9123_v49  ;;  %v9178_v49 = vld [vmem:[%s12722_s28 + $0x370] ss:$8 sps:$4 sm:$0xff]  }
 0x35b   :  { %3657 = vmatpush2.bf16.msra.mxu0 %v9121_v35 }
 0x35c   :  { %3658 = vmatprep.subr.bf16.mxu0 %v9129_v39 }
 0x35e   :  { %7998 = vmatmul.mubr.msk.bf16.gmra.mxu0 %vm2648_vm0, %v9065_v61  ;;  %v9183_v61 = vld [vmem:[%s12722_s28 + $0x224] ss:$8 sps:$4 sm:$0xff]  }
 0x35f   :  { %2775 = vmatprep.mubr.bf16.mxu0 %v12721_v51  ;;  %3659 = vmatpush2.bf16.msra.mxu0 %v9127_v58  ;;  %v9186_v58 = vld [vmem:[%s12722_s28 + $0x364] ss:$8 sps:$4 sm:$0xff]  }
 0x360   :  { %3660 = vmatprep.subr.bf16.mxu0 %v9135_v5 }
 0x363   :  { %3661 = vmatpush2.bf16.msra.mxu0 %v9133_v42  ;;  %v9181_v42 = vld [vmem:[%s12722_s28 + $0x220] ss:$8 sps:$4 sm:$0xff]  }
 0x364   :  { %3662 = vmatprep.subr.bf16.mxu0 %v9141_v53 }
 0x366   :  { %7999 = vmatmul.mubr.msk.bf16.gmra.mxu0 %vm2648_vm0, %v9066_v2  ;;  %v9184_v2 = vld [vmem:[%s12722_s28 + $0x360] ss:$8 sps:$4 sm:$0xff]  }
 0x367   :  { %3663 = vmatpush2.bf16.msra.mxu0 %v9139_v19  ;;  %v9192_v19 = vld [vmem:[%s12722_s28 + $0x354] ss:$8 sps:$4 sm:$0xff]  }
 0x368   :  { %3664 = vmatprep.subr.bf16.mxu0 %v9147_v1 }
 0x36b   :  { %3665 = vmatpush2.bf16.msra.mxu0 %v9145_v17  ;;  %v9187_v17 = vld [vmem:[%s12722_s28 + $0x210] ss:$8 sps:$4 sm:$0xff]  }
 0x36c   :  { %3740 = vmatprep.subr.bf16.mxu0 %v9156_v29  ;;  %v9198_v29 = vld [vmem:[%s12722_s28 + $0x344] ss:$8 sps:$4 sm:$0xff]  }
 0x3ee   :  { %v2707_v23 = vpop.f32.mrf.mxu0 }
 0x3f0   :  { %v2709_v0 = vpop.f32.mrf.mxu0 }
 0x3f2   :  { %v2711_v40 = vpop.f32.mrf.mxu0 }
 0x3f3   :  { %v8560_v32 = vpack.c.bf16 %v2711_v40, %v2707_v23  ;;  %v9199_v23 = vld [vmem:[%s12722_s28 + $0x2f0] ss:$8 sps:$4 sm:$0xff]  }
 0x3f4   :  { %v2713_v43 = vpop.f32.mrf.mxu0 }
 0x3f5   :  { %v8561_v16 = vpack.c.bf16 %v2713_v43, %v2709_v0  ;;  %v9202_v0 = vld [vmem:[%s12722_s28 + $0x330] ss:$8 sps:$4 sm:$0xff]   ;;  %v9207_v43 = vld [vmem:[%s12722_s28 + $0x2e4] ss:$8 sps:$4 sm:$0xff]  }
 0x3f6   :  { %v2717_v34 = vpop.f32.mrf.mxu0 }
 0x3f7   :  { %3666 = vmatprep.mubr.bf16.mxu0 %v8561_v16  ;;  %v9210_v16 = vld [vmem:[%s12722_s28 + $0x324] ss:$8 sps:$4 sm:$0xff]  }
 0x3f8   :  { %v2719_v28 = vpop.f32.mrf.mxu0  ;;  %3667 = vmatmul.mubr.bf16.vlgmr.msra.gmra.mxu0 %v8560_v32 }
 0x3f9   :  { %3741 = vmatpush1.bf16.msra.mxu0 %v9154_v63 }
 0x3fa   :  { %v2721_v3 = vpop.f32.mrf.mxu0  ;;  %3742 = vmatprep.subr.bf16.mxu0 %v9162_v52  ;;  %v9208_v52 = vld [vmem:[%s12722_s28 + $0x320] ss:$8 sps:$4 sm:$0xff]  }
 0x3fb   :  { %v8568_v62 = vpack.c.bf16 %v2721_v3, %v2717_v34  ;;  %v9205_v34 = vld [vmem:[%s12722_s28 + $0x2e0] ss:$8 sps:$4 sm:$0xff]  }
 0x3fc   :  { %v2723_v57 = vpop.f32.mrf.mxu0 }
 0x3fd   :  { %v8569_v59 = vpack.c.bf16 %v2723_v57, %v2719_v28  ;;  %3743 = vmatpush1.bf16.msra.mxu0 %v9160_v55  ;;  %v9213_v28 = vld [vmem:[%s12722_s28 + $0x2d4] ss:$8 sps:$4 sm:$0xff]   ;;  %v9211_v57 = vld [vmem:[%s12722_s28 + $0x2d0] ss:$8 sps:$4 sm:$0xff]  }
 0x3fe   :  { %v2727_v25 = vpop.f32.mrf.mxu0  ;;  %3744 = vmatprep.subr.bf16.mxu0 %v9168_v33  ;;  %v9216_v55 = vld [vmem:[%s12722_s28 + $0x314] ss:$8 sps:$4 sm:$0xff]  }
 0x3ff   :  { %3676 = vmatprep.mubr.bf16.mxu0 %v8569_v59  ;;  %v9214_v59 = vld [vmem:[%s12722_s28 + $0x310] ss:$8 sps:$4 sm:$0xff]  }
 0x400   :  { %v2729_v21 = vpop.f32.mrf.mxu0  ;;  %3677 = vmatmul.mubr.bf16.gmra.mxu0 %v8568_v62  ;;  %v9222_v62 = vld [vmem:[%s12722_s28 + $0x304] ss:$8 sps:$4 sm:$0xff]  }
 0x401   :  { %3745 = vmatpush1.bf16.msra.mxu0 %v9166_v37  ;;  %v9219_v37 = vld [vmem:[%s12722_s28 + $0x2c4] ss:$8 sps:$4 sm:$0xff]  }
 0x402   :  { %v2731_v4 = vpop.f32.mrf.mxu0  ;;  %3746 = vmatprep.subr.bf16.mxu0 %v9174_v36 }
 0x403   :  { %v8562_v35 = vpack.c.bf16 %v2731_v4, %v2727_v25  ;;  %v9225_v4 = vld [vmem:[%s12722_s28 + $0x2b4] ss:$8 sps:$4 sm:$0xff]  }
 0x404   :  { %v2733_v54 = vpop.f32.mrf.mxu0 }
 0x405   :  { %v8563_v27 = vpack.c.bf16 %v2733_v54, %v2729_v21  ;;  %3747 = vmatpush1.bf16.msra.mxu0 %v9172_v41  ;;  %v9217_v21 = vld [vmem:[%s12722_s28 + $0x2c0] ss:$8 sps:$4 sm:$0xff]  }
 0x406   :  { %v2737_v39 = vpop.f32.mrf.mxu0  ;;  %3748 = vmatprep.subr.bf16.mxu0 %v9177_v30  ;;  %v9220_v41 = vld [vmem:[%s12722_s28 + $0x300] ss:$8 sps:$4 sm:$0xff]   ;;  %v9228_v30 = vld [vmem:[%s12722_s28 + $0x3f4] ss:$8 sps:$4 sm:$0xff]  }
 0x407   :  { %3719 = vmatprep.mubr.bf16.mxu1 %v8563_v27 }
 0x408   :  { %v2739_v5 = vpop.f32.mrf.mxu0  ;;  %3720 = vmatmul.mubr.bf16.vlgmr.msra.gmra.mxu1 %v8562_v35 }
 0x409   :  { %3749 = vmatpush1.bf16.msra.mxu0 %v9175_v20  ;;  %3794 = vmatpush1.bf16.msra.mxu1 %v9178_v49  ;;  %v9223_v20 = vld [vmem:[%s12722_s28 + $0x2b0] ss:$8 sps:$4 sm:$0xff]  }
 0x40a   :  { %v2741_v53 = vpop.f32.mrf.mxu0  ;;  %3750 = vmatprep.subr.bf16.mxu0 %v9183_v61  ;;  %3795 = vmatprep.subr.bf16.mxu1 %v9186_v58  ;;  %v9226_v49 = vld [vmem:[%s12722_s28 + $0x3f0] ss:$8 sps:$4 sm:$0xff]   ;;  %v9234_v61 = vld [vmem:[%s12722_s28 + $0x3e4] ss:$8 sps:$4 sm:$0xff]   ;;  %v9229_v58 = vld [vmem:[%s12722_s28 + $0x2a0] ss:$8 sps:$4 sm:$0xff]  }
 0x40b   :  { %v8570_v22 = vpack.c.bf16 %v2741_v53, %v2737_v39  ;;  %v9231_v39 = vld [vmem:[%s12722_s28 + $0x2a4] ss:$8 sps:$4 sm:$0xff]   ;;  %v9235_v53 = vld [vmem:[%s12722_s28 + $0x290] ss:$8 sps:$4 sm:$0xff]  }
 0x40c   :  { %v2743_v1 = vpop.f32.mrf.mxu0 }
 0x40d   :  { %v8571_v7 = vpack.c.bf16 %v2743_v1, %v2739_v5  ;;  %3751 = vmatpush1.bf16.msra.mxu0 %v9181_v42  ;;  %3796 = vmatpush1.bf16.msra.mxu1 %v9184_v2  ;;  %v9232_v5 = vld [vmem:[%s12722_s28 + $0x3e0] ss:$8 sps:$4 sm:$0xff]   ;;  %v9237_v42 = vld [vmem:[%s12722_s28 + $0x294] ss:$8 sps:$4 sm:$0xff]  }
 0x40e   :  { %3752 = vmatprep.subr.bf16.mxu0 %v9189_v38  ;;  %3797 = vmatprep.subr.bf16.mxu1 %v9192_v19  ;;  %v11428_v31 = vpop.f32.mrf.mxu0  ;;  %v9240_v2 = vld [vmem:[%s12722_s28 + $0x3d4] ss:$8 sps:$4 sm:$0xff]   ;;  %v9238_v38 = vld [vmem:[%s12722_s28 + $0x3d0] ss:$8 sps:$4 sm:$0xff]   ;;  %v9243_v19 = vld [vmem:[%s12722_s28 + $0x284] ss:$8 sps:$4 sm:$0xff]  }
 0x40f   :  { %3729 = vmatprep.mubr.bf16.mxu1 %v8571_v7  ;;  %v9241_v1 = vld [vmem:[%s12722_s28 + $0x280] ss:$8 sps:$4 sm:$0xff]  }
 0x410   :  { %3730 = vmatmul.mubr.bf16.gmra.mxu1 %v8570_v22  ;;  %v2749_v6 = vpop.f32.mrf.mxu0  ;;  %v9246_v22 = vld [vmem:[%s12722_s28 + $0x3c4] ss:$8 sps:$4 sm:$0xff]   ;;  %v9244_v7 = vld [vmem:[%s12722_s28 + $0x3c0] ss:$8 sps:$4 sm:$0xff]  }
 0x411   :  { %3753 = vmatpush1.bf16.msra.mxu0 %v9187_v17  ;;  %3798 = vmatpush1.bf16.msra.mxu1 %v9190_v18  ;;  %v9249_v17 = vld [vmem:[%s12722_s28 + $0x3b4] ss:$8 sps:$4 sm:$0xff]   ;;  %v9247_v18 = vld [vmem:[%s12722_s28 + $0x3b0] ss:$8 sps:$4 sm:$0xff]  }
 0x412   :  { %3754 = vmatprep.subr.bf16.mxu0 %v9195_v50  ;;  %3799 = vmatprep.subr.bf16.mxu1 %v9198_v29  ;;  %v11442_v60 = vpop.f32.mrf.mxu0 }
 0x413   :  { %v8564_v29 = vpack.c.bf16 %v11442_v60, %v11428_v31  ;;  %v9253_v31 = vld [vmem:[%s12722_s28 + $0x390] ss:$8 sps:$4 sm:$0xff]  }
 0x414   :  { %v2753_v56 = vpop.f32.mrf.mxu0 }
 0x415   :  { %3755 = vmatpush1.bf16.msra.mxu0 %v9193_v48  ;;  %3800 = vmatpush1.bf16.msra.mxu1 %v9196_v8  ;;  %v8565_v40 = vpack.c.bf16 %v2753_v56, %v2749_v6  ;;  %v9252_v6 = vld [vmem:[%s12722_s28 + $0x3a4] ss:$8 sps:$4 sm:$0xff]   ;;  %v9250_v8 = vld [vmem:[%s12722_s28 + $0x3a0] ss:$8 sps:$4 sm:$0xff]  }
 0x416   :  { %3756 = vmatprep.subr.bf16.mxu0 %v9201_v24  ;;  %3801 = vmatprep.subr.bf16.mxu1 %v9204_v26  ;;  %v11456_v63 = vpop.f32.mrf.mxu0  ;;  %v9255_v24 = vld [vmem:[%s12722_s28 + $0x394] ss:$8 sps:$4 sm:$0xff]   ;;  %v9258_v56 = vld [vmem:[%s12722_s28 + $0x384] ss:$8 sps:$4 sm:$0xff]  }
 0x417   :  { %3772 = vmatprep.mubr.bf16.mxu0 %v8565_v40 }
 0x418   :  { %v11458_v32 = vpop.f32.mrf.mxu0 }
 0x419   :  { %3757 = vmatpush2.bf16.msra.mxu0 %v9199_v23  ;;  %3802 = vmatpush1.bf16.msra.mxu1 %v9202_v0  ;;  %v9256_v0 = vld [vmem:[%s12722_s28 + $0x380] ss:$8 sps:$4 sm:$0xff]   ;;  %s9695_s28 = scalar_lea.vmem %s512_s5, 16384 }
 0x41a   :  { %3758 = vmatprep.subr.bf16.mxu0 %v9207_v43  ;;  %3803 = vmatprep.subr.bf16.mxu1 %v9210_v16  ;;  %v11472_v3 = vpop.f32.mrf.mxu0  ;;  %p9696_p13 = scmp.ne.s32.totalorder %s512_s5, %s9695_s28  ;;  %p9701_p1 = scmp.lt.s32.totalorder %s9695_s28, %s9695_s28 }
 0x41b   :  { %v8572_v60 = vpack.c.bf16 %v11472_v3, %v11456_v63 }
 0x41c   :  { %v11474_v33 = vpop.f32.mrf.mxu0  ;;  %p9702_p2 = por %p9701_p1, %p9700_p0 }
 0x41d   :  { %3759 = vmatpush2.bf16.msra.mxu0 %v9205_v34  ;;  %3804 = vmatpush1.bf16.msra.mxu1 %v9208_v52  ;;  %v8573_v50 = vpack.c.bf16 %v11474_v33, %v11458_v32  ;;  %v9741_v32 = vmov 0.0  }
 0x41e   :  { %3760 = vmatprep.subr.bf16.mxu0 %v9213_v28  ;;  %3805 = vmatprep.subr.bf16.mxu1 %v9216_v55  ;;  %v11488_v25 = vpop.f32.mrf.mxu0  ;;  %p9703_p3 = pnand %p9702_p2, %p9696_p13 }
 0x420   :  { %v2769_v36 = vpop.f32.mrf.mxu0 }
 0x421   :  { %3761 = vmatpush2.bf16.msra.mxu0 %v9211_v57  ;;  %3806 = vmatpush1.bf16.msra.mxu1 %v9214_v59 }
 0x422   :  { %3762 = vmatprep.subr.bf16.mxu0 %v9219_v37  ;;  %3807 = vmatprep.subr.bf16.mxu1 %v9222_v62  ;;  %v11502_v54 = vpop.f32.mrf.mxu0 }
 0x423   :  { %v8566_v16 = vpack.c.bf16 %v11502_v54, %v11488_v25 }
 0x424   :  { %v2773_v27 = vpop.f32.mrf.mxu0 }
 0x425   :  { %3763 = vmatpush2.bf16.msra.mxu0 %v9217_v21  ;;  %3808 = vmatpush1.bf16.msra.mxu1 %v9220_v41  ;;  %v8567_v35 = vpack.c.bf16 %v2773_v27, %v2769_v36 }
 0x426   :  { %3764 = vmatprep.subr.bf16.mxu0 %v9225_v4  ;;  %3809 = vmatprep.subr.bf16.mxu1 %v9228_v30  ;;  %v2777_v48 = vpop.f32.mrf.mxu0 }
 0x427   :  { %3825 = vmatprep.mubr.bf16.mxu1 %v8567_v35 }
 0x428   :  { %v2779_v26 = vpop.f32.mrf.mxu0 }
 0x429   :  { %3765 = vmatpush2.bf16.msra.mxu0 %v9223_v20  ;;  %3810 = vmatpush2.bf16.msra.mxu1 %v9226_v49 }
 0x42a   :  { %3766 = vmatprep.subr.bf16.mxu0 %v9231_v39  ;;  %3811 = vmatprep.subr.bf16.mxu1 %v9234_v61  ;;  %v2781_v23 = vpop.f32.mrf.mxu0 }
 0x42b   :  { %v8574_v63 = vpack.c.bf16 %v2781_v23, %v2777_v48 }
 0x42c   :  { %v2783_v40 = vpop.f32.mrf.mxu0 }
 0x42d   :  { %3767 = vmatpush2.bf16.msra.mxu0 %v9229_v58  ;;  %3812 = vmatpush2.bf16.msra.mxu1 %v9232_v5  ;;  %v8575_v43 = vpack.c.bf16 %v2783_v40, %v2779_v26 }
 0x42e   :  { %3768 = vmatprep.subr.bf16.mxu0 %v9237_v42  ;;  %3813 = vmatprep.subr.bf16.mxu1 %v9240_v2 }
 0x431   :  { %3769 = vmatpush2.bf16.msra.mxu0 %v9235_v53  ;;  %3814 = vmatpush2.bf16.msra.mxu1 %v9238_v38 }
 0x432   :  { %3770 = vmatprep.subr.bf16.mxu0 %v9243_v19  ;;  %3815 = vmatprep.subr.bf16.mxu1 %v9246_v22 }
 0x435   :  { %3771 = vmatpush2.bf16.msra.mxu0 %v9241_v1  ;;  %3816 = vmatpush2.bf16.msra.mxu1 %v9244_v7 }
 0x436   :  { %3817 = vmatprep.subr.bf16.mxu1 %v9249_v17 }
 0x438   :  { %3773 = vmatmul.mubr.bf16.vlgmr.msra.gmra.mxu0 %v8564_v29 }
 0x439   :  { %3818 = vmatpush2.bf16.msra.mxu1 %v9247_v18  ;;  %3782 = vmatprep.mubr.bf16.mxu0 %v8573_v50 }
 0x43a   :  { %3819 = vmatprep.subr.bf16.mxu1 %v9252_v6 }
 0x43d   :  { %3820 = vmatpush2.bf16.msra.mxu1 %v9250_v8 }
 0x43e   :  { %3821 = vmatprep.subr.bf16.mxu1 %v9255_v24 }
 0x440   :  { %3783 = vmatmul.mubr.bf16.gmra.mxu0 %v8572_v60 }
 0x441   :  { %3822 = vmatpush2.bf16.msra.mxu1 %v9253_v31  ;;  %3922 = vmatprep.mubr.f32.mxu0 %v9741_v32 }
 0x442   :  { %3823 = vmatprep.subr.bf16.mxu1 %v9258_v56 }
 0x445   :  { %3824 = vmatpush2.bf16.msra.mxu1 %v9256_v0 }
 0x448   :  { %3826 = vmatmul.mubr.bf16.vlgmr.msra.gmra.mxu1 %v8566_v16 }
 0x449   :  { %3835 = vmatprep.mubr.bf16.mxu1 %v8575_v43 }
 0x450   :  { %3836 = vmatmul.mubr.bf16.gmra.mxu1 %v8574_v63 }
 0x451   :  { %3993 = vmatprep.mubr.f32.mxu1 %v9741_v32 }
 0x4b8   :  { %v3668_v34 = vpop.f32.mrf.mxu0 }
 0x4ba   :  { %v3670_v52 = vpop.f32.mrf.mxu0 }
 0x4bc   :  { %v3672_v28 = vpop.f32.mrf.mxu0 }
 0x4be   :  { %v3674_v55 = vpop.f32.mrf.mxu0 }
 0x4c0   :  { %v3678_v3 = vpop.f32.mrf.mxu0 }
 0x4c2   :  { %v3680_v57 = vpop.f32.mrf.mxu0 }
 0x4c4   :  { %v3682_v37 = vpop.f32.mrf.mxu0 }
 0x4c6   :  { %v3684_v25 = vpop.f32.mrf.mxu0 }
 0x4c8   :  { %v3721_v33 = vpop.f32.mrf.mxu1 }
 0x4c9   :  { %v3722_v40 = vadd.f32 %v3721_v33, %v3668_v34 }
 0x4ca   :  { %v3723_v59 = vpop.f32.mrf.mxu1 }
 0x4cb   :  { %v3724_v60 = vadd.f32 %v3723_v59, %v3670_v52 }
 0x4cc   :  { %v3725_v62 = vpop.f32.mrf.mxu1 }
 0x4cd   :  { %v3726_v8 = vadd.f32 %v3725_v62, %v3672_v28 }
 0x4ce   :  { %v3727_v36 = vpop.f32.mrf.mxu1 }
 0x4cf   :  { %v3728_v29 = vadd.f32 %v3727_v36, %v3674_v55 }
 0x4d0   :  { %v3731_v41 = vpop.f32.mrf.mxu1 }
 0x4d1   :  { %v3732_v17 = vadd.f32 %v3731_v41, %v3678_v3 }
 0x4d2   :  { %v3733_v30 = vpop.f32.mrf.mxu1 }
 0x4d3   :  { %v3734_v1 = vadd.f32 %v3733_v30, %v3680_v57  ;;  %v9742_v30 = vmov 1.0  }
 0x4d4   :  { %v3735_v27 = vpop.f32.mrf.mxu1 }
 0x4d5   :  { %v3736_v38 = vadd.f32 %v3735_v27, %v3682_v37  ;;  %v4047_v27 = vld [vmem:[%s12724_s30 + $0x178] sm:$0xff] }
 0x4d6   :  { %v3737_v49 = vpop.f32.mrf.mxu1 }
 0x4d7   :  { %v3738_v7 = vadd.f32 %v3737_v49, %v3684_v25  ;;  %v4062_v49 = vld [vmem:[%s12724_s30 + $0x1f0] sm:$0xff] }
 0x4f8   :  { %v3774_v21 = vpop.f32.mrf.mxu0 }
 0x4f9   :  { %v3775_v55 = vadd.f32 %v3774_v21, %v3722_v40  ;;  %v4031_v21 = vld [vmem:[%s12724_s30 + $0xf8] sm:$0xff]  ;;  %v4008_v40 = vld [vmem:[%s12724_s30 + $0x40] sm:$0xff] }
 0x4fa   :  { %v3776_v4 = vpop.f32.mrf.mxu0 }
 0x4fb   :  { %v3777_v63 = vadd.f32 %v3776_v4, %v3724_v60  ;;  %v4063_v4 = vld [vmem:[%s12724_s30 + $0x1f8] sm:$0xff]  ;;  %v4024_v60 = vld [vmem:[%s12724_s30 + $0xc0] sm:$0xff] }
 0x4fc   :  { %v3778_v54 = vpop.f32.mrf.mxu0 }
 0x4fd   :  { %v3779_v43 = vadd.f32 %v3778_v54, %v3726_v8  ;;  %v4015_v54 = vld [vmem:[%s12724_s30 + $0x78] sm:$0xff]  ;;  %v4057_v8 = vld [vmem:[%s12724_s30 + $0x1c8] sm:$0xff] }
 0x4fe   :  { %v3780_v20 = vpop.f32.mrf.mxu0 }
 0x4ff   :  { %v3781_v56 = vadd.f32 %v3780_v20, %v3728_v29  ;;  %v4030_v20 = vld [vmem:[%s12724_s30 + $0xf0] sm:$0xff] }
 0x500   :  { %v3784_v35 = vpop.f32.mrf.mxu0  ;;  %v4010_v29 = vld [vmem:[%s12724_s30 + $0x50] sm:$0xff] }
 0x501   :  { %v3785_v24 = vadd.f32 %v3784_v35, %v3732_v17  ;;  %v4014_v35 = vld [vmem:[%s12724_s30 + $0x70] sm:$0xff]  ;;  %v4043_v17 = vld [vmem:[%s12724_s30 + $0x158] sm:$0xff] }
 0x502   :  { %v3786_v61 = vpop.f32.mrf.mxu0 }
 0x503   :  { %v3787_v6 = vadd.f32 %v3786_v61, %v3734_v1  ;;  %v4029_v61 = vld [vmem:[%s12724_s30 + $0xe8] sm:$0xff]  ;;  %v4059_v1 = vld [vmem:[%s12724_s30 + $0x1d8] sm:$0xff] }
 0x504   :  { %v3788_v42 = vpop.f32.mrf.mxu0 }
 0x505   :  { %v3789_v18 = vadd.f32 %v3788_v42, %v3736_v38  ;;  %v4045_v42 = vld [vmem:[%s12724_s30 + $0x168] sm:$0xff]  ;;  %v4012_v38 = vld [vmem:[%s12724_s30 + $0x60] sm:$0xff] }
 0x506   :  { %v3790_v19 = vpop.f32.mrf.mxu0 }
 0x507   :  { %v3791_v48 = vadd.f32 %v3790_v19, %v3738_v7  ;;  %v4044_v19 = vld [vmem:[%s12724_s30 + $0x160] sm:$0xff]  ;;  %v4011_v7 = vld [vmem:[%s12724_s30 + $0x58] sm:$0xff] }
 0x508   :  { %v3827_v39 = vpop.f32.mrf.mxu1 }
 0x509   :  { %v11603_v59 = vadd.f32 %v3827_v39, %v3775_v55  ;;  %v4046_v39 = vld [vmem:[%s12724_s30 + $0x170] sm:$0xff]  ;;  %v4007_v55 = vld [vmem:[%s12724_s30 + $0x38] sm:$0xff] }
 0x50a   :  { %v3829_v58 = vpop.f32.mrf.mxu1 }
 0x50b   :  { %v11598_v34 = vadd.f32 %v3829_v58, %v3777_v63  ;;  %v3846_v41 = vmul.f32 %v11603_v59, %v11603_v59  ;;  %v4061_v58 = vld [vmem:[%s12724_s30 + $0x1e8] sm:$0xff]  ;;  %v4023_v63 = vld [vmem:[%s12724_s30 + $0xb8] sm:$0xff] }
 0x50c   :  { %v3831_v5 = vpop.f32.mrf.mxu1 }
 0x50d   :  { %v11593_v57 = vadd.f32 %v3831_v5, %v3779_v43  ;;  %v3847_v36 = vmul.f32 %v11598_v34, %v11598_v34  ;;  %v4013_v5 = vld [vmem:[%s12724_s30 + $0x68] sm:$0xff]  ;;  %v4040_v43 = vld [vmem:[%s12724_s30 + $0x140] sm:$0xff] }
 0x50e   :  { %v3833_v2 = vpop.f32.mrf.mxu1 }
 0x50f   :  { %v11588_v3 = vadd.f32 %v3833_v2, %v3781_v56  ;;  %v3848_v25 = vmul.f32 %v11593_v57, %v11593_v57  ;;  %v4028_v2 = vld [vmem:[%s12724_s30 + $0xe0] sm:$0xff] }
 0x510   :  { %v3837_v53 = vpop.f32.mrf.mxu1  ;;  %v4056_v56 = vld [vmem:[%s12724_s30 + $0x1c0] sm:$0xff] }
 0x511   :  { %v11586_v16 = vadd.f32 %v3837_v53, %v3785_v24  ;;  %v3849_v62 = vmul.f32 %v11588_v3, %v11588_v3  ;;  %v4060_v53 = vld [vmem:[%s12724_s30 + $0x1e0] sm:$0xff]  ;;  %v4009_v24 = vld [vmem:[%s12724_s30 + $0x48] sm:$0xff] }
 0x512   :  { %v3839_v22 = vpop.f32.mrf.mxu1 }
 0x513   :  { %v11582_v23 = vadd.f32 %v3839_v22, %v3787_v6  ;;  %v3850_v37 = vmul.f32 %v11586_v16, %v11586_v16  ;;  %v4027_v22 = vld [vmem:[%s12724_s30 + $0xd8] sm:$0xff]  ;;  %v4042_v6 = vld [vmem:[%s12724_s30 + $0x150] sm:$0xff] }
 0x514   :  { %v3841_v50 = vpop.f32.mrf.mxu1 }
 0x515   :  { %v11580_v26 = vadd.f32 %v3841_v50, %v3789_v18  ;;  %v3851_v33 = vmul.f32 %v11582_v23, %v11582_v23  ;;  %v4026_v18 = vld [vmem:[%s12724_s30 + $0xd0] sm:$0xff] }
 0x516   :  { %v3843_v31 = vpop.f32.mrf.mxu1  ;;  %v4058_v50 = vld [vmem:[%s12724_s30 + $0x1d0] sm:$0xff] }
 0x517   :  { %v11584_v0 = vadd.f32 %v3843_v31, %v3791_v48  ;;  %v3852_v52 = vmul.f32 %v11580_v26, %v11580_v26  ;;  %v4025_v48 = vld [vmem:[%s12724_s30 + $0xc8] sm:$0xff] }
 0x518   :  { %v4041_v31 = vld [vmem:[%s12724_s30 + $0x148] sm:$0xff] }
 0x519   :  { %3882 = vmatprep.subr.mxu0 %v11584_v0  ;;  %v3853_v28 = vmul.f32 %v11584_v0, %v11584_v0 }
 0x51a   :  { %3883 = vmatpush1.msra.mxu0 %v11580_v26 }
 0x51b   :  { %3884 = vmatprep.subr.mxu0 %v11582_v23  ;;  %3953 = vmatprep.subr.mxu1 %v3853_v28  ;;  %v4055_v28 = vld [vmem:[%s12724_s30 + $0x1b8] sm:$0xff] }
 0x51c   :  { %3885 = vmatpush1.msra.mxu0 %v11586_v16  ;;  %3954 = vmatpush1.msra.mxu1 %v3852_v52  ;;  %v4039_v52 = vld [vmem:[%s12724_s30 + $0x138] sm:$0xff] }
 0x51d   :  { %3886 = vmatprep.subr.mxu0 %v11588_v3  ;;  %3955 = vmatprep.subr.mxu1 %v3851_v33  ;;  %v4022_v33 = vld [vmem:[%s12724_s30 + $0xb0] sm:$0xff] }
 0x51e   :  { %3887 = vmatpush1.msra.mxu0 %v11593_v57  ;;  %3956 = vmatpush1.msra.mxu1 %v3850_v37  ;;  %v4054_v37 = vld [vmem:[%s12724_s30 + $0x1b0] sm:$0xff] }
 0x51f   :  { %3888 = vmatprep.subr.mxu0 %v11598_v34  ;;  %3957 = vmatprep.subr.mxu1 %v3849_v62  ;;  %v4006_v62 = vld [vmem:[%s12724_s30 + $0x30] sm:$0xff] }
 0x520   :  { %3889 = vmatpush1.msra.mxu0 %v11603_v59  ;;  %3958 = vmatpush1.msra.mxu1 %v3848_v25  ;;  %v4038_v25 = vld [vmem:[%s12724_s30 + $0x130] sm:$0xff] }
 0x521   :  { %3959 = vmatprep.subr.mxu1 %v3847_v36  ;;  %8160 = vmatmul.mubr.msk.f32.vlgmr.msra.gmra.mxu0 %vm3854_vm1, %v9742_v30  ;;  %v4021_v36 = vld [vmem:[%s12724_s30 + $0xa8] sm:$0xff] }
 0x522   :  { %3960 = vmatpush1.msra.mxu1 %v3846_v41  ;;  %8592 = vmatprep.subr.mxu0 %v4031_v21  ;;  %v4053_v21 = vld [vmem:[%s12724_s30 + $0x1a8] sm:$0xff] }
 0x523   :  { %8161 = vmatmul.mubr.msk.f32.vlgmr.msra.gmra.mxu1 %vm3854_vm1, %v9742_v30  ;;  %8627 = vmatprep.subr.mxu1 %v4063_v4  ;;  %v4005_v41 = vld [vmem:[%s12724_s30 + $0x28] sm:$0xff] }
 0x524   :  { %8593 = vmatpush3.msra.mxu0 %v4015_v54  ;;  %8628 = vmatpush3.msra.mxu1 %v4047_v27  ;;  %v4037_v4 = vld [vmem:[%s12724_s30 + $0x128] sm:$0xff]  ;;  %v4020_v54 = vld [vmem:[%s12724_s30 + $0xa0] sm:$0xff] }
 0x525   :  { %8594 = vmatprep.subr.mxu0 %v4030_v20  ;;  %8629 = vmatprep.subr.mxu1 %v4062_v49  ;;  %v4052_v27 = vld [vmem:[%s12724_s30 + $0x1a0] sm:$0xff] }
 0x526   :  { %8595 = vmatpush3.msra.mxu0 %v4014_v35  ;;  %8630 = vmatpush3.msra.mxu1 %v4046_v39  ;;  %v4004_v20 = vld [vmem:[%s12724_s30 + $0x20] sm:$0xff]  ;;  %v4019_v35 = vld [vmem:[%s12724_s30 + $0x98] sm:$0xff] }
 0x527   :  { %8596 = vmatprep.subr.mxu0 %v4029_v61  ;;  %8631 = vmatprep.subr.mxu1 %v4061_v58  ;;  %v4036_v49 = vld [vmem:[%s12724_s30 + $0x120] sm:$0xff]  ;;  %v4051_v39 = vld [vmem:[%s12724_s30 + $0x198] sm:$0xff] }
 0x528   :  { %8597 = vmatpush3.msra.mxu0 %v4013_v5  ;;  %8632 = vmatpush3.msra.mxu1 %v4045_v42  ;;  %v4003_v61 = vld [vmem:[%s12724_s30 + $0x18] sm:$0xff]  ;;  %v4018_v5 = vld [vmem:[%s12724_s30 + $0x90] sm:$0xff] }
 0x529   :  { %8598 = vmatprep.subr.mxu0 %v4028_v2  ;;  %8633 = vmatprep.subr.mxu1 %v4060_v53  ;;  %v4035_v58 = vld [vmem:[%s12724_s30 + $0x118] sm:$0xff]  ;;  %v4050_v42 = vld [vmem:[%s12724_s30 + $0x190] sm:$0xff] }
 0x52a   :  { %8599 = vmatpush3.msra.mxu0 %v4012_v38  ;;  %8634 = vmatpush3.msra.mxu1 %v4044_v19  ;;  %v4002_v2 = vld [vmem:[%s12724_s30 + $0x10] sm:$0xff]  ;;  %v4017_v38 = vld [vmem:[%s12724_s30 + $0x88] sm:$0xff] }
 0x52b   :  { %8600 = vmatprep.subr.mxu0 %v4027_v22  ;;  %8635 = vmatprep.subr.mxu1 %v4059_v1  ;;  %v4034_v53 = vld [vmem:[%s12724_s30 + $0x110] sm:$0xff]  ;;  %v4001_v19 = vld [vmem:[%s12724_s30 + $0x8] sm:$0xff]  ;;  %v4016_v1 = vld [vmem:[%s12724_s30 + $0x80] sm:$0xff] }
 0x52c   :  { %8601 = vmatpush3.msra.mxu0 %v4011_v7  ;;  %8636 = vmatpush3.msra.mxu1 %v4043_v17  ;;  %v4049_v22 = vld [vmem:[%s12724_s30 + $0x188] sm:$0xff]  ;;  %v4000_v17 = vld [vmem:[%s12724_s30] sm:$0xff] }
 0x52d   :  { %8602 = vmatprep.subr.mxu0 %v4026_v18  ;;  %8637 = vmatprep.subr.mxu1 %v4058_v50  ;;  %v4033_v7 = vld [vmem:[%s12724_s30 + $0x108] sm:$0xff]  ;;  %v4048_v18 = vld [vmem:[%s12724_s30 + $0x180] sm:$0xff] }
 0x52e   :  { %8603 = vmatpush3.msra.mxu0 %v4010_v29  ;;  %8638 = vmatpush3.msra.mxu1 %v4042_v6  ;;  %v4032_v50 = vld [vmem:[%s12724_s30 + $0x100] sm:$0xff] }
 0x52f   :  { %8604 = vmatprep.subr.mxu0 %v4025_v48  ;;  %8639 = vmatprep.subr.mxu1 %v4057_v8 }
 0x530   :  { %8605 = vmatpush3.msra.mxu0 %v4009_v24  ;;  %8640 = vmatpush3.msra.mxu1 %v4041_v31 }
 0x531   :  { %8606 = vmatprep.subr.mxu0 %v4024_v60  ;;  %8641 = vmatprep.subr.mxu1 %v4056_v56 }
 0x532   :  { %8607 = vmatpush3.msra.mxu0 %v4008_v40  ;;  %8642 = vmatpush3.msra.mxu1 %v4040_v43 }
 0x533   :  { %8608 = vmatprep.subr.mxu0 %v4023_v63  ;;  %8643 = vmatprep.subr.mxu1 %v4055_v28 }
 0x534   :  { %8609 = vmatpush3.msra.mxu0 %v4007_v55  ;;  %8644 = vmatpush3.msra.mxu1 %v4039_v52 }
 0x535   :  { %8610 = vmatprep.subr.mxu0 %v4022_v33  ;;  %8645 = vmatprep.subr.mxu1 %v4054_v37 }
 0x536   :  { %8611 = vmatpush3.msra.mxu0 %v4006_v62  ;;  %8646 = vmatpush3.msra.mxu1 %v4038_v25  ;;  %v9743_v62 = vmov 1966171168  }
 0x537   :  { %8612 = vmatprep.subr.mxu0 %v4021_v36  ;;  %8647 = vmatprep.subr.mxu1 %v4053_v21  ;;  %v4216_v25 = vunpack.c.l.s4 %v9743_v62  ;;  %v4218_v36 = vlaneseq }
 0x538   :  { %8613 = vmatpush3.msra.mxu0 %v4005_v41  ;;  %8648 = vmatpush3.msra.mxu1 %v4037_v4  ;;  %v4247_v4 = vld [vmem:[#allocation10 + $0x18] sm:$0xff] }
 0x539   :  { %8614 = vmatprep.subr.mxu0 %v4020_v54  ;;  %8649 = vmatprep.subr.mxu1 %v4052_v27  ;;  %v4217_v21 = vunpack.c.0.s8 %v4216_v25  ;;  %v4219_v41 = vshrl.u32 %v4218_v36, 7  ;;  %v4246_v27 = vld [vmem:[#allocation10 + $0x10] sm:$0xff] }
 0x53a   :  { %8615 = vmatpush3.msra.mxu0 %v4004_v20  ;;  %8650 = vmatpush3.msra.mxu1 %v4036_v49  ;;  %v4245_v20 = vld [vmem:[#allocation10 + $0x8] sm:$0xff]  ;;  %v4244_v49 = vld [vmem:[#allocation10] sm:$0xff] }
 0x53b   :  { %8616 = vmatprep.subr.mxu0 %v4019_v35  ;;  %8651 = vmatprep.subr.mxu1 %v4051_v39  ;;  %v11818_v54 = vsub.s32 %v4217_v21, %v4219_v41 }
 0x53c   :  { %8617 = vmatpush3.msra.mxu0 %v4003_v61  ;;  %8652 = vmatpush3.msra.mxu1 %v4035_v58  ;;  %v4211_v58 = vld [vmem:[#allocation8] sm:$0x1] }
 0x53d   :  { %8618 = vmatprep.subr.mxu0 %v4018_v5  ;;  %8653 = vmatprep.subr.mxu1 %v4050_v42 }
 0x53e   :  { %8619 = vmatpush3.msra.mxu0 %v4002_v2  ;;  %8654 = vmatpush3.msra.mxu1 %v4034_v53  ;;  %v4233_v2 = vld [vmem:[%s12725_s0] sm:$0x1]  ;;  %v11825_v53 = vsub.s32 0, %v4219_v41 }
 0x53f   :  { %8620 = vmatprep.subr.mxu0 %v4017_v38  ;;  %8655 = vmatprep.subr.mxu1 %v4049_v22 }
 0x540   :  { %8621 = vmatpush3.msra.mxu0 %v4001_v19  ;;  %8656 = vmatpush3.msra.mxu1 %v4033_v7 }
 0x541   :  { %8622 = vmatprep.subr.mxu0 %v4016_v1  ;;  %8657 = vmatprep.subr.mxu1 %v4048_v18 }
 0x542   :  { %8623 = vmatpush3.msra.mxu0 %v4000_v17  ;;  %8658 = vmatpush3.msra.mxu1 %v4032_v50 }
 0x543   :  { %4280 = vmatprep.subr.mxu0 %v4247_v4 }
 0x5e1   :  { %v3924_v29 = vpop.f32.mrf.mxu0 }
 0x5e3   :  { %v3995_v6 = vpop.f32.mrf.mxu1  ;;  %v3926_v48 = vpop.f32.mrf.mxu0 }
 0x5e4   :  { %4128 = vmatprep.mubr.f32.mxu0 %v3926_v48 }
 0x5e5   :  { %v3997_v8 = vpop.f32.mrf.mxu1  ;;  %4129 = vmatmul.mubr.f32.vlgmr.msra.gmra.mxu0 %v3924_v29 }
 0x5e6   :  { %4198 = vmatprep.mubr.f32.mxu1 %v3997_v8  ;;  %4316 = vmatprep.mubr.f32.mxu0 %v9741_v32 }
 0x5e7   :  { %4199 = vmatmul.mubr.f32.vlgmr.msra.gmra.mxu1 %v3995_v6  ;;  %4281 = vmatpush1.msra.mxu0 %v4246_v27 }
 0x5e8   :  { %4282 = vmatprep.subr.mxu0 %v4245_v20 }
 0x5e9   :  { %4283 = vmatpush1.msra.mxu0 %v4244_v49 }
 0x6a5   :  { %v8624_v24 = vpop.f32.mrf.mxu0 }
 0x6a7   :  { %v8659_v31 = vpop.f32.mrf.mxu1  ;;  %v8625_v60 = vpop.f32.mrf.mxu0 }
 0x6a8   :  { %v8626_v40 = vadd.f32 %v8625_v60, %v8624_v24 }
 0x6a9   :  { %v8660_v56 = vpop.f32.mrf.mxu1 }
 0x6aa   :  { %v8661_v43 = vadd.f32 %v8660_v56, %v8659_v31 }
 0x6ac   :  { %v4201_v63 = vadd.f32 %v8661_v43, %v8626_v40 }
 0x6ae   :  { %v4204_v28 = vmul.f32 0.001953125, %v4201_v63 }
 0x6b0   :  { %v4205_v55 = vmul.f32 %v4204_v28, %v4204_v28 }
 0x6b2   :  { %4207 = vrot.lane.b32.xlu0 %v4205_v55, %s9735_s6  ;;  %s9744_s6 = smov 112  }
 0x724   :  { %v4208_v52 = vpop.permute.xlu0 %4207 }
 0x725   :  { %v4210_v33 = vsub.f32 %v4204_v28, %v4208_v52 }
 0x727   :  { %v4212_v37 = vadd.f32 1e-05, %v4210_v33 }
 0x729   :  { %9259 = vrsqrt.f32 %v4212_v37 }
 0x736   :  { %v9260_v35 = vpop.eup %9259 }
 0x737   :  { %v4221_v39 = vrot.slane %v9260_v35, %v11818_v54 }
 0x739   :  { %v4228_v61 = vrot.slane %v4221_v39, %v11818_v54 }
 0x73b   :  { %4229 = vrot.lane.b32.xlu0 %v4228_v61, %s9744_s6 }
 0x7ad   :  { %v4230_v5 = vpop.permute.xlu0 %4229 }
 0x7ae   :  { %v4232_v42 = vmul.f32 %v4230_v5, %v4211_v58 }
 0x7b0   :  { %v4234_v38 = vmul.f32 %v4232_v42, %v4204_v28 }
 0x7b2   :  { %v4235_v19 = vsub.f32 %v4233_v2, %v4234_v38 }
 0x7b4   :  { %v4240_v22 = vrot.slane %v4235_v19, %v11825_v53 }
 0x7b6   :  { %v4243_v1 = vsel %vm4242_vm2, %v4232_v42, %v4240_v22 }
 0x7b7   :  { %8162 = vmatmul.mubr.msk.f32.vlgmr.msra.gmra.mxu0 %vm4248_vm3, %v4243_v1 }
 0x7b8   :  { %9706 = shalt.err (!%p9703_p3)  }
 0x7b9   :  { %514 = dma.hbm_to_vmem [thread:$0]  %s12460_s16, 16384, %s512_s5, [#allocation5 + $0x1]  ;;  %v11833_v7 = vsub.s32 1, %v4219_v41 }
 0x877   :  { %v4318_v17 = vpop.f32.mrf.mxu0 }
 0x878   :  { %v4326_v18 = vrot.slane %v4318_v17, %v11825_v53  ;;  %v4342_v50 = vrot.slane %v4318_v17, %v11833_v7 }
 0x879   :  { %v4320_v29 = vpop.f32.mrf.mxu0 }
 0x87a   :  { %v4331_v6 = vmul.f32 %v4326_v18, %v11603_v59  ;;  %v4333_v48 = vmul.f32 %v4326_v18, %v11593_v57  ;;  %v4335_v8 = vmul.f32 %v4326_v18, %v11586_v16  ;;  %v4337_v24 = vmul.f32 %v4326_v18, %v11580_v26 }
 0x87b   :  { %v4330_v31 = vrot.slane %v4320_v29, %v11825_v53  ;;  %v4346_v60 = vrot.slane %v4320_v29, %v11833_v7 }
 0x87c   :  { %v4347_v56 = vadd.f32 %v4342_v50, %v4331_v6  ;;  %v4349_v40 = vadd.f32 %v4342_v50, %v4333_v48  ;;  %v4351_v43 = vadd.f32 %v4342_v50, %v4335_v8  ;;  %v4353_v63 = vadd.f32 %v4342_v50, %v4337_v24 }
 0x87d   :  { %v4332_v28 = vmul.f32 %v4330_v31, %v11598_v34  ;;  %v4334_v55 = vmul.f32 %v4330_v31, %v11588_v3  ;;  %v4336_v59 = vmul.f32 %v4330_v31, %v11582_v23  ;;  %v4338_v57 = vmul.f32 %v4330_v31, %v11584_v0 }
 0x87e   :  { %vm4355_vm4 = vcmp.ge.f32.partialorder %v4347_v56, 0.0  ;;  %vm4357_vm5 = vcmp.ge.f32.partialorder %v4349_v40, 0.0  ;;  %vm4359_vm6 = vcmp.ge.f32.partialorder %v4351_v43, 0.0  ;;  %vm4361_vm7 = vcmp.ge.f32.partialorder %v4353_v63, 0.0 }
 0x87f   :  { %v4363_v26 = vmul.f32 0.2, %v4347_v56  ;;  %v4365_v16 = vmul.f32 0.2, %v4349_v40  ;;  %v4367_v52 = vmul.f32 0.2, %v4351_v43  ;;  %v4348_v33 = vadd.f32 %v4346_v60, %v4332_v28 }
 0x880   :  { %v4369_v37 = vmul.f32 0.2, %v4353_v63  ;;  %v4350_v62 = vadd.f32 %v4346_v60, %v4334_v55  ;;  %v4352_v25 = vadd.f32 %v4346_v60, %v4336_v59  ;;  %v4354_v36 = vadd.f32 %v4346_v60, %v4338_v57 }
 0x881   :  { %v4371_v21 = vsel %vm4355_vm4, %v4347_v56, %v4363_v26  ;;  %v4373_v34 = vsel %vm4357_vm5, %v4349_v40, %v4365_v16  ;;  %v4375_v41 = vsel %vm4359_vm6, %v4351_v43, %v4367_v52  ;;  %vm4356_vm8 = vcmp.ge.f32.partialorder %v4348_v33, 0.0 }
 0x882   :  { %v4377_v3 = vsel %vm4361_vm7, %v4353_v63, %v4369_v37  ;;  %vm4358_vm9 = vcmp.ge.f32.partialorder %v4350_v62, 0.0  ;;  %vm4360_vm10 = vcmp.ge.f32.partialorder %v4352_v25, 0.0  ;;  %vm4362_vm11 = vcmp.ge.f32.partialorder %v4354_v36, 0.0 }
 0x883   :  { %v4364_v23 = vmul.f32 0.2, %v4348_v33  ;;  %v4366_v0 = vmul.f32 0.2, %v4350_v62  ;;  %v4368_v4 = vmul.f32 0.2, %v4352_v25 }
 0x884   :  { %v4370_v27 = vmul.f32 0.2, %v4354_v36 }
 0x885   :  { %v4372_v20 = vsel %vm4356_vm8, %v4348_v33, %v4364_v23  ;;  %v4374_v49 = vsel %vm4358_vm9, %v4350_v62, %v4366_v0  ;;  %v4376_v35 = vsel %vm4360_vm10, %v4352_v25, %v4368_v4 }
 0x886   :  { %v4378_v39 = vsel %vm4362_vm11, %v4354_v36, %v4370_v27 }
 0x887   :  { %9719 = dma.done.wait [#allocation5], 16384 }
 0x888   :  { %9720 = vsyncadd [#allocation5], 4294950912  ;;  %v4386_v61 = vpack.c.bf16 %v4378_v39, %v4376_v35  ;;  %v4385_v58 = vpack.c.bf16 %v4377_v3, %v4375_v41  ;;  %v4384_v5 = vpack.c.bf16 %v4374_v49, %v4372_v20  ;;  %4587 = vmatprep.mubr.bf16.mxu1 %v12721_v51  ;;  %v8202_v42 = vcombine.high %v9982_v14, %v9987_v15  ;;  %v12726_v18 = vld [vmem:[#allocation44_spill] sm:$0xff]  ;;  %v12729_v6 = vld [vmem:[#allocation43_spill] sm:$0xff]  ;;  %s9747_s5 = smov 96  }
 0x889   :  { %v8201_v2 = vcombine.low %v9982_v14, %v9987_v15  ;;  %v8200_v38 = vcombine.high %v9972_v12, %v9977_v13  ;;  %v4383_v19 = vpack.c.bf16 %v4373_v34, %v4371_v21  ;;  %v8199_v22 = vcombine.low %v9972_v12, %v9977_v13  ;;  %v9261_v14 = vld [vmem:[%s12453_s9] sm:$0xff]   ;;  %v12730_v48 = vld [vmem:[#allocation42_spill] sm:$0xff]  ;;  %v12736_v59 = vld [vmem:[#allocation67_spill] sm:$0xff] }
 0x88a   :  { %4567 = vmatprep.subr.bf16.mxu1 %v4386_v61  ;;  %5372 = vmatprep.subr.bf16.mxu0 %v8202_v42  ;;  %v8234_v1 = vcombine.high %v10142_v46, %v10147_v47  ;;  %v8198_v17 = vcombine.high %v9962_v10, %v9967_v11  ;;  %v8233_v15 = vcombine.low %v10142_v46, %v10147_v47  ;;  %v12728_v47 = vld [vmem:[#allocation71_spill] sm:$0xff]  ;;  %v9262_v24 = vld [vmem:[%s12453_s9 + $0x8] sm:$0xff]   ;;  %v12734_v40 = vld [vmem:[#allocation40_spill] sm:$0xff] }
 0x88b   :  { %4568 = vmatpush1.bf16.msra.mxu1 %v4385_v58  ;;  %5373 = vmatpush1.bf16.msra.mxu0 %v8201_v2  ;;  %v8197_v12 = vcombine.low %v9962_v10, %v9967_v11  ;;  %v8232_v13 = vcombine.high %v10132_v44, %v10137_v45  ;;  %v8196_v50 = vcombine.high %v12726_v18, %v9957_v9  ;;  %v12727_v11 = vld [vmem:[#allocation72_spill] sm:$0xff]  ;;  %v12732_v31 = vld [vmem:[#allocation69_spill] sm:$0xff]  ;;  %v12737_v26 = vld [vmem:[#allocation39_spill] sm:$0xff] }
 0x88c   :  { %4569 = vmatprep.subr.bf16.mxu1 %v4384_v5  ;;  %5374 = vmatprep.subr.bf16.mxu0 %v8200_v38  ;;  %v8231_v46 = vcombine.low %v10132_v44, %v10137_v45  ;;  %v8195_v10 = vcombine.low %v12726_v18, %v9957_v9  ;;  %v8230_v29 = vcombine.high %v12728_v47, %v12727_v11  ;;  %v12731_v45 = vld [vmem:[#allocation70_spill] sm:$0xff]  ;;  %v12733_v56 = vld [vmem:[#allocation41_spill] sm:$0xff]  ;;  %v12735_v55 = vld [vmem:[#allocation68_spill] sm:$0xff] }
 0x88d   :  { %v8194_v8 = vcombine.high %v12730_v48, %v12729_v6  ;;  %v8229_v44 = vcombine.low %v12728_v47, %v12727_v11  ;;  %v8193_v9 = vcombine.low %v12730_v48, %v12729_v6  ;;  %v8228_v60 = vcombine.high %v12732_v31, %v12731_v45  ;;  %v12738_v16 = vld [vmem:[#allocation38_spill] sm:$0xff]  ;;  %v12740_v36 = vld [vmem:[#allocation65_spill] sm:$0xff]  ;;  %v12742_v41 = vld [vmem:[#allocation36_spill] sm:$0xff] }
 0x88e   :  { %v8192_v43 = vcombine.high %v12734_v40, %v12733_v56  ;;  %v8227_v63 = vcombine.low %v12732_v31, %v12731_v45  ;;  %v8191_v28 = vcombine.low %v12734_v40, %v12733_v56  ;;  %v8226_v57 = vcombine.high %v12736_v59, %v12735_v55  ;;  %v9263_v33 = vld [vmem:[%s12453_s9 + $0x10] sm:$0xff]   ;;  %v12741_v34 = vld [vmem:[#allocation37_spill] sm:$0xff]  ;;  %v12743_v4 = vld [vmem:[#allocation64_spill] sm:$0xff] }
 0x88f   :  { %4570 = vmatpush1.bf16.msra.mxu1 %v4383_v19  ;;  %5375 = vmatpush1.bf16.msra.mxu0 %v8199_v22  ;;  %v8190_v52 = vcombine.high %v12738_v16, %v12737_v26  ;;  %v8225_v37 = vcombine.low %v12736_v59, %v12735_v55  ;;  %v8189_v62 = vcombine.low %v12738_v16, %v12737_v26  ;;  %v12739_v25 = vld [vmem:[#allocation66_spill] sm:$0xff]  ;;  %v12744_v27 = vld [vmem:[#allocation63_spill] sm:$0xff]  ;;  %v12745_v49 = vld [vmem:[#allocation60_spill] sm:$0xff] }
 0x890   :  { %5415 = vmatprep.subr.bf16.mxu1 %v8234_v1  ;;  %5376 = vmatprep.subr.bf16.mxu0 %v8198_v17  ;;  %v8224_v21 = vcombine.high %v12740_v36, %v12739_v25  ;;  %v8188_v3 = vcombine.high %v12742_v41, %v12741_v34  ;;  %v8223_v23 = vcombine.low %v12740_v36, %v12739_v25  ;;  %v12746_v35 = vld [vmem:[#allocation59_spill] sm:$0xff]  ;;  %v12747_v42 = vld [vmem:[#allocation62_spill] sm:$0xff]  ;;  %v12748_v2 = vld [vmem:[#allocation61_spill] sm:$0xff] }
 0x891   :  { %v8187_v0 = vcombine.low %v12742_v41, %v12741_v34  ;;  %v8222_v20 = vcombine.high %v12744_v27, %v12743_v4  ;;  %v8218_v39 = vcombine.high %v12746_v35, %v12745_v49  ;;  %v9264_v61 = vld [vmem:[%s12453_s9 + $0x18] sm:$0xff]   ;;  %v8221_v58 = vcombine.low %v12744_v27, %v12743_v4  ;;  %v12749_v19 = vld [vmem:[#allocation58_spill] sm:$0xff]  ;;  %v12750_v22 = vld [vmem:[#allocation57_spill] sm:$0xff] }
 0x892   :  { %8167 = vmatmul.mubr.msk.bf16.vlgmr.msra.gmra.mxu1 %vm3854_vm1, %v9261_v14  ;;  %v8217_v5 = vcombine.low %v12746_v35, %v12745_v49  ;;  %v8220_v38 = vcombine.high %v12748_v2, %v12747_v42  ;;  %v8216_v1 = vcombine.high %v12750_v22, %v12749_v19  ;;  %v8219_v17 = vcombine.low %v12748_v2, %v12747_v42  ;;  %v12753_v18 = vld [vmem:[#allocation56_spill] sm:$0xff]  ;;  %v12755_v47 = vld [vmem:[#allocation86_spill] sm:$0xff]  ;;  %v12760_v31 = vld [vmem:[#allocation83_spill] sm:$0xff] }
 0x893   :  { %4597 = vmatprep.mubr.bf16.mxu1 %v12721_v51  ;;  %5416 = vmatpush1.bf16.msra.mxu1 %v8233_v15  ;;  %v8215_v14 = vcombine.low %v12750_v22, %v12749_v19  ;;  %v12751_v15 = vld [vmem:[#allocation88_spill] sm:$0xff]  ;;  %v12757_v48 = vld [vmem:[#allocation54_spill] sm:$0xff]  ;;  %v12762_v40 = vld [vmem:[#allocation51_spill] sm:$0xff] }
 0x894   :  { %5377 = vmatpush1.bf16.msra.mxu0 %v8197_v12  ;;  %5417 = vmatprep.subr.bf16.mxu1 %v8232_v13  ;;  %v12752_v12 = vld [vmem:[#allocation87_spill] sm:$0xff]  ;;  %v12759_v45 = vld [vmem:[#allocation84_spill] sm:$0xff]  ;;  %v12763_v55 = vld [vmem:[#allocation82_spill] sm:$0xff] }
 0x895   :  { %5378 = vmatprep.subr.bf16.mxu0 %v8196_v50  ;;  %v8250_v13 = vcombine.high %v12752_v12, %v12751_v15  ;;  %v12754_v50 = vld [vmem:[#allocation55_spill] sm:$0xff]  ;;  %v12761_v56 = vld [vmem:[#allocation52_spill] sm:$0xff]  ;;  %v12764_v59 = vld [vmem:[#allocation81_spill] sm:$0xff] }
 0x896   :  { %v8213_v11 = vcombine.low %v12754_v50, %v12753_v18  ;;  %v12765_v26 = vld [vmem:[#allocation50_spill] sm:$0xff]  ;;  %v12766_v16 = vld [vmem:[#allocation49_spill] sm:$0xff]  ;;  %v12768_v25 = vld [vmem:[#allocation47_spill] sm:$0xff] }
 0x897   :  { %5418 = vmatpush1.bf16.msra.mxu1 %v8231_v46  ;;  %v8214_v46 = vcombine.high %v12754_v50, %v12753_v18  ;;  %v12770_v34 = vld [vmem:[#allocation79_spill] sm:$0xff]  ;;  %v12772_v4 = vld [vmem:[#allocation45_spill] sm:$0xff]  ;;  %v12777_v2 = vld [vmem:[#allocation104_spill] sm:$0xff] }
 0x898   :  { %5379 = vmatpush1.bf16.msra.mxu0 %v8195_v10  ;;  %5419 = vmatprep.subr.bf16.mxu1 %v8230_v29  ;;  %v8249_v10 = vcombine.low %v12752_v12, %v12751_v15  ;;  %v12756_v29 = vld [vmem:[#allocation85_spill] sm:$0xff]  ;;  %v12781_v12 = vld [vmem:[#allocation136_spill] sm:$0xff] }
 0x899   :  { %5380 = vmatprep.subr.bf16.mxu0 %v8194_v8  ;;  %v8248_v6 = vcombine.high %v12756_v29, %v12755_v47  ;;  %v12758_v8 = vld [vmem:[#allocation53_spill] sm:$0xff] }
 0x89a   :  { %8168 = vmatmul.mubr.msk.bf16.gmra.mxu1 %vm3854_vm1, %v9262_v24  ;;  %v8212_v24 = vcombine.high %v12758_v8, %v12757_v48  ;;  %v12774_v49 = vld [vmem:[#allocation77_spill] sm:$0xff] }
 0x89b   :  { %4607 = vmatprep.mubr.bf16.mxu1 %v12721_v51  ;;  %5420 = vmatpush1.bf16.msra.mxu1 %v8229_v44  ;;  %v8247_v44 = vcombine.low %v12756_v29, %v12755_v47 }
 0x89c   :  { %5381 = vmatpush1.bf16.msra.mxu0 %v8193_v9  ;;  %5421 = vmatprep.subr.bf16.mxu1 %v8228_v60  ;;  %v8211_v9 = vcombine.low %v12758_v8, %v12757_v48  ;;  %v8246_v60 = vcombine.high %v12760_v31, %v12759_v45  ;;  %v12783_v8 = vld [vmem:[#allocation102_spill] sm:$0xff] }
 0x89d   :  { %5382 = vmatprep.subr.bf16.mxu0 %v8192_v43  ;;  %v8210_v43 = vcombine.high %v12762_v40, %v12761_v56 }
 0x89f   :  { %5422 = vmatpush1.bf16.msra.mxu1 %v8227_v63  ;;  %v8245_v63 = vcombine.low %v12760_v31, %v12759_v45 }
 0x8a0   :  { %5383 = vmatpush1.bf16.msra.mxu0 %v8191_v28  ;;  %5423 = vmatprep.subr.bf16.mxu1 %v8226_v57  ;;  %v8209_v28 = vcombine.low %v12762_v40, %v12761_v56  ;;  %v8244_v57 = vcombine.high %v12764_v59, %v12763_v55  ;;  %v12786_v56 = vld [vmem:[#allocation99_spill] sm:$0xff] }
 0x8a1   :  { %5384 = vmatprep.subr.bf16.mxu0 %v8190_v52  ;;  %v8208_v52 = vcombine.high %v12766_v16, %v12765_v26 }
 0x8a2   :  { %8169 = vmatmul.mubr.msk.bf16.gmra.mxu1 %vm3854_vm1, %v9263_v33  ;;  %v8243_v33 = vcombine.low %v12764_v59, %v12763_v55 }
 0x8a3   :  { %4617 = vmatprep.mubr.bf16.mxu1 %v12721_v51  ;;  %5424 = vmatpush1.bf16.msra.mxu1 %v8225_v37  ;;  %v8207_v37 = vcombine.low %v12766_v16, %v12765_v26  ;;  %v12788_v26 = vld [vmem:[#allocation97_spill] sm:$0xff] }
 0x8a4   :  { %5385 = vmatpush1.bf16.msra.mxu0 %v8189_v62  ;;  %5425 = vmatprep.subr.bf16.mxu1 %v8224_v21  ;;  %v12767_v62 = vld [vmem:[#allocation48_spill] sm:$0xff] }
 0x8a5   :  { %5386 = vmatprep.subr.bf16.mxu0 %v8188_v3  ;;  %v8206_v36 = vcombine.high %v12768_v25, %v12767_v62  ;;  %v12769_v21 = vld [vmem:[#allocation80_spill] sm:$0xff]  ;;  %v8205_v3 = vcombine.low %v12768_v25, %v12767_v62 }
 0x8a6   :  { %v8242_v41 = vcombine.high %v12770_v34, %v12769_v21 }
 0x8a7   :  { %5426 = vmatpush1.bf16.msra.mxu1 %v8223_v23  ;;  %v8241_v23 = vcombine.low %v12770_v34, %v12769_v21  ;;  %v12791_v34 = vld [vmem:[#allocation96_spill] sm:$0xff] }
 0x8a8   :  { %5387 = vmatpush1.bf16.msra.mxu0 %v8187_v0  ;;  %5427 = vmatprep.subr.bf16.mxu1 %v8222_v20  ;;  %v12771_v0 = vld [vmem:[#allocation46_spill] sm:$0xff] }
 0x8a9   :  { %5388 = vmatprep.subr.bf16.mxu0 %v8218_v39  ;;  %v8204_v27 = vcombine.high %v12772_v4, %v12771_v0  ;;  %v12773_v20 = vld [vmem:[#allocation78_spill] sm:$0xff]  ;;  %v8203_v39 = vcombine.low %v12772_v4, %v12771_v0  ;;  %v12794_v0 = vld [vmem:[#allocation131_spill] sm:$0xff] }
 0x8aa   :  { %8170 = vmatmul.mubr.msk.bf16.gmra.mxu1 %vm3854_vm1, %v9264_v61  ;;  %v8240_v35 = vcombine.high %v12774_v49, %v12773_v20  ;;  %v8239_v61 = vcombine.low %v12774_v49, %v12773_v20 }
 0x8ab   :  { %5428 = vmatpush1.bf16.msra.mxu1 %v8221_v58  ;;  %v12775_v58 = vld [vmem:[#allocation76_spill] sm:$0xff] }
 0x8ac   :  { %5389 = vmatpush2.bf16.msra.mxu0 %v8217_v5  ;;  %5429 = vmatprep.subr.bf16.mxu1 %v8220_v38  ;;  %v12776_v5 = vld [vmem:[#allocation75_spill] sm:$0xff] }
 0x8ad   :  { %5390 = vmatprep.subr.bf16.mxu0 %v8216_v1  ;;  %v8238_v42 = vcombine.high %v12776_v5, %v12775_v58  ;;  %v12778_v38 = vld [vmem:[#allocation103_spill] sm:$0xff]  ;;  %v8237_v22 = vcombine.low %v12776_v5, %v12775_v58  ;;  %v12779_v1 = vld [vmem:[#allocation74_spill] sm:$0xff]  ;;  %v12796_v58 = vld [vmem:[#allocation93_spill] sm:$0xff] }
 0x8ae   :  { %v8266_v19 = vcombine.high %v12778_v38, %v12777_v2  ;;  %v8265_v29 = vcombine.low %v12778_v38, %v12777_v2  ;;  %v12798_v2 = vld [vmem:[#allocation129_spill] sm:$0xff] }
 0x8af   :  { %5430 = vmatpush1.bf16.msra.mxu1 %v8219_v17  ;;  %v12780_v17 = vld [vmem:[#allocation73_spill] sm:$0xff] }
 0x8b0   :  { %5391 = vmatpush2.bf16.msra.mxu0 %v8215_v14  ;;  %5431 = vmatprep.subr.bf16.mxu1 %v8250_v13  ;;  %v8236_v14 = vcombine.high %v12780_v17, %v12779_v1  ;;  %v8235_v15 = vcombine.low %v12780_v17, %v12779_v1  ;;  %v12782_v13 = vld [vmem:[#allocation135_spill] sm:$0xff] }
 0x8b1   :  { %5392 = vmatprep.subr.bf16.mxu0 %v8214_v46  ;;  %v8298_v18 = vcombine.high %v12782_v13, %v12781_v12  ;;  %v8297_v55 = vcombine.low %v12782_v13, %v12781_v12  ;;  %v12801_v13 = vld [vmem:[#allocation128_spill] sm:$0xff] }
 0x8b3   :  { %5432 = vmatpush2.bf16.msra.mxu1 %v8249_v10 }
 0x8b4   :  { %5393 = vmatpush2.bf16.msra.mxu0 %v8213_v11  ;;  %5433 = vmatprep.subr.bf16.mxu1 %v8248_v6 }
 0x8b5   :  { %5394 = vmatprep.subr.bf16.mxu0 %v8212_v24  ;;  %v12784_v24 = vld [vmem:[#allocation101_spill] sm:$0xff] }
 0x8b6   :  { %v8263_v45 = vcombine.low %v12784_v24, %v12783_v8 }
 0x8b7   :  { %5434 = vmatpush2.bf16.msra.mxu1 %v8247_v44  ;;  %v8264_v44 = vcombine.high %v12784_v24, %v12783_v8  ;;  %v12805_v24 = vld [vmem:[#allocation126_spill] sm:$0xff] }
 0x8b8   :  { %5395 = vmatpush2.bf16.msra.mxu0 %v8211_v9  ;;  %5435 = vmatprep.subr.bf16.mxu1 %v8246_v60  ;;  %v12785_v60 = vld [vmem:[#allocation100_spill] sm:$0xff] }
 0x8b9   :  { %5396 = vmatprep.subr.bf16.mxu0 %v8210_v43  ;;  %v8262_v40 = vcombine.high %v12786_v56, %v12785_v60 }
 0x8bb   :  { %5436 = vmatpush2.bf16.msra.mxu1 %v8245_v63 }
 0x8bc   :  { %5397 = vmatpush2.bf16.msra.mxu0 %v8209_v28  ;;  %5437 = vmatprep.subr.bf16.mxu1 %v8244_v57  ;;  %v8261_v28 = vcombine.low %v12786_v56, %v12785_v60  ;;  %v12787_v57 = vld [vmem:[#allocation98_spill] sm:$0xff]  ;;  %v12807_v60 = vld [vmem:[#allocation120_spill] sm:$0xff]  ;;  %v12808_v56 = vld [vmem:[#allocation119_spill] sm:$0xff] }
 0x8bd   :  { %5398 = vmatprep.subr.bf16.mxu0 %v8208_v52  ;;  %v8260_v16 = vcombine.high %v12788_v26, %v12787_v57  ;;  %v12789_v52 = vld [vmem:[#allocation134_spill] sm:$0xff] }
 0x8bf   :  { %5438 = vmatpush2.bf16.msra.mxu1 %v8243_v33  ;;  %v12790_v33 = vld [vmem:[#allocation133_spill] sm:$0xff] }
 0x8c0   :  { %5399 = vmatpush2.bf16.msra.mxu0 %v8207_v37  ;;  %5439 = vmatprep.subr.bf16.mxu1 %v8242_v41  ;;  %v8296_v37 = vcombine.high %v12790_v33, %v12789_v52  ;;  %v8295_v21 = vcombine.low %v12790_v33, %v12789_v52  ;;  %v12792_v41 = vld [vmem:[#allocation95_spill] sm:$0xff]  ;;  %v12813_v52 = vld [vmem:[#allocation122_spill] sm:$0xff]  ;;  %v12814_v33 = vld [vmem:[#allocation121_spill] sm:$0xff] }
 0x8c1   :  { %5400 = vmatprep.subr.bf16.mxu0 %v8206_v36  ;;  %v8259_v36 = vcombine.low %v12788_v26, %v12787_v57  ;;  %v8257_v49 = vcombine.low %v12792_v41, %v12791_v34  ;;  %v12811_v57 = vld [vmem:[#allocation118_spill] sm:$0xff]  ;;  %v12812_v26 = vld [vmem:[#allocation117_spill] sm:$0xff] }
 0x8c3   :  { %5440 = vmatpush2.bf16.msra.mxu1 %v8241_v23  ;;  %v12793_v23 = vld [vmem:[#allocation132_spill] sm:$0xff] }
 0x8c4   :  { %5401 = vmatpush2.bf16.msra.mxu0 %v8205_v3  ;;  %5441 = vmatprep.subr.bf16.mxu1 %v8240_v35  ;;  %v8258_v3 = vcombine.high %v12792_v41, %v12791_v34  ;;  %v8294_v4 = vcombine.high %v12794_v0, %v12793_v23  ;;  %v8293_v35 = vcombine.low %v12794_v0, %v12793_v23  ;;  %v12816_v34 = vld [vmem:[#allocation115_spill] sm:$0xff] }
 0x8c5   :  { %5402 = vmatprep.subr.bf16.mxu0 %v8204_v27  ;;  %v12818_v23 = vld [vmem:[#allocation151_spill] sm:$0xff] }
 0x8c7   :  { %5442 = vmatpush2.bf16.msra.mxu1 %v8239_v61  ;;  %v12795_v61 = vld [vmem:[#allocation94_spill] sm:$0xff] }
 0x8c8   :  { %5403 = vmatpush2.bf16.msra.mxu0 %v8203_v39  ;;  %5443 = vmatprep.subr.bf16.mxu1 %v8238_v42  ;;  %v8256_v5 = vcombine.high %v12796_v58, %v12795_v61  ;;  %v12797_v42 = vld [vmem:[#allocation130_spill] sm:$0xff]  ;;  %v8255_v1 = vcombine.low %v12796_v58, %v12795_v61  ;;  %v12822_v58 = vld [vmem:[#allocation149_spill] sm:$0xff] }
 0x8c9   :  { %5458 = vmatprep.subr.bf16.mxu0 %v8266_v19  ;;  %v8292_v38 = vcombine.high %v12798_v2, %v12797_v42  ;;  %v8291_v17 = vcombine.low %v12798_v2, %v12797_v42  ;;  %v12821_v61 = vld [vmem:[#allocation150_spill] sm:$0xff] }
 0x8ca   :  { %v8311_v2 = vcombine.low %v12822_v58, %v12821_v61 }
 0x8cb   :  { %5444 = vmatpush2.bf16.msra.mxu1 %v8237_v22 }
 0x8cc   :  { %5445 = vmatprep.subr.bf16.mxu1 %v8236_v14  ;;  %v12799_v14 = vld [vmem:[#allocation92_spill] sm:$0xff] }
 0x8cf   :  { %5446 = vmatpush2.bf16.msra.mxu1 %v8235_v15  ;;  %v12800_v15 = vld [vmem:[#allocation91_spill] sm:$0xff] }
 0x8d0   :  { %5501 = vmatprep.subr.bf16.mxu1 %v8298_v18  ;;  %v8254_v12 = vcombine.high %v12800_v15, %v12799_v14  ;;  %v12802_v18 = vld [vmem:[#allocation127_spill] sm:$0xff] }
 0x952   :  { %v4589_v50 = vpop.f32.mrf.mxu1 }
 0x954   :  { %v4591_v46 = vpop.f32.mrf.mxu1 }
 0x956   :  { %v4593_v10 = vpop.f32.mrf.mxu1 }
 0x957   :  { %v8576_v6 = vpack.c.bf16 %v4593_v10, %v4589_v50  ;;  %v8290_v50 = vcombine.high %v12802_v18, %v12801_v13 }
 0x958   :  { %v4595_v11 = vpop.f32.mrf.mxu1 }
 0x959   :  { %v8577_v47 = vpack.c.bf16 %v4595_v11, %v4591_v46  ;;  %v8253_v11 = vcombine.low %v12800_v15, %v12799_v14  ;;  %v12826_v14 = vld [vmem:[#allocation147_spill] sm:$0xff] }
 0x95a   :  { %v4599_v48 = vpop.f32.mrf.mxu1 }
 0x95b   :  { %5404 = vmatprep.mubr.bf16.mxu0 %v8577_v47  ;;  %v8289_v47 = vcombine.low %v12802_v18, %v12801_v13  ;;  %v12827_v18 = vld [vmem:[#allocation110_spill] sm:$0xff] }
 0x95c   :  { %v4601_v9 = vpop.f32.mrf.mxu1  ;;  %5405 = vmatmul.mubr.bf16.vlgmr.msra.gmra.mxu0 %v8576_v6  ;;  %v12803_v6 = vld [vmem:[#allocation90_spill] sm:$0xff] }
 0x95d   :  { %5459 = vmatpush1.bf16.msra.mxu0 %v8265_v29 }
 0x95e   :  { %v4603_v31 = vpop.f32.mrf.mxu1  ;;  %5460 = vmatprep.subr.bf16.mxu0 %v8264_v44  ;;  %v12806_v44 = vld [vmem:[#allocation125_spill] sm:$0xff] }
 0x95f   :  { %v8578_v59 = vpack.c.bf16 %v4603_v31, %v4599_v48  ;;  %v12804_v48 = vld [vmem:[#allocation89_spill] sm:$0xff]  ;;  %v8287_v31 = vcombine.low %v12806_v44, %v12805_v24 }
 0x960   :  { %v4605_v43 = vpop.f32.mrf.mxu1  ;;  %v8252_v8 = vcombine.high %v12804_v48, %v12803_v6 }
 0x961   :  { %v8579_v63 = vpack.c.bf16 %v4605_v43, %v4601_v9  ;;  %5461 = vmatpush1.bf16.msra.mxu0 %v8263_v45  ;;  %v8288_v9 = vcombine.high %v12806_v44, %v12805_v24  ;;  %v8251_v45 = vcombine.low %v12804_v48, %v12803_v6  ;;  %v12809_v43 = vld [vmem:[#allocation124_spill] sm:$0xff]  ;;  %v12832_v24 = vld [vmem:[#allocation107_spill] sm:$0xff] }
 0x962   :  { %5462 = vmatprep.subr.bf16.mxu0 %v8262_v40  ;;  %v12015_v62 = vpop.f32.mrf.mxu1  ;;  %v8282_v40 = vcombine.high %v12808_v56, %v12807_v60 }
 0x963   :  { %5447 = vmatprep.mubr.bf16.mxu1 %v8579_v63  ;;  %v12810_v63 = vld [vmem:[#allocation123_spill] sm:$0xff] }
 0x964   :  { %5448 = vmatmul.mubr.bf16.vlgmr.msra.gmra.mxu1 %v8578_v59  ;;  %v4611_v25 = vpop.f32.mrf.mxu1  ;;  %v8285_v59 = vcombine.low %v12810_v63, %v12809_v43 }
 0x965   :  { %5463 = vmatpush1.bf16.msra.mxu0 %v8261_v28  ;;  %5502 = vmatpush1.bf16.msra.mxu1 %v8297_v55  ;;  %v8286_v28 = vcombine.high %v12810_v63, %v12809_v43  ;;  %v8281_v55 = vcombine.low %v12808_v56, %v12807_v60  ;;  %v12836_v43 = vld [vmem:[#allocation105_spill] sm:$0xff] }
 0x966   :  { %5464 = vmatprep.subr.bf16.mxu0 %v8260_v16  ;;  %5503 = vmatprep.subr.bf16.mxu1 %v8296_v37  ;;  %v12025_v27 = vpop.f32.mrf.mxu1  ;;  %v8280_v16 = vcombine.high %v12812_v26, %v12811_v57  ;;  %v8284_v37 = vcombine.high %v12814_v33, %v12813_v52 }
 0x968   :  { %v4615_v20 = vpop.f32.mrf.mxu1 }
 0x969   :  { %5465 = vmatpush1.bf16.msra.mxu0 %v8259_v36  ;;  %5504 = vmatpush1.bf16.msra.mxu1 %v8295_v21  ;;  %v8581_v39 = vpack.c.bf16 %v4615_v20, %v4611_v25  ;;  %v8279_v25 = vcombine.low %v12812_v26, %v12811_v57  ;;  %v8283_v36 = vcombine.low %v12814_v33, %v12813_v52  ;;  %v12815_v21 = vld [vmem:[#allocation116_spill] sm:$0xff]  ;;  %v12840_v52 = vld [vmem:[#allocation139_spill] sm:$0xff] }
 0x96a   :  { %5466 = vmatprep.subr.bf16.mxu0 %v8258_v3  ;;  %5505 = vmatprep.subr.bf16.mxu1 %v8294_v4  ;;  %v12035_v19 = vpop.f32.mrf.mxu1  ;;  %v8278_v41 = vcombine.high %v12816_v34, %v12815_v21  ;;  %v12817_v3 = vld [vmem:[#allocation152_spill] sm:$0xff]  ;;  %v8277_v4 = vcombine.low %v12816_v34, %v12815_v21  ;;  %v12842_v21 = vld [vmem:[#allocation137_spill] sm:$0xff] }
 0x96b   :  { %5490 = vmatprep.mubr.bf16.mxu0 %v8581_v39  ;;  %v8314_v0 = vcombine.high %v12818_v23, %v12817_v3  ;;  %v8313_v20 = vcombine.low %v12818_v23, %v12817_v3  ;;  %v5722_v23 = vld [vmem:[%s12457_s13 + $0xf0] sm:$0xff] }
 0x96c   :  { %v4621_v22 = vpop.f32.mrf.mxu1 }
 0x96d   :  { %5467 = vmatpush1.bf16.msra.mxu0 %v8257_v49  ;;  %5506 = vmatpush1.bf16.msra.mxu1 %v8293_v35  ;;  %v12819_v49 = vld [vmem:[#allocation114_spill] sm:$0xff]  ;;  %v12820_v35 = vld [vmem:[#allocation113_spill] sm:$0xff] }
 0x96e   :  { %5468 = vmatprep.subr.bf16.mxu0 %v8256_v5  ;;  %5507 = vmatprep.subr.bf16.mxu1 %v8292_v38  ;;  %v12045_v46 = vpop.f32.mrf.mxu1  ;;  %v8276_v39 = vcombine.high %v12820_v35, %v12819_v49  ;;  %v8312_v5 = vcombine.high %v12822_v58, %v12821_v61  ;;  %v8275_v42 = vcombine.low %v12820_v35, %v12819_v49  ;;  %v12823_v38 = vld [vmem:[#allocation112_spill] sm:$0xff]  ;;  %v5702_v61 = vld [vmem:[%s12457_s13 + $0x50] sm:$0xff]  ;;  %v5717_v58 = vld [vmem:[%s12457_s13 + $0xc8] sm:$0xff] }
 0x96f   :  { %v8582_v3 = vpack.c.bf16 %v12045_v46, %v12035_v19  ;;  %v5721_v19 = vld [vmem:[%s12457_s13 + $0xe8] sm:$0xff]  ;;  %v5719_v49 = vld [vmem:[%s12457_s13 + $0xd8] sm:$0xff] }
 0x970   :  { %v4625_v10 = vpop.f32.mrf.mxu1  ;;  %v5705_v46 = vld [vmem:[%s12457_s13 + $0x68] sm:$0xff]  ;;  %v5703_v35 = vld [vmem:[%s12457_s13 + $0x58] sm:$0xff] }
 0x971   :  { %5469 = vmatpush1.bf16.msra.mxu0 %v8255_v1  ;;  %5508 = vmatpush1.bf16.msra.mxu1 %v8291_v17  ;;  %v8583_v29 = vpack.c.bf16 %v4625_v10, %v4621_v22  ;;  %v12824_v22 = vld [vmem:[#allocation111_spill] sm:$0xff]  ;;  %v12825_v17 = vld [vmem:[#allocation148_spill] sm:$0xff] }
 0x972   :  { %5470 = vmatprep.subr.bf16.mxu0 %v8254_v12  ;;  %5509 = vmatprep.subr.bf16.mxu1 %v8290_v50  ;;  %v8274_v1 = vcombine.high %v12824_v22, %v12823_v38  ;;  %v8310_v15 = vcombine.high %v12826_v14, %v12825_v17  ;;  %v8273_v12 = vcombine.low %v12824_v22, %v12823_v38  ;;  %v12828_v50 = vld [vmem:[#allocation109_spill] sm:$0xff]  ;;  %v5715_v38 = vld [vmem:[%s12457_s13 + $0xb8] sm:$0xff] }
 0x973   :  { %5533 = vmatprep.mubr.bf16.mxu1 %v8583_v29  ;;  %v8309_v13 = vcombine.low %v12826_v14, %v12825_v17  ;;  %v8272_v10 = vcombine.high %v12828_v50, %v12827_v18  ;;  %v8271_v6 = vcombine.low %v12828_v50, %v12827_v18  ;;  %v5699_v22 = vld [vmem:[%s12457_s13 + $0x38] sm:$0xff]  ;;  %v5698_v17 = vld [vmem:[%s12457_s13 + $0x30] sm:$0xff]  ;;  %v5713_v14 = vld [vmem:[%s12457_s13 + $0xa8] sm:$0xff] }
 0x974   :  { %v5711_v18 = vld [vmem:[%s12457_s13 + $0x98] sm:$0xff] }
 0x975   :  { %5471 = vmatpush1.bf16.msra.mxu0 %v8253_v11  ;;  %5510 = vmatpush1.bf16.msra.mxu1 %v8289_v47  ;;  %v12829_v11 = vld [vmem:[#allocation146_spill] sm:$0xff]  ;;  %v12830_v47 = vld [vmem:[#allocation145_spill] sm:$0xff]  ;;  %v5695_v50 = vld [vmem:[%s12457_s13 + $0x18] sm:$0xff] }
 0x976   :  { %5472 = vmatprep.subr.bf16.mxu0 %v8252_v8  ;;  %5511 = vmatprep.subr.bf16.mxu1 %v8288_v9  ;;  %v8308_v29 = vcombine.high %v12830_v47, %v12829_v11  ;;  %v8307_v48 = vcombine.low %v12830_v47, %v12829_v11  ;;  %v12831_v8 = vld [vmem:[#allocation108_spill] sm:$0xff]  ;;  %v5694_v11 = vld [vmem:[%s12457_s13 + $0x10] sm:$0xff] }
 0x977   :  { %v8270_v44 = vcombine.high %v12832_v24, %v12831_v8  ;;  %v12833_v9 = vld [vmem:[#allocation144_spill] sm:$0xff]  ;;  %v8269_v60 = vcombine.low %v12832_v24, %v12831_v8 }
 0x979   :  { %5473 = vmatpush1.bf16.msra.mxu0 %v8251_v45  ;;  %5512 = vmatpush1.bf16.msra.mxu1 %v8287_v31  ;;  %v12834_v45 = vld [vmem:[#allocation143_spill] sm:$0xff] }
 0x97a   :  { %5474 = vmatprep.subr.bf16.mxu0 %v8282_v40  ;;  %5513 = vmatprep.subr.bf16.mxu1 %v8286_v28  ;;  %v8306_v31 = vcombine.high %v12834_v45, %v12833_v9  ;;  %v8305_v56 = vcombine.low %v12834_v45, %v12833_v9  ;;  %v12835_v40 = vld [vmem:[#allocation106_spill] sm:$0xff] }
 0x97b   :  { %v8268_v63 = vcombine.high %v12836_v43, %v12835_v40  ;;  %v12837_v28 = vld [vmem:[#allocation142_spill] sm:$0xff]  ;;  %v8267_v57 = vcombine.low %v12836_v43, %v12835_v40 }
 0x97d   :  { %5475 = vmatpush2.bf16.msra.mxu0 %v8281_v55  ;;  %5514 = vmatpush1.bf16.msra.mxu1 %v8285_v59  ;;  %v12838_v55 = vld [vmem:[#allocation141_spill] sm:$0xff] }
 0x97e   :  { %5476 = vmatprep.subr.bf16.mxu0 %v8280_v16  ;;  %5515 = vmatprep.subr.bf16.mxu1 %v8284_v37  ;;  %v8304_v59 = vcombine.high %v12838_v55, %v12837_v28  ;;  %v8303_v26 = vcombine.low %v12838_v55, %v12837_v28  ;;  %v12839_v16 = vld [vmem:[#allocation140_spill] sm:$0xff] }
 0x97f   :  { %v8302_v33 = vcombine.high %v12840_v52, %v12839_v16  ;;  %v8301_v37 = vcombine.low %v12840_v52, %v12839_v16 }
 0x981   :  { %5477 = vmatpush2.bf16.msra.mxu0 %v8279_v25  ;;  %5516 = vmatpush1.bf16.msra.mxu1 %v8283_v36  ;;  %v8580_v25 = vpack.c.bf16 %v12025_v27, %v12015_v62  ;;  %v12841_v36 = vld [vmem:[#allocation138_spill] sm:$0xff]  ;;  %v5723_v62 = vld [vmem:[%s12457_s13 + $0xf8] sm:$0xff] }
 0x982   :  { %5478 = vmatprep.subr.bf16.mxu0 %v8278_v41  ;;  %5517 = vmatprep.subr.bf16.mxu1 %v8314_v0  ;;  %v8300_v34 = vcombine.high %v12842_v21, %v12841_v36  ;;  %v8299_v41 = vcombine.low %v12842_v21, %v12841_v36  ;;  %v5707_v27 = vld [vmem:[%s12457_s13 + $0x78] sm:$0xff]  ;;  %v5706_v0 = vld [vmem:[%s12457_s13 + $0x70] sm:$0xff] }
 0x985   :  { %5479 = vmatpush2.bf16.msra.mxu0 %v8277_v4  ;;  %5518 = vmatpush2.bf16.msra.mxu1 %v8313_v20  ;;  %v5720_v4 = vld [vmem:[%s12457_s13 + $0xe0] sm:$0xff] }
 0x986   :  { %5480 = vmatprep.subr.bf16.mxu0 %v8276_v39  ;;  %5519 = vmatprep.subr.bf16.mxu1 %v8312_v5  ;;  %v5704_v20 = vld [vmem:[%s12457_s13 + $0x60] sm:$0xff]  ;;  %v5718_v39 = vld [vmem:[%s12457_s13 + $0xd0] sm:$0xff]  ;;  %v5701_v5 = vld [vmem:[%s12457_s13 + $0x48] sm:$0xff] }
 0x989   :  { %5481 = vmatpush2.bf16.msra.mxu0 %v8275_v42  ;;  %5520 = vmatpush2.bf16.msra.mxu1 %v8311_v2  ;;  %v5716_v42 = vld [vmem:[%s12457_s13 + $0xc0] sm:$0xff] }
 0x98a   :  { %5482 = vmatprep.subr.bf16.mxu0 %v8274_v1  ;;  %5521 = vmatprep.subr.bf16.mxu1 %v8310_v15  ;;  %v5700_v2 = vld [vmem:[%s12457_s13 + $0x40] sm:$0xff]  ;;  %v5714_v1 = vld [vmem:[%s12457_s13 + $0xb0] sm:$0xff]  ;;  %v5697_v15 = vld [vmem:[%s12457_s13 + $0x28] sm:$0xff] }
 0x98d   :  { %5483 = vmatpush2.bf16.msra.mxu0 %v8273_v12  ;;  %5522 = vmatpush2.bf16.msra.mxu1 %v8309_v13  ;;  %v5712_v12 = vld [vmem:[%s12457_s13 + $0xa0] sm:$0xff] }
 0x98e   :  { %5484 = vmatprep.subr.bf16.mxu0 %v8272_v10  ;;  %5523 = vmatprep.subr.bf16.mxu1 %v8308_v29  ;;  %v5696_v13 = vld [vmem:[%s12457_s13 + $0x20] sm:$0xff]  ;;  %v5710_v10 = vld [vmem:[%s12457_s13 + $0x90] sm:$0xff] }
 0x991   :  { %5485 = vmatpush2.bf16.msra.mxu0 %v8271_v6  ;;  %5524 = vmatpush2.bf16.msra.mxu1 %v8307_v48 }
 0x992   :  { %5486 = vmatprep.subr.bf16.mxu0 %v8270_v44  ;;  %5525 = vmatprep.subr.bf16.mxu1 %v8306_v31 }
 0x995   :  { %5487 = vmatpush2.bf16.msra.mxu0 %v8269_v60  ;;  %5526 = vmatpush2.bf16.msra.mxu1 %v8305_v56 }
 0x996   :  { %5488 = vmatprep.subr.bf16.mxu0 %v8268_v63  ;;  %5527 = vmatprep.subr.bf16.mxu1 %v8304_v59 }
 0x999   :  { %5489 = vmatpush2.bf16.msra.mxu0 %v8267_v57  ;;  %5528 = vmatpush2.bf16.msra.mxu1 %v8303_v26 }
 0x99a   :  { %5529 = vmatprep.subr.bf16.mxu1 %v8302_v33 }
 0x99c   :  { %5491 = vmatmul.mubr.bf16.vlgmr.msra.gmra.mxu0 %v8580_v25 }
 0x99d   :  { %5530 = vmatpush2.bf16.msra.mxu1 %v8301_v37  ;;  %5614 = vmatprep.mubr.f32.mxu0 %v9741_v32 }
 0x99e   :  { %5531 = vmatprep.subr.bf16.mxu1 %v8300_v34 }
 0x9a1   :  { %5532 = vmatpush2.bf16.msra.mxu1 %v8299_v41 }
 0x9a2   :  { %8662 = vmatprep.subr.mxu1 %v5723_v62 }
 0x9a4   :  { %5534 = vmatmul.mubr.bf16.vlgmr.msra.gmra.mxu1 %v8582_v3 }
 0x9a5   :  { %8663 = vmatpush3.msra.mxu1 %v5707_v27 }
 0x9a6   :  { %8664 = vmatprep.subr.mxu1 %v5722_v23  ;;  %v5755_v23 = vld [vmem:[%s12457_s13 + $0x1f8] sm:$0xff] }
 0x9a7   :  { %8665 = vmatpush3.msra.mxu1 %v5706_v0  ;;  %v5739_v0 = vld [vmem:[%s12457_s13 + $0x178] sm:$0xff] }
 0x9a8   :  { %8666 = vmatprep.subr.mxu1 %v5721_v19  ;;  %v5754_v19 = vld [vmem:[%s12457_s13 + $0x1f0] sm:$0xff] }
 0x9a9   :  { %8667 = vmatpush3.msra.mxu1 %v5705_v46  ;;  %v5738_v46 = vld [vmem:[%s12457_s13 + $0x170] sm:$0xff] }
 0x9aa   :  { %8668 = vmatprep.subr.mxu1 %v5720_v4  ;;  %v5753_v4 = vld [vmem:[%s12457_s13 + $0x1e8] sm:$0xff] }
 0x9ab   :  { %8669 = vmatpush3.msra.mxu1 %v5704_v20  ;;  %v5737_v20 = vld [vmem:[%s12457_s13 + $0x168] sm:$0xff] }
 0x9ac   :  { %8670 = vmatprep.subr.mxu1 %v5719_v49  ;;  %v5752_v49 = vld [vmem:[%s12457_s13 + $0x1e0] sm:$0xff] }
 0x9ad   :  { %8671 = vmatpush3.msra.mxu1 %v5703_v35  ;;  %v5736_v35 = vld [vmem:[%s12457_s13 + $0x160] sm:$0xff] }
 0x9ae   :  { %8672 = vmatprep.subr.mxu1 %v5718_v39  ;;  %v5751_v39 = vld [vmem:[%s12457_s13 + $0x1d8] sm:$0xff] }
 0x9af   :  { %8673 = vmatpush3.msra.mxu1 %v5702_v61  ;;  %v5735_v61 = vld [vmem:[%s12457_s13 + $0x158] sm:$0xff] }
 0x9b0   :  { %8674 = vmatprep.subr.mxu1 %v5717_v58  ;;  %v5750_v58 = vld [vmem:[%s12457_s13 + $0x1d0] sm:$0xff] }
 0x9b1   :  { %8675 = vmatpush3.msra.mxu1 %v5701_v5  ;;  %v5734_v5 = vld [vmem:[%s12457_s13 + $0x150] sm:$0xff] }
 0x9b2   :  { %8676 = vmatprep.subr.mxu1 %v5716_v42  ;;  %v5749_v42 = vld [vmem:[%s12457_s13 + $0x1c8] sm:$0xff] }
 0x9b3   :  { %8677 = vmatpush3.msra.mxu1 %v5700_v2  ;;  %v5733_v2 = vld [vmem:[%s12457_s13 + $0x148] sm:$0xff] }
 0x9b4   :  { %8678 = vmatprep.subr.mxu1 %v5715_v38  ;;  %v5748_v38 = vld [vmem:[%s12457_s13 + $0x1c0] sm:$0xff] }
 0x9b5   :  { %8679 = vmatpush3.msra.mxu1 %v5699_v22  ;;  %v5732_v22 = vld [vmem:[%s12457_s13 + $0x140] sm:$0xff] }
 0x9b6   :  { %8680 = vmatprep.subr.mxu1 %v5714_v1  ;;  %v5747_v1 = vld [vmem:[%s12457_s13 + $0x1b8] sm:$0xff] }
 0x9b7   :  { %8681 = vmatpush3.msra.mxu1 %v5698_v17  ;;  %v5731_v17 = vld [vmem:[%s12457_s13 + $0x138] sm:$0xff] }
 0x9b8   :  { %8682 = vmatprep.subr.mxu1 %v5713_v14  ;;  %v5746_v14 = vld [vmem:[%s12457_s13 + $0x1b0] sm:$0xff] }
 0x9b9   :  { %8683 = vmatpush3.msra.mxu1 %v5697_v15  ;;  %v5730_v15 = vld [vmem:[%s12457_s13 + $0x130] sm:$0xff] }
 0x9ba   :  { %8684 = vmatprep.subr.mxu1 %v5712_v12  ;;  %v5745_v12 = vld [vmem:[%s12457_s13 + $0x1a8] sm:$0xff] }
 0x9bb   :  { %8685 = vmatpush3.msra.mxu1 %v5696_v13  ;;  %v5729_v13 = vld [vmem:[%s12457_s13 + $0x128] sm:$0xff] }
 0x9bc   :  { %8686 = vmatprep.subr.mxu1 %v5711_v18  ;;  %v5744_v18 = vld [vmem:[%s12457_s13 + $0x1a0] sm:$0xff] }
 0x9bd   :  { %8687 = vmatpush3.msra.mxu1 %v5695_v50  ;;  %v5728_v50 = vld [vmem:[%s12457_s13 + $0x120] sm:$0xff] }
 0x9be   :  { %8688 = vmatprep.subr.mxu1 %v5710_v10  ;;  %v5709_v10 = vld [vmem:[%s12457_s13 + $0x88] sm:$0xff] }
 0x9bf   :  { %8689 = vmatpush3.msra.mxu1 %v5694_v11  ;;  %v5743_v11 = vld [vmem:[%s12457_s13 + $0x198] sm:$0xff] }
 0x9c0   :  { %8690 = vmatprep.subr.mxu1 %v5709_v10 }
 0xa1c   :  { %v5406_v47 = vpop.f32.mrf.mxu0 }
 0xa1e   :  { %v5408_v29 = vpop.f32.mrf.mxu0 }
 0xa20   :  { %v5410_v6 = vpop.f32.mrf.mxu0 }
 0xa22   :  { %v5412_v8 = vpop.f32.mrf.mxu0 }
 0xa24   :  { %v5449_v48 = vpop.f32.mrf.mxu1 }
 0xa25   :  { %v5450_v26 = vadd.f32 %v5449_v48, %v5406_v47  ;;  %v5693_v47 = vld [vmem:[%s12457_s13 + $0x8] sm:$0xff]  ;;  %v5742_v48 = vld [vmem:[%s12457_s13 + $0x190] sm:$0xff] }
 0xa26   :  { %v5451_v24 = vpop.f32.mrf.mxu1  ;;  %8691 = vmatpush3.msra.mxu1 %v5693_v47 }
 0xa27   :  { %v5452_v59 = vadd.f32 %v5451_v24, %v5408_v29  ;;  %v5727_v29 = vld [vmem:[%s12457_s13 + $0x118] sm:$0xff]  ;;  %v5726_v24 = vld [vmem:[%s12457_s13 + $0x110] sm:$0xff] }
 0xa28   :  { %v5453_v9 = vpop.f32.mrf.mxu1 }
 0xa29   :  { %v5454_v28 = vadd.f32 %v5453_v9, %v5410_v6  ;;  %v5708_v6 = vld [vmem:[%s12457_s13 + $0x80] sm:$0xff]  ;;  %v5725_v9 = vld [vmem:[%s12457_s13 + $0x108] sm:$0xff] }
 0xa2a   :  { %v5455_v31 = vpop.f32.mrf.mxu1  ;;  %8692 = vmatprep.subr.mxu1 %v5708_v6 }
 0xa2b   :  { %v5456_v63 = vadd.f32 %v5455_v31, %v5412_v8  ;;  %v5692_v8 = vld [vmem:[%s12457_s13] sm:$0xff] }
 0xa2c   :  { %8693 = vmatpush3.msra.mxu1 %v5692_v8  ;;  %v5724_v31 = vld [vmem:[%s12457_s13 + $0x100] sm:$0xff] }
 0xa5c   :  { %v5492_v44 = vpop.f32.mrf.mxu0 }
 0xa5d   :  { %v5493_v25 = vadd.f32 %v5492_v44, %v5450_v26  ;;  %v5741_v44 = vld [vmem:[%s12457_s13 + $0x188] sm:$0xff] }
 0xa5e   :  { %v5494_v45 = vpop.f32.mrf.mxu0 }
 0xa5f   :  { %v5495_v33 = vadd.f32 %v5494_v45, %v5452_v59  ;;  %v5740_v45 = vld [vmem:[%s12457_s13 + $0x180] sm:$0xff]  ;;  %s9746_s13 = smov 32  }
 0xa60   :  { %v5496_v60 = vpop.f32.mrf.mxu0 }
 0xa61   :  { %v5497_v16 = vadd.f32 %v5496_v60, %v5454_v28 }
 0xa62   :  { %v5498_v40 = vpop.f32.mrf.mxu0 }
 0xa63   :  { %v5499_v57 = vadd.f32 %v5498_v40, %v5456_v63 }
 0xa64   :  { %v5535_v56 = vpop.f32.mrf.mxu1 }
 0xa65   :  { %v12227_v34 = vadd.f32 %v5535_v56, %v5493_v25 }
 0xa66   :  { %v5537_v43 = vpop.f32.mrf.mxu1 }
 0xa67   :  { %v12224_v21 = vadd.f32 %v5537_v43, %v5495_v33  ;;  %v5544_v27 = vmul.f32 %v12227_v34, %v12227_v34 }
 0xa68   :  { %v5539_v55 = vpop.f32.mrf.mxu1 }
 0xa69   :  { %v12222_v36 = vadd.f32 %v5539_v55, %v5497_v16  ;;  %v5545_v62 = vmul.f32 %v12224_v21, %v12224_v21 }
 0xa6a   :  { %v5541_v52 = vpop.f32.mrf.mxu1 }
 0xa6b   :  { %v12220_v37 = vadd.f32 %v5541_v52, %v5499_v57  ;;  %v5546_v3 = vmul.f32 %v12222_v36, %v12222_v36 }
 0xa6d   :  { %5578 = vmatprep.subr.mxu0 %v12220_v37  ;;  %v5547_v41 = vmul.f32 %v12220_v37, %v12220_v37 }
 0xa6e   :  { %5579 = vmatpush1.msra.mxu0 %v12222_v36 }
 0xa6f   :  { %5580 = vmatprep.subr.mxu0 %v12224_v21 }
 0xa70   :  { %5581 = vmatpush1.msra.mxu0 %v12227_v34 }
 0xa71   :  { %8315 = vmatmul.mubr.msk.f32.vlgmr.msra.gmra.mxu0 %vm4248_vm3, %v9742_v30  ;;  %5649 = vmatprep.subr.mxu0 %v5547_v41 }
 0xa72   :  { %5650 = vmatpush1.msra.mxu0 %v5546_v3  ;;  %5685 = vmatprep.mubr.f32.mxu0 %v9741_v32 }
 0xa73   :  { %5651 = vmatprep.subr.mxu0 %v5545_v62  ;;  %v5942_v62 = vld [vmem:[%s12458_s14 + $0x38] sm:$0xff] }
 0xa74   :  { %5652 = vmatpush1.msra.mxu0 %v5544_v27  ;;  %5970 = vmatprep.subr.mxu1 %v5942_v62  ;;  %v5941_v27 = vld [vmem:[%s12458_s14 + $0x30] sm:$0xff] }
 0xa75   :  { %8316 = vmatmul.mubr.msk.f32.vlgmr.msra.gmra.mxu0 %vm4248_vm3, %v9742_v30  ;;  %8697 = vmatprep.subr.mxu0 %v5755_v23  ;;  %v5940_v23 = vld [vmem:[%s12458_s14 + $0x28] sm:$0xff] }
 0xa76   :  { %8698 = vmatpush3.msra.mxu0 %v5739_v0  ;;  %v5939_v0 = vld [vmem:[%s12458_s14 + $0x20] sm:$0xff] }
 0xa77   :  { %8699 = vmatprep.subr.mxu0 %v5754_v19  ;;  %v5938_v19 = vld [vmem:[%s12458_s14 + $0x18] sm:$0xff] }
 0xa78   :  { %8700 = vmatpush3.msra.mxu0 %v5738_v46  ;;  %v5937_v46 = vld [vmem:[%s12458_s14 + $0x10] sm:$0xff] }
 0xa79   :  { %8701 = vmatprep.subr.mxu0 %v5753_v4  ;;  %v5936_v4 = vld [vmem:[%s12458_s14 + $0x8] sm:$0xff] }
 0xa7a   :  { %8702 = vmatpush3.msra.mxu0 %v5737_v20  ;;  %v5935_v20 = vld [vmem:[%s12458_s14] sm:$0xff] }
 0xa7b   :  { %8703 = vmatprep.subr.mxu0 %v5752_v49 }
 0xa7c   :  { %8704 = vmatpush3.msra.mxu0 %v5736_v35 }
 0xa7d   :  { %8705 = vmatprep.subr.mxu0 %v5751_v39 }
 0xa7e   :  { %8706 = vmatpush3.msra.mxu0 %v5735_v61  ;;  %v5903_v61 = vld [vmem:[#allocation11] sm:$0x1] }
 0xa7f   :  { %8707 = vmatprep.subr.mxu0 %v5750_v58 }
 0xa80   :  { %8708 = vmatpush3.msra.mxu0 %v5734_v5 }
 0xa81   :  { %8709 = vmatprep.subr.mxu0 %v5749_v42  ;;  %v5925_v42 = vld [vmem:[#allocation13] sm:$0x1] }
 0xa82   :  { %8710 = vmatpush3.msra.mxu0 %v5733_v2 }
 0xa83   :  { %8711 = vmatprep.subr.mxu0 %v5748_v38 }
 0xa84   :  { %8712 = vmatpush3.msra.mxu0 %v5732_v22 }
 0xa85   :  { %8713 = vmatprep.subr.mxu0 %v5747_v1 }
 0xa86   :  { %8714 = vmatpush3.msra.mxu0 %v5731_v17 }
 0xa87   :  { %8715 = vmatprep.subr.mxu0 %v5746_v14 }
 0xa88   :  { %8716 = vmatpush3.msra.mxu0 %v5730_v15 }
 0xa89   :  { %8717 = vmatprep.subr.mxu0 %v5745_v12 }
 0xa8a   :  { %8718 = vmatpush3.msra.mxu0 %v5729_v13 }
 0xa8b   :  { %8719 = vmatprep.subr.mxu0 %v5744_v18 }
 0xa8c   :  { %8720 = vmatpush3.msra.mxu0 %v5728_v50 }
 0xa8d   :  { %8721 = vmatprep.subr.mxu0 %v5743_v11 }
 0xa8e   :  { %8722 = vmatpush3.msra.mxu0 %v5727_v29 }
 0xa8f   :  { %8723 = vmatprep.subr.mxu0 %v5742_v48 }
 0xa90   :  { %8724 = vmatpush3.msra.mxu0 %v5726_v24 }
 0xa91   :  { %8725 = vmatprep.subr.mxu0 %v5741_v44 }
 0xa92   :  { %8726 = vmatpush3.msra.mxu0 %v5725_v9 }
 0xa93   :  { %8727 = vmatprep.subr.mxu0 %v5740_v45 }
 0xa94   :  { %8728 = vmatpush3.msra.mxu0 %v5724_v31 }
 0xb31   :  { %v5616_v60 = vpop.f32.mrf.mxu0 }
 0xb33   :  { %v5618_v56 = vpop.f32.mrf.mxu0 }
 0xb34   :  { %5820 = vmatprep.mubr.f32.mxu1 %v5618_v56 }
 0xb35   :  { %v5687_v40 = vpop.f32.mrf.mxu0  ;;  %5821 = vmatmul.mubr.f32.vlgmr.msra.gmra.mxu1 %v5616_v60 }
 0xb36   :  { %6010 = vmatprep.mubr.f32.mxu1 %v9741_v32  ;;  %5971 = vmatpush1.msra.mxu1 %v5941_v27 }
 0xb37   :  { %v5689_v43 = vpop.f32.mrf.mxu0  ;;  %5972 = vmatprep.subr.mxu1 %v5940_v23 }
 0xb38   :  { %5890 = vmatprep.mubr.f32.mxu0 %v5689_v43  ;;  %5973 = vmatpush1.msra.mxu1 %v5939_v0 }
 0xb39   :  { %5891 = vmatmul.mubr.f32.vlgmr.msra.gmra.mxu0 %v5687_v40  ;;  %5974 = vmatprep.subr.mxu1 %v5938_v19 }
 0xb3a   :  { %5975 = vmatpush1.msra.mxu1 %v5937_v46 }
 0xb3b   :  { %5976 = vmatprep.subr.mxu1 %v5936_v4 }
 0xb3c   :  { %5977 = vmatpush1.msra.mxu1 %v5935_v20 }
 0xbf5   :  { %v8694_v63 = vpop.f32.mrf.mxu1 }
 0xbf7   :  { %v8695_v28 = vpop.f32.mrf.mxu1 }
 0xbf8   :  { %v8696_v57 = vadd.f32 %v8695_v28, %v8694_v63 }
 0xbf9   :  { %v8729_v55 = vpop.f32.mrf.mxu0 }
 0xbfb   :  { %v8730_v59 = vpop.f32.mrf.mxu0 }
 0xbfc   :  { %v8731_v26 = vadd.f32 %v8730_v59, %v8729_v55 }
 0xbfe   :  { %v5893_v16 = vadd.f32 %v8731_v26, %v8696_v57 }
 0xc00   :  { %v5896_v52 = vmul.f32 0.0078125, %v5893_v16 }
 0xc02   :  { %v5897_v33 = vmul.f32 %v5896_v52, %v5896_v52 }
 0xc04   :  { %5899 = vrot.lane.b32.xlu0 %v5897_v33, %s9746_s13 }
 0xc76   :  { %v5900_v25 = vpop.permute.xlu0 %5899 }
 0xc77   :  { %v5902_v41 = vsub.f32 %v5896_v52, %v5900_v25 }
 0xc79   :  { %v5904_v3 = vadd.f32 1e-05, %v5902_v41 }
 0xc7b   :  { %9265 = vrsqrt.f32 %v5904_v3 }
 0xc88   :  { %v9266_v49 = vpop.eup %9265 }
 0xc89   :  { %v5913_v35 = vrot.slane %v9266_v49, %v11818_v54 }
 0xc8b   :  { %v5920_v39 = vrot.slane %v5913_v35, %v11818_v54 }
 0xc8d   :  { %5921 = vrot.lane.b32.xlu0 %v5920_v39, %s9747_s5 }
 0xcff   :  { %v5922_v58 = vpop.permute.xlu0 %5921 }
 0xd00   :  { %v5924_v5 = vmul.f32 %v5922_v58, %v5903_v61 }
 0xd02   :  { %v5926_v2 = vmul.f32 %v5924_v5, %v5896_v52 }
 0xd04   :  { %v5927_v38 = vsub.f32 %v5925_v42, %v5926_v2 }
 0xd06   :  { %v5932_v22 = vrot.slane %v5927_v38, %v11825_v53 }
 0xd08   :  { %v5934_v1 = vsel %vm4242_vm2, %v5924_v5, %v5932_v22 }
 0xd09   :  { %8317 = vmatmul.mubr.msk.f32.vlgmr.msra.gmra.mxu1 %vm3854_vm1, %v5934_v1 }
 0xdc9   :  { %v6012_v17 = vpop.f32.mrf.mxu1 }
 0xdca   :  { %v6020_v14 = vrot.slane %v6012_v17, %v11825_v53  ;;  %v6032_v18 = vrot.slane %v6012_v17, %v11833_v7 }
 0xdcb   :  { %v6014_v15 = vpop.f32.mrf.mxu1 }
 0xdcc   :  { %v6025_v12 = vmul.f32 %v6020_v14, %v12227_v34  ;;  %v6027_v13 = vmul.f32 %v6020_v14, %v12222_v36  ;;  %v6024_v50 = vrot.slane %v6014_v15, %v11825_v53  ;;  %v6036_v6 = vrot.slane %v6014_v15, %v11833_v7 }
 0xdce   :  { %v6037_v10 = vadd.f32 %v6032_v18, %v6025_v12  ;;  %v6039_v11 = vadd.f32 %v6032_v18, %v6027_v13  ;;  %v6026_v47 = vmul.f32 %v6024_v50, %v12224_v21  ;;  %v6028_v29 = vmul.f32 %v6024_v50, %v12220_v37 }
 0xdd0   :  { %vm6041_vm12 = vcmp.ge.f32.partialorder %v6037_v10, 0.0  ;;  %vm6043_vm13 = vcmp.ge.f32.partialorder %v6039_v11, 0.0  ;;  %v6045_v48 = vmul.f32 0.2, %v6037_v10  ;;  %v6047_v8 = vmul.f32 0.2, %v6039_v11 }
 0xdd1   :  { %v6038_v24 = vadd.f32 %v6036_v6, %v6026_v47  ;;  %v6040_v34 = vadd.f32 %v6036_v6, %v6028_v29 }
 0xdd2   :  { %v6049_v44 = vsel %vm6041_vm12, %v6037_v10, %v6045_v48  ;;  %v6051_v36 = vsel %vm6043_vm13, %v6039_v11, %v6047_v8 }
 0xdd3   :  { %vm6042_vm14 = vcmp.ge.f32.partialorder %v6038_v24, 0.0  ;;  %vm6044_vm15 = vcmp.ge.f32.partialorder %v6040_v34, 0.0  ;;  %v6046_v9 = vmul.f32 0.2, %v6038_v24  ;;  %v6048_v45 = vmul.f32 0.2, %v6040_v34 }
 0xdd5   :  { %v6050_v31 = vsel %vm6042_vm14, %v6038_v24, %v6046_v9  ;;  %v6052_v60 = vsel %vm6044_vm15, %v6040_v34, %v6048_v45 }
 0xdd6   :  { %9721 = dma.done.wait [#allocation5 + $0x1], 16384 }
 0xdd7   :  { %9722 = vsyncadd [#allocation5 + $0x1], 4294950912  ;;  %v6056_v21 = vpack.c.bf16 %v6052_v60, %v6050_v31  ;;  %v6055_v37 = vpack.c.bf16 %v6051_v36, %v6049_v44  ;;  %6237 = vmatprep.mubr.bf16.mxu0 %v12721_v51  ;;  %v9267_v56 = vld [vmem:[%s12459_s15] sm:$0xff]   ;;  %v9269_v40 = vld [vmem:[#allocation4 + $0x74] ss:$8 sps:$4 sm:$0xff]   ;;  %vm7132_vm1 = vcmask 64512  }
 0xdd8   :  { %v9271_v43 = vld [vmem:[#allocation4 + $0x70] ss:$8 sps:$4 sm:$0xff]   ;;  %v9268_v63 = vld [vmem:[%s12459_s15 + $0x8] sm:$0xff]   ;;  %6966 = vmatprep.subr.bf16.mxu1 %v9269_v40  ;;  %v9276_v59 = vld [vmem:[#allocation4 + $0x174] ss:$8 sps:$4 sm:$0xff]   ;;  %vm7727_vm4 = vcmask 1024  }
 0xdd9   :  { %6219 = vmatprep.subr.bf16.mxu0 %v6056_v21  ;;  %v9272_v28 = vld [vmem:[#allocation4 + $0x64] ss:$8 sps:$4 sm:$0xff]   ;;  %6967 = vmatpush1.bf16.msra.mxu1 %v9271_v43  ;;  %v9274_v55 = vld [vmem:[#allocation4 + $0x170] ss:$8 sps:$4 sm:$0xff]   ;;  %v9277_v57 = vld [vmem:[#allocation4 + $0x60] ss:$8 sps:$4 sm:$0xff]  }
 0xdda   :  { %6220 = vmatpush1.bf16.msra.mxu0 %v6055_v37  ;;  %6968 = vmatprep.subr.bf16.mxu1 %v9272_v28  ;;  %v9278_v26 = vld [vmem:[#allocation4 + $0x54] ss:$8 sps:$4 sm:$0xff]   ;;  %v9280_v16 = vld [vmem:[#allocation4 + $0x160] ss:$8 sps:$4 sm:$0xff]   ;;  %v9282_v52 = vld [vmem:[#allocation4 + $0x164] ss:$8 sps:$4 sm:$0xff]  }
 0xddb   :  { %7007 = vmatprep.subr.bf16.mxu0 %v9276_v59  ;;  %v9283_v33 = vld [vmem:[#allocation4 + $0x50] ss:$8 sps:$4 sm:$0xff]   ;;  %v9288_v25 = vld [vmem:[#allocation4 + $0x154] ss:$8 sps:$4 sm:$0xff]   ;;  %v9289_v3 = vld [vmem:[#allocation4 + $0x40] ss:$8 sps:$4 sm:$0xff]  }
 0xddc   :  { %v9286_v41 = vld [vmem:[#allocation4 + $0x150] ss:$8 sps:$4 sm:$0xff]   ;;  %v9294_v62 = vld [vmem:[#allocation4 + $0x144] ss:$8 sps:$4 sm:$0xff]   ;;  %v9290_v27 = vld [vmem:[#allocation4 + $0x34] ss:$8 sps:$4 sm:$0xff]  }
 0xddd   :  { %8320 = vmatmul.mubr.msk.bf16.vlgmr.msra.gmra.mxu0 %vm4248_vm3, %v9267_v56  ;;  %6969 = vmatpush1.bf16.msra.mxu1 %v9277_v57  ;;  %v9292_v23 = vld [vmem:[#allocation4 + $0x140] ss:$8 sps:$4 sm:$0xff]   ;;  %v9295_v0 = vld [vmem:[#allocation4 + $0x30] ss:$8 sps:$4 sm:$0xff]   ;;  %v9300_v19 = vld [vmem:[#allocation4 + $0x134] ss:$8 sps:$4 sm:$0xff]  }
 0xdde   :  { %6247 = vmatprep.mubr.bf16.mxu0 %v12721_v51  ;;  %7008 = vmatpush1.bf16.msra.mxu0 %v9274_v55  ;;  %v9284_v51 = vld [vmem:[#allocation4 + $0x44] ss:$8 sps:$4 sm:$0xff]   ;;  %v9298_v4 = vld [vmem:[#allocation4 + $0x130] ss:$8 sps:$4 sm:$0xff]   ;;  %v9301_v20 = vld [vmem:[#allocation4 + $0x20] ss:$8 sps:$4 sm:$0xff]  }
 0xddf   :  { %6970 = vmatprep.subr.bf16.mxu1 %v9278_v26  ;;  %7009 = vmatprep.subr.bf16.mxu0 %v9282_v52  ;;  %v9296_v46 = vld [vmem:[#allocation4 + $0x24] ss:$8 sps:$4 sm:$0xff]   ;;  %v9302_v35 = vld [vmem:[#allocation4 + $0x14] ss:$8 sps:$4 sm:$0xff]   ;;  %v9304_v39 = vld [vmem:[#allocation4 + $0x120] ss:$8 sps:$4 sm:$0xff]  }
 0xde0   :  { %v9306_v49 = vld [vmem:[#allocation4 + $0x124] ss:$8 sps:$4 sm:$0xff]   ;;  %v9307_v61 = vld [vmem:[#allocation4 + $0x10] ss:$8 sps:$4 sm:$0xff]   ;;  %v9312_v58 = vld [vmem:[#allocation4 + $0x114] ss:$8 sps:$4 sm:$0xff]  }
 0xde1   :  { %6971 = vmatpush1.bf16.msra.mxu1 %v9283_v33  ;;  %v9308_v5 = vld [vmem:[#allocation4 + $0x4] ss:$8 sps:$4 sm:$0xff]   ;;  %v9310_v42 = vld [vmem:[#allocation4 + $0x110] ss:$8 sps:$4 sm:$0xff]   ;;  %v9313_v2 = vld [vmem:[#allocation4] ss:$8 sps:$4 sm:$0xff]  }
 0xde2   :  { %7010 = vmatpush1.bf16.msra.mxu0 %v9280_v16  ;;  %6972 = vmatprep.subr.bf16.mxu1 %v9284_v51  ;;  %v9318_v38 = vld [vmem:[#allocation4 + $0x104] ss:$8 sps:$4 sm:$0xff]   ;;  %v9314_v22 = vld [vmem:[#allocation4 + $0xf4] ss:$8 sps:$4 sm:$0xff]   ;;  %v9316_v1 = vld [vmem:[#allocation4 + $0x100] ss:$8 sps:$4 sm:$0xff]  }
 0xde3   :  { %7011 = vmatprep.subr.bf16.mxu0 %v9288_v25  ;;  %v9319_v17 = vld [vmem:[#allocation4 + $0xf0] ss:$8 sps:$4 sm:$0xff]   ;;  %v9324_v14 = vld [vmem:[#allocation4 + $0x1f4] ss:$8 sps:$4 sm:$0xff]   ;;  %v9320_v15 = vld [vmem:[#allocation4 + $0xe4] ss:$8 sps:$4 sm:$0xff]  }
 0xde4   :  { %v9322_v12 = vld [vmem:[#allocation4 + $0x1f0] ss:$8 sps:$4 sm:$0xff]   ;;  %v9325_v13 = vld [vmem:[#allocation4 + $0xe0] ss:$8 sps:$4 sm:$0xff]   ;;  %v9326_v18 = vld [vmem:[#allocation4 + $0xd4] ss:$8 sps:$4 sm:$0xff]  }
 0xde5   :  { %8321 = vmatmul.mubr.msk.bf16.gmra.mxu0 %vm4248_vm3, %v9268_v63  ;;  %6973 = vmatpush1.bf16.msra.mxu1 %v9289_v3  ;;  %v9330_v50 = vld [vmem:[#allocation4 + $0x1e4] ss:$8 sps:$4 sm:$0xff]   ;;  %v9328_v10 = vld [vmem:[#allocation4 + $0x1e0] ss:$8 sps:$4 sm:$0xff]   ;;  %v9331_v11 = vld [vmem:[#allocation4 + $0xd0] ss:$8 sps:$4 sm:$0xff]  }
 0xde6   :  { %7012 = vmatpush1.bf16.msra.mxu0 %v9286_v41  ;;  %6974 = vmatprep.subr.bf16.mxu1 %v9290_v27  ;;  %v9332_v47 = vld [vmem:[#allocation4 + $0xc4] ss:$8 sps:$4 sm:$0xff]   ;;  %v9336_v29 = vld [vmem:[#allocation4 + $0x1d4] ss:$8 sps:$4 sm:$0xff]   ;;  %v9334_v6 = vld [vmem:[#allocation4 + $0x1d0] ss:$8 sps:$4 sm:$0xff]  }
 0xde7   :  { %7013 = vmatprep.subr.bf16.mxu0 %v9294_v62  ;;  %v9337_v48 = vld [vmem:[#allocation4 + $0xc0] ss:$8 sps:$4 sm:$0xff]   ;;  %v9342_v8 = vld [vmem:[#allocation4 + $0x1c4] ss:$8 sps:$4 sm:$0xff]   ;;  %v9338_v24 = vld [vmem:[#allocation4 + $0xb4] ss:$8 sps:$4 sm:$0xff]  }
 0xde8   :  { %v9340_v34 = vld [vmem:[#allocation4 + $0x1c0] ss:$8 sps:$4 sm:$0xff]   ;;  %v9343_v44 = vld [vmem:[#allocation4 + $0xb0] ss:$8 sps:$4 sm:$0xff]   ;;  %v9348_v36 = vld [vmem:[#allocation4 + $0x1b4] ss:$8 sps:$4 sm:$0xff]  }
 0xde9   :  { %6975 = vmatpush1.bf16.msra.mxu1 %v9295_v0  ;;  %v9344_v9 = vld [vmem:[#allocation4 + $0xa4] ss:$8 sps:$4 sm:$0xff]   ;;  %v9346_v45 = vld [vmem:[#allocation4 + $0x1b0] ss:$8 sps:$4 sm:$0xff]   ;;  %v9349_v31 = vld [vmem:[#allocation4 + $0xa0] ss:$8 sps:$4 sm:$0xff]  }
 0xdea   :  { %7014 = vmatpush1.bf16.msra.mxu0 %v9292_v23  ;;  %6976 = vmatprep.subr.bf16.mxu1 %v9296_v46  ;;  %v9354_v60 = vld [vmem:[#allocation4 + $0x1a4] ss:$8 sps:$4 sm:$0xff]   ;;  %v9350_v21 = vld [vmem:[#allocation4 + $0x94] ss:$8 sps:$4 sm:$0xff]   ;;  %v9352_v37 = vld [vmem:[#allocation4 + $0x1a0] ss:$8 sps:$4 sm:$0xff]  }
 0xdeb   :  { %7015 = vmatprep.subr.bf16.mxu0 %v9300_v19  ;;  %v9355_v56 = vld [vmem:[#allocation4 + $0x90] ss:$8 sps:$4 sm:$0xff]   ;;  %v9356_v40 = vld [vmem:[#allocation4 + $0x84] ss:$8 sps:$4 sm:$0xff]   ;;  %v9360_v43 = vld [vmem:[#allocation4 + $0x194] ss:$8 sps:$4 sm:$0xff]  }
 0xdec   :  { %v9358_v63 = vld [vmem:[#allocation4 + $0x190] ss:$8 sps:$4 sm:$0xff]   ;;  %v9361_v28 = vld [vmem:[#allocation4 + $0x80] ss:$8 sps:$4 sm:$0xff]   ;;  %v9364_v55 = vld [vmem:[#allocation4 + $0x184] ss:$8 sps:$4 sm:$0xff]  }
 0xded   :  { %6977 = vmatpush1.bf16.msra.mxu1 %v9301_v20  ;;  %v9367_v59 = vld [vmem:[#allocation4 + $0x274] ss:$8 sps:$4 sm:$0xff]   ;;  %v9362_v57 = vld [vmem:[#allocation4 + $0x180] ss:$8 sps:$4 sm:$0xff]   ;;  %v9365_v51 = vld [vmem:[#allocation4 + $0x270] ss:$8 sps:$4 sm:$0xff]  }
 0xdee   :  { %7016 = vmatpush1.bf16.msra.mxu0 %v9298_v4  ;;  %6978 = vmatprep.subr.bf16.mxu1 %v9302_v35  ;;  %v9373_v26 = vld [vmem:[#allocation4 + $0x374] ss:$8 sps:$4 sm:$0xff]   ;;  %v9370_v3 = vld [vmem:[#allocation4 + $0x264] ss:$8 sps:$4 sm:$0xff]   ;;  %v9368_v23 = vld [vmem:[#allocation4 + $0x260] ss:$8 sps:$4 sm:$0xff]  }
 0xdef   :  { %7017 = vmatprep.subr.bf16.mxu0 %v9306_v49  ;;  %v9371_v0 = vld [vmem:[#allocation4 + $0x370] ss:$8 sps:$4 sm:$0xff]   ;;  %v9376_v46 = vld [vmem:[#allocation4 + $0x254] ss:$8 sps:$4 sm:$0xff]   ;;  %v9379_v4 = vld [vmem:[#allocation4 + $0x364] ss:$8 sps:$4 sm:$0xff]  }
 0xdf0   :  { %v9374_v35 = vld [vmem:[#allocation4 + $0x250] ss:$8 sps:$4 sm:$0xff]  }
 0xdf1   :  { %6979 = vmatpush1.bf16.msra.mxu1 %v9307_v61 }
 0xdf2   :  { %7018 = vmatpush1.bf16.msra.mxu0 %v9304_v39  ;;  %6980 = vmatprep.subr.bf16.mxu1 %v9308_v5  ;;  %v9377_v39 = vld [vmem:[#allocation4 + $0x360] ss:$8 sps:$4 sm:$0xff]   ;;  %v9385_v5 = vld [vmem:[#allocation4 + $0x354] ss:$8 sps:$4 sm:$0xff]  }
 0xdf3   :  { %7019 = vmatprep.subr.bf16.mxu0 %v9312_v58  ;;  %v9382_v58 = vld [vmem:[#allocation4 + $0x244] ss:$8 sps:$4 sm:$0xff]  }
 0xdf5   :  { %6981 = vmatpush1.bf16.msra.mxu1 %v9313_v2 }
 0xdf6   :  { %7020 = vmatpush1.bf16.msra.mxu0 %v9310_v42  ;;  %6982 = vmatprep.subr.bf16.mxu1 %v9314_v22  ;;  %v9383_v22 = vld [vmem:[#allocation4 + $0x350] ss:$8 sps:$4 sm:$0xff]  }
 0xdf7   :  { %7021 = vmatprep.subr.bf16.mxu0 %v9318_v38  ;;  %v9380_v38 = vld [vmem:[#allocation4 + $0x240] ss:$8 sps:$4 sm:$0xff]  }
 0xdf9   :  { %6983 = vmatpush2.bf16.msra.mxu1 %v9319_v17  ;;  %v9388_v17 = vld [vmem:[#allocation4 + $0x234] ss:$8 sps:$4 sm:$0xff]  }
 0xdfa   :  { %7022 = vmatpush1.bf16.msra.mxu0 %v9316_v1  ;;  %6984 = vmatprep.subr.bf16.mxu1 %v9320_v15  ;;  %v9386_v15 = vld [vmem:[#allocation4 + $0x230] ss:$8 sps:$4 sm:$0xff]  }
 0xdfb   :  { %7023 = vmatprep.subr.bf16.mxu0 %v9324_v14  ;;  %v9391_v14 = vld [vmem:[#allocation4 + $0x344] ss:$8 sps:$4 sm:$0xff]  }
 0xdfd   :  { %6985 = vmatpush2.bf16.msra.mxu1 %v9325_v13  ;;  %v9394_v13 = vld [vmem:[#allocation4 + $0x224] ss:$8 sps:$4 sm:$0xff]  }
 0xdfe   :  { %7024 = vmatpush2.bf16.msra.mxu0 %v9322_v12  ;;  %6986 = vmatprep.subr.bf16.mxu1 %v9326_v18  ;;  %v9389_v12 = vld [vmem:[#allocation4 + $0x340] ss:$8 sps:$4 sm:$0xff]   ;;  %v9397_v18 = vld [vmem:[#allocation4 + $0x334] ss:$8 sps:$4 sm:$0xff]  }
 0xdff   :  { %7025 = vmatprep.subr.bf16.mxu0 %v9330_v50  ;;  %v9392_v50 = vld [vmem:[#allocation4 + $0x220] ss:$8 sps:$4 sm:$0xff]  }
 0xe01   :  { %6987 = vmatpush2.bf16.msra.mxu1 %v9331_v11  ;;  %v9400_v11 = vld [vmem:[#allocation4 + $0x214] ss:$8 sps:$4 sm:$0xff]  }
 0xe02   :  { %7026 = vmatpush2.bf16.msra.mxu0 %v9328_v10  ;;  %6988 = vmatprep.subr.bf16.mxu1 %v9332_v47  ;;  %v9395_v10 = vld [vmem:[#allocation4 + $0x330] ss:$8 sps:$4 sm:$0xff]   ;;  %v9403_v47 = vld [vmem:[#allocation4 + $0x324] ss:$8 sps:$4 sm:$0xff]  }
 0xe03   :  { %7027 = vmatprep.subr.bf16.mxu0 %v9336_v29  ;;  %v9398_v29 = vld [vmem:[#allocation4 + $0x210] ss:$8 sps:$4 sm:$0xff]  }
 0xe05   :  { %6989 = vmatpush2.bf16.msra.mxu1 %v9337_v48  ;;  %v9406_v48 = vld [vmem:[#allocation4 + $0x204] ss:$8 sps:$4 sm:$0xff]  }
 0xe06   :  { %7028 = vmatpush2.bf16.msra.mxu0 %v9334_v6  ;;  %6990 = vmatprep.subr.bf16.mxu1 %v9338_v24  ;;  %v9401_v6 = vld [vmem:[#allocation4 + $0x320] ss:$8 sps:$4 sm:$0xff]  }
 0xe07   :  { %7029 = vmatprep.subr.bf16.mxu0 %v9342_v8  ;;  %v9409_v8 = vld [vmem:[#allocation4 + $0x314] ss:$8 sps:$4 sm:$0xff]   ;;  %v9404_v24 = vld [vmem:[#allocation4 + $0x200] ss:$8 sps:$4 sm:$0xff]  }
 0xe09   :  { %6991 = vmatpush2.bf16.msra.mxu1 %v9343_v44  ;;  %v9412_v44 = vld [vmem:[#allocation4 + $0x2f4] ss:$8 sps:$4 sm:$0xff]  }
 0xe0a   :  { %7030 = vmatpush2.bf16.msra.mxu0 %v9340_v34  ;;  %6992 = vmatprep.subr.bf16.mxu1 %v9344_v9  ;;  %v9407_v34 = vld [vmem:[#allocation4 + $0x310] ss:$8 sps:$4 sm:$0xff]  }
 0xe0b   :  { %7031 = vmatprep.subr.bf16.mxu0 %v9348_v36  ;;  %v9415_v36 = vld [vmem:[#allocation4 + $0x304] ss:$8 sps:$4 sm:$0xff]   ;;  %v9410_v9 = vld [vmem:[#allocation4 + $0x2f0] ss:$8 sps:$4 sm:$0xff]  }
 0xe0d   :  { %6993 = vmatpush2.bf16.msra.mxu1 %v9349_v31  ;;  %v9418_v31 = vld [vmem:[#allocation4 + $0x2e4] ss:$8 sps:$4 sm:$0xff]  }
 0xe0e   :  { %7032 = vmatpush2.bf16.msra.mxu0 %v9346_v45  ;;  %6994 = vmatprep.subr.bf16.mxu1 %v9350_v21  ;;  %v9413_v45 = vld [vmem:[#allocation4 + $0x300] ss:$8 sps:$4 sm:$0xff]  }
 0xe0f   :  { %7033 = vmatprep.subr.bf16.mxu0 %v9354_v60  ;;  %v9421_v60 = vld [vmem:[#allocation4 + $0x3f4] ss:$8 sps:$4 sm:$0xff]   ;;  %v9416_v21 = vld [vmem:[#allocation4 + $0x2e0] ss:$8 sps:$4 sm:$0xff]  }
 0xe11   :  { %6995 = vmatpush2.bf16.msra.mxu1 %v9355_v56  ;;  %v9424_v56 = vld [vmem:[#allocation4 + $0x2d4] ss:$8 sps:$4 sm:$0xff]  }
 0xe12   :  { %7034 = vmatpush2.bf16.msra.mxu0 %v9352_v37  ;;  %6996 = vmatprep.subr.bf16.mxu1 %v9356_v40  ;;  %v9419_v37 = vld [vmem:[#allocation4 + $0x3f0] ss:$8 sps:$4 sm:$0xff]   ;;  %v9427_v40 = vld [vmem:[#allocation4 + $0x3e4] ss:$8 sps:$4 sm:$0xff]  }
 0xe13   :  { %7035 = vmatprep.subr.bf16.mxu0 %v9360_v43  ;;  %v9422_v43 = vld [vmem:[#allocation4 + $0x2d0] ss:$8 sps:$4 sm:$0xff]  }
 0xe15   :  { %6997 = vmatpush2.bf16.msra.mxu1 %v9361_v28  ;;  %v9430_v28 = vld [vmem:[#allocation4 + $0x2c4] ss:$8 sps:$4 sm:$0xff]  }
 0xe16   :  { %7036 = vmatpush2.bf16.msra.mxu0 %v9358_v63  ;;  %7048 = vmatprep.subr.bf16.mxu1 %v9367_v59  ;;  %v9425_v63 = vld [vmem:[#allocation4 + $0x3e0] ss:$8 sps:$4 sm:$0xff]  }
 0xe17   :  { %7037 = vmatprep.subr.bf16.mxu0 %v9364_v55  ;;  %v9433_v55 = vld [vmem:[#allocation4 + $0x3d4] ss:$8 sps:$4 sm:$0xff]   ;;  %v9428_v59 = vld [vmem:[#allocation4 + $0x2c0] ss:$8 sps:$4 sm:$0xff]  }
 0xe1a   :  { %7038 = vmatpush2.bf16.msra.mxu0 %v9362_v57  ;;  %v9431_v57 = vld [vmem:[#allocation4 + $0x3d0] ss:$8 sps:$4 sm:$0xff]  }
 0xe1b   :  { %7089 = vmatprep.subr.bf16.mxu0 %v9373_v26  ;;  %v9436_v26 = vld [vmem:[#allocation4 + $0x2b4] ss:$8 sps:$4 sm:$0xff]  }
 0xe9d   :  { %v6239_v16 = vpop.f32.mrf.mxu0 }
 0xe9e   :  { %v8584_v25 = vpack.c.bf16 %v6239_v16, %v6239_v16  ;;  %v9439_v16 = vld [vmem:[#allocation4 + $0x3c4] ss:$8 sps:$4 sm:$0xff]  }
 0xe9f   :  { %v6241_v52 = vpop.f32.mrf.mxu0 }
 0xea0   :  { %v8585_v33 = vpack.c.bf16 %v6241_v52, %v6241_v52  ;;  %v9434_v52 = vld [vmem:[#allocation4 + $0x2b0] ss:$8 sps:$4 sm:$0xff]  }
 0xea1   :  { %v6243_v41 = vpop.f32.mrf.mxu0 }
 0xea2   :  { %6998 = vmatprep.mubr.bf16.mxu1 %v8585_v33  ;;  %v8586_v19 = vpack.c.bf16 %v6243_v41, %v6243_v41  ;;  %v9437_v33 = vld [vmem:[#allocation4 + $0x3c0] ss:$8 sps:$4 sm:$0xff]  }
 0xea3   :  { %v6245_v62 = vpop.f32.mrf.mxu0  ;;  %6999 = vmatmul.mubr.bf16.vlgmr.msra.gmra.mxu1 %v8584_v25  ;;  %v9445_v25 = vld [vmem:[#allocation4 + $0x3b4] ss:$8 sps:$4 sm:$0xff]   ;;  %v9440_v41 = vld [vmem:[#allocation4 + $0x2a0] ss:$8 sps:$4 sm:$0xff]  }
 0xea4   :  { %v8587_v27 = vpack.c.bf16 %v6245_v62, %v6245_v62  ;;  %7049 = vmatpush1.bf16.msra.mxu1 %v9365_v51  ;;  %v9442_v51 = vld [vmem:[#allocation4 + $0x2a4] ss:$8 sps:$4 sm:$0xff]   ;;  %v9448_v62 = vld [vmem:[#allocation4 + $0x294] ss:$8 sps:$4 sm:$0xff]  }
 0xea5   :  { %7050 = vmatprep.subr.bf16.mxu1 %v9370_v3  ;;  %v12401_v20 = vpop.f32.mrf.mxu0  ;;  %v9443_v3 = vld [vmem:[#allocation4 + $0x3b0] ss:$8 sps:$4 sm:$0xff]  }
 0xea6   :  { %7039 = vmatprep.mubr.bf16.mxu0 %v8587_v27  ;;  %v9451_v27 = vld [vmem:[#allocation4 + $0x3a4] ss:$8 sps:$4 sm:$0xff]  }
 0xea7   :  { %7040 = vmatmul.mubr.bf16.vlgmr.msra.gmra.mxu0 %v8586_v19  ;;  %v6251_v49 = vpop.f32.mrf.mxu0  ;;  %v9454_v19 = vld [vmem:[#allocation4 + $0x284] ss:$8 sps:$4 sm:$0xff]  }
 0xea8   :  { %7051 = vmatpush1.bf16.msra.mxu1 %v9368_v23  ;;  %7090 = vmatpush1.bf16.msra.mxu0 %v9371_v0  ;;  %v8589_v61 = vpack.c.bf16 %v6251_v49, %v6251_v49  ;;  %v9446_v23 = vld [vmem:[#allocation4 + $0x290] ss:$8 sps:$4 sm:$0xff]   ;;  %v9449_v0 = vld [vmem:[#allocation4 + $0x3a0] ss:$8 sps:$4 sm:$0xff]  }
 0xea9   :  { %7052 = vmatprep.subr.bf16.mxu1 %v9376_v46  ;;  %7091 = vmatprep.subr.bf16.mxu0 %v9379_v4  ;;  %v12403_v42 = vpop.f32.mrf.mxu0  ;;  %v9457_v46 = vld [vmem:[#allocation4 + $0x394] ss:$8 sps:$4 sm:$0xff]   ;;  %v9452_v4 = vld [vmem:[#allocation4 + $0x280] ss:$8 sps:$4 sm:$0xff]   ;;  %v9455_v49 = vld [vmem:[#allocation4 + $0x390] ss:$8 sps:$4 sm:$0xff]  }
 0xeaa   :  { %7080 = vmatprep.mubr.bf16.mxu1 %v8589_v61  ;;  %v8588_v61 = vpack.c.bf16 %v12401_v20, %v12401_v20  ;;  %v7305_v20 = vld [vmem:[#allocation17 + $0xe0] sm:$0xff] }
 0xeab   :  { %v6255_v2 = vpop.f32.mrf.mxu0 }
 0xeac   :  { %7053 = vmatpush1.bf16.msra.mxu1 %v9374_v35  ;;  %7092 = vmatpush1.bf16.msra.mxu0 %v9377_v39  ;;  %v8591_v1 = vpack.c.bf16 %v6255_v2, %v6255_v2  ;;  %v9460_v35 = vld [vmem:[#allocation4 + $0x384] ss:$8 sps:$4 sm:$0xff]   ;;  %v9458_v39 = vld [vmem:[#allocation4 + $0x380] ss:$8 sps:$4 sm:$0xff]  }
 0xead   :  { %7054 = vmatprep.subr.bf16.mxu1 %v9382_v58  ;;  %7093 = vmatprep.subr.bf16.mxu0 %v9385_v5  ;;  %v8590_v58 = vpack.c.bf16 %v12403_v42, %v12403_v42  ;;  %v7308_v5 = vld [vmem:[#allocation17 + $0xf8] sm:$0xff] }
 0xeae   :  { %7121 = vmatprep.mubr.bf16.mxu0 %v8591_v1  ;;  %v7292_v2 = vld [vmem:[#allocation17 + $0x78] sm:$0xff]  ;;  %v7306_v1 = vld [vmem:[#allocation17 + $0xe8] sm:$0xff] }
 0xeaf   :  { %v7288_v42 = vld [vmem:[#allocation17 + $0x58] sm:$0xff] }
 0xeb0   :  { %7055 = vmatpush1.bf16.msra.mxu1 %v9380_v38  ;;  %7094 = vmatpush1.bf16.msra.mxu0 %v9383_v22  ;;  %v7307_v38 = vld [vmem:[#allocation17 + $0xf0] sm:$0xff] }
 0xeb1   :  { %7056 = vmatprep.subr.bf16.mxu1 %v9388_v17  ;;  %7095 = vmatprep.subr.bf16.mxu0 %v9391_v14  ;;  %v7291_v22 = vld [vmem:[#allocation17 + $0x70] sm:$0xff]  ;;  %v7290_v17 = vld [vmem:[#allocation17 + $0x68] sm:$0xff]  ;;  %v7289_v14 = vld [vmem:[#allocation17 + $0x60] sm:$0xff] }
 0xeb4   :  { %7057 = vmatpush1.bf16.msra.mxu1 %v9386_v15  ;;  %7096 = vmatpush1.bf16.msra.mxu0 %v9389_v12  ;;  %v7304_v15 = vld [vmem:[#allocation17 + $0xd8] sm:$0xff]  ;;  %v7303_v12 = vld [vmem:[#allocation17 + $0xd0] sm:$0xff] }
 0xeb5   :  { %7058 = vmatprep.subr.bf16.mxu1 %v9394_v13  ;;  %7097 = vmatprep.subr.bf16.mxu0 %v9397_v18  ;;  %v7287_v13 = vld [vmem:[#allocation17 + $0x50] sm:$0xff]  ;;  %v7302_v18 = vld [vmem:[#allocation17 + $0xc8] sm:$0xff] }
 0xeb8   :  { %7059 = vmatpush1.bf16.msra.mxu1 %v9392_v50  ;;  %7098 = vmatpush1.bf16.msra.mxu0 %v9395_v10  ;;  %v7286_v50 = vld [vmem:[#allocation17 + $0x48] sm:$0xff]  ;;  %v7301_v10 = vld [vmem:[#allocation17 + $0xc0] sm:$0xff] }
 0xeb9   :  { %7060 = vmatprep.subr.bf16.mxu1 %v9400_v11  ;;  %7099 = vmatprep.subr.bf16.mxu0 %v9403_v47  ;;  %v7285_v11 = vld [vmem:[#allocation17 + $0x40] sm:$0xff]  ;;  %v7300_v47 = vld [vmem:[#allocation17 + $0xb8] sm:$0xff] }
 0xebc   :  { %7061 = vmatpush1.bf16.msra.mxu1 %v9398_v29  ;;  %7100 = vmatpush1.bf16.msra.mxu0 %v9401_v6  ;;  %v7284_v29 = vld [vmem:[#allocation17 + $0x38] sm:$0xff]  ;;  %v7299_v6 = vld [vmem:[#allocation17 + $0xb0] sm:$0xff] }
 0xebd   :  { %7062 = vmatprep.subr.bf16.mxu1 %v9406_v48  ;;  %7101 = vmatprep.subr.bf16.mxu0 %v9409_v8  ;;  %v7283_v48 = vld [vmem:[#allocation17 + $0x30] sm:$0xff]  ;;  %v7298_v8 = vld [vmem:[#allocation17 + $0xa8] sm:$0xff] }
 0xec0   :  { %7063 = vmatpush1.bf16.msra.mxu1 %v9404_v24  ;;  %7102 = vmatpush1.bf16.msra.mxu0 %v9407_v34  ;;  %v7282_v24 = vld [vmem:[#allocation17 + $0x28] sm:$0xff]  ;;  %v7297_v34 = vld [vmem:[#allocation17 + $0xa0] sm:$0xff] }
 0xec1   :  { %7064 = vmatprep.subr.bf16.mxu1 %v9412_v44  ;;  %7103 = vmatprep.subr.bf16.mxu0 %v9415_v36  ;;  %v7281_v44 = vld [vmem:[#allocation17 + $0x20] sm:$0xff]  ;;  %v7296_v36 = vld [vmem:[#allocation17 + $0x98] sm:$0xff] }
 0xec4   :  { %7065 = vmatpush2.bf16.msra.mxu1 %v9410_v9  ;;  %7104 = vmatpush1.bf16.msra.mxu0 %v9413_v45  ;;  %v7280_v9 = vld [vmem:[#allocation17 + $0x18] sm:$0xff]  ;;  %v7295_v45 = vld [vmem:[#allocation17 + $0x90] sm:$0xff] }
 0xec5   :  { %7066 = vmatprep.subr.bf16.mxu1 %v9418_v31  ;;  %7105 = vmatprep.subr.bf16.mxu0 %v9421_v60  ;;  %v7279_v31 = vld [vmem:[#allocation17 + $0x10] sm:$0xff] }
 0xec8   :  { %7067 = vmatpush2.bf16.msra.mxu1 %v9416_v21  ;;  %7106 = vmatpush2.bf16.msra.mxu0 %v9419_v37 }
 0xec9   :  { %7068 = vmatprep.subr.bf16.mxu1 %v9424_v56  ;;  %7107 = vmatprep.subr.bf16.mxu0 %v9427_v40 }
 0xecc   :  { %7069 = vmatpush2.bf16.msra.mxu1 %v9422_v43  ;;  %7108 = vmatpush2.bf16.msra.mxu0 %v9425_v63 }
 0xecd   :  { %7070 = vmatprep.subr.bf16.mxu1 %v9430_v28  ;;  %7109 = vmatprep.subr.bf16.mxu0 %v9433_v55 }
 0xed0   :  { %7071 = vmatpush2.bf16.msra.mxu1 %v9428_v59  ;;  %7110 = vmatpush2.bf16.msra.mxu0 %v9431_v57 }
 0xed1   :  { %7072 = vmatprep.subr.bf16.mxu1 %v9436_v26  ;;  %7111 = vmatprep.subr.bf16.mxu0 %v9439_v16 }
 0xed4   :  { %7073 = vmatpush2.bf16.msra.mxu1 %v9434_v52  ;;  %7112 = vmatpush2.bf16.msra.mxu0 %v9437_v33 }
 0xed5   :  { %7074 = vmatprep.subr.bf16.mxu1 %v9442_v51  ;;  %7113 = vmatprep.subr.bf16.mxu0 %v9445_v25 }
 0xed8   :  { %7075 = vmatpush2.bf16.msra.mxu1 %v9440_v41  ;;  %7114 = vmatpush2.bf16.msra.mxu0 %v9443_v3 }
 0xed9   :  { %7076 = vmatprep.subr.bf16.mxu1 %v9448_v62  ;;  %7115 = vmatprep.subr.bf16.mxu0 %v9451_v27 }
 0xedc   :  { %7077 = vmatpush2.bf16.msra.mxu1 %v9446_v23  ;;  %7116 = vmatpush2.bf16.msra.mxu0 %v9449_v0 }
 0xedd   :  { %7078 = vmatprep.subr.bf16.mxu1 %v9454_v19  ;;  %7117 = vmatprep.subr.bf16.mxu0 %v9457_v46  ;;  %v7340_v46 = vld [vmem:[#allocation17 + $0x1f8] sm:$0xff] }
 0xee0   :  { %7079 = vmatpush2.bf16.msra.mxu1 %v9452_v4  ;;  %7118 = vmatpush2.bf16.msra.mxu0 %v9455_v49  ;;  %v7324_v4 = vld [vmem:[#allocation17 + $0x178] sm:$0xff]  ;;  %v7339_v49 = vld [vmem:[#allocation17 + $0x1f0] sm:$0xff] }
 0xee1   :  { %7119 = vmatprep.subr.bf16.mxu0 %v9460_v35  ;;  %8732 = vmatprep.subr.mxu1 %v7308_v5  ;;  %v7323_v35 = vld [vmem:[#allocation17 + $0x170] sm:$0xff]  ;;  %v7321_v5 = vld [vmem:[#allocation17 + $0x160] sm:$0xff] }
 0xee3   :  { %7081 = vmatmul.mubr.bf16.vlgmr.msra.gmra.mxu1 %v8588_v61  ;;  %v7322_v61 = vld [vmem:[#allocation17 + $0x168] sm:$0xff] }
 0xee4   :  { %7120 = vmatpush2.bf16.msra.mxu0 %v9458_v39  ;;  %8733 = vmatpush3.msra.mxu1 %v7292_v2  ;;  %v7338_v39 = vld [vmem:[#allocation17 + $0x1e8] sm:$0xff]  ;;  %v7336_v2 = vld [vmem:[#allocation17 + $0x1d8] sm:$0xff] }
 0xee5   :  { %8734 = vmatprep.subr.mxu1 %v7307_v38  ;;  %v7320_v38 = vld [vmem:[#allocation17 + $0x158] sm:$0xff] }
 0xee6   :  { %8735 = vmatpush3.msra.mxu1 %v7291_v22  ;;  %v7335_v22 = vld [vmem:[#allocation17 + $0x1d0] sm:$0xff] }
 0xee7   :  { %7122 = vmatmul.mubr.bf16.vlgmr.msra.gmra.mxu0 %v8590_v58  ;;  %8736 = vmatprep.subr.mxu1 %v7306_v1  ;;  %v7337_v58 = vld [vmem:[#allocation17 + $0x1e0] sm:$0xff]  ;;  %v7319_v1 = vld [vmem:[#allocation17 + $0x150] sm:$0xff] }
 0xee8   :  { %7199 = vmatprep.mubr.f32.mxu0 %v9741_v32  ;;  %8737 = vmatpush3.msra.mxu1 %v7290_v17  ;;  %v7334_v17 = vld [vmem:[#allocation17 + $0x1c8] sm:$0xff] }
 0xee9   :  { %8738 = vmatprep.subr.mxu1 %v7305_v20  ;;  %v7333_v20 = vld [vmem:[#allocation17 + $0x1c0] sm:$0xff] }
 0xeea   :  { %8739 = vmatpush3.msra.mxu1 %v7289_v14  ;;  %v7317_v14 = vld [vmem:[#allocation17 + $0x140] sm:$0xff] }
 0xeeb   :  { %8740 = vmatprep.subr.mxu1 %v7304_v15  ;;  %v7332_v15 = vld [vmem:[#allocation17 + $0x1b8] sm:$0xff] }
 0xeec   :  { %8741 = vmatpush3.msra.mxu1 %v7288_v42  ;;  %v7316_v42 = vld [vmem:[#allocation17 + $0x138] sm:$0xff] }
 0xeed   :  { %8742 = vmatprep.subr.mxu1 %v7303_v12  ;;  %v7331_v12 = vld [vmem:[#allocation17 + $0x1b0] sm:$0xff] }
 0xeee   :  { %8743 = vmatpush3.msra.mxu1 %v7287_v13  ;;  %v7315_v13 = vld [vmem:[#allocation17 + $0x130] sm:$0xff] }
 0xeef   :  { %8744 = vmatprep.subr.mxu1 %v7302_v18  ;;  %v7330_v18 = vld [vmem:[#allocation17 + $0x1a8] sm:$0xff] }
 0xef0   :  { %8745 = vmatpush3.msra.mxu1 %v7286_v50  ;;  %v7314_v50 = vld [vmem:[#allocation17 + $0x128] sm:$0xff] }
 0xef1   :  { %8746 = vmatprep.subr.mxu1 %v7301_v10  ;;  %v7329_v10 = vld [vmem:[#allocation17 + $0x1a0] sm:$0xff] }
 0xef2   :  { %8747 = vmatpush3.msra.mxu1 %v7285_v11  ;;  %v7313_v11 = vld [vmem:[#allocation17 + $0x120] sm:$0xff] }
 0xef3   :  { %8748 = vmatprep.subr.mxu1 %v7300_v47  ;;  %v7294_v47 = vld [vmem:[#allocation17 + $0x88] sm:$0xff] }
 0xef4   :  { %8749 = vmatpush3.msra.mxu1 %v7284_v29  ;;  %v7328_v29 = vld [vmem:[#allocation17 + $0x198] sm:$0xff] }
 0xef5   :  { %8750 = vmatprep.subr.mxu1 %v7299_v6  ;;  %v7278_v6 = vld [vmem:[#allocation17 + $0x8] sm:$0xff] }
 0xef6   :  { %8751 = vmatpush3.msra.mxu1 %v7283_v48  ;;  %v7312_v48 = vld [vmem:[#allocation17 + $0x118] sm:$0xff] }
 0xef7   :  { %8752 = vmatprep.subr.mxu1 %v7298_v8  ;;  %v7293_v8 = vld [vmem:[#allocation17 + $0x80] sm:$0xff] }
 0xef8   :  { %8753 = vmatpush3.msra.mxu1 %v7282_v24  ;;  %v7327_v24 = vld [vmem:[#allocation17 + $0x190] sm:$0xff] }
 0xef9   :  { %8754 = vmatprep.subr.mxu1 %v7297_v34  ;;  %v7277_v34 = vld [vmem:[#allocation17] sm:$0xff] }
 0xefa   :  { %8755 = vmatpush3.msra.mxu1 %v7281_v44  ;;  %v7311_v44 = vld [vmem:[#allocation17 + $0x110] sm:$0xff] }
 0xefb   :  { %8756 = vmatprep.subr.mxu1 %v7296_v36  ;;  %v7326_v36 = vld [vmem:[#allocation17 + $0x188] sm:$0xff] }
 0xefc   :  { %8757 = vmatpush3.msra.mxu1 %v7280_v9  ;;  %v7310_v9 = vld [vmem:[#allocation17 + $0x108] sm:$0xff] }
 0xefd   :  { %8758 = vmatprep.subr.mxu1 %v7295_v45  ;;  %v7325_v45 = vld [vmem:[#allocation17 + $0x180] sm:$0xff] }
 0xefe   :  { %8759 = vmatpush3.msra.mxu1 %v7279_v31  ;;  %v7309_v31 = vld [vmem:[#allocation17 + $0x100] sm:$0xff] }
 0xeff   :  { %8760 = vmatprep.subr.mxu1 %v7294_v47 }
 0xf00   :  { %8761 = vmatpush3.msra.mxu1 %v7278_v6 }
 0xf01   :  { %8762 = vmatprep.subr.mxu1 %v7293_v8 }
 0xf02   :  { %8763 = vmatpush3.msra.mxu1 %v7277_v34 }
 0xf63   :  { %v7000_v60 = vpop.f32.mrf.mxu1 }
 0xf65   :  { %v7002_v21 = vpop.f32.mrf.mxu1 }
 0xf67   :  { %v7004_v37 = vpop.f32.mrf.mxu1  ;;  %v7041_v56 = vpop.f32.mrf.mxu0 }
 0xf68   :  { %v7042_v59 = vadd.f32 %v7041_v56, %v7000_v60 }
 0xf69   :  { %v7005_v40 = vpop.f32.mrf.mxu1  ;;  %v7043_v43 = vpop.f32.mrf.mxu0 }
 0xf6a   :  { %v7044_v26 = vadd.f32 %v7043_v43, %v7002_v21 }
 0xf6b   :  { %v7045_v63 = vpop.f32.mrf.mxu0 }
 0xf6d   :  { %v7046_v28 = vpop.f32.mrf.mxu0 }
 0xfa3   :  { %v7082_v55 = vpop.f32.mrf.mxu1 }
 0xfa4   :  { %v7083_v16 = vadd.f32 %v7082_v55, %v7042_v59 }
 0xfa5   :  { %v7084_v57 = vpop.f32.mrf.mxu1 }
 0xfa6   :  { %v7085_v51 = vadd.f32 %v7084_v57, %v7044_v26 }
 0xfa7   :  { %v7086_v52 = vpop.f32.mrf.mxu1  ;;  %v7123_v33 = vpop.f32.mrf.mxu0 }
 0xfa8   :  { %v12410_v25 = vadd.f32 %v7123_v33, %v7083_v16  ;;  %v7535_v52 = vld [vmem:[#allocation19 + $0x78] sm:$0xff]  ;;  %v7534_v33 = vld [vmem:[#allocation19 + $0x70] sm:$0xff] }
 0xfa9   :  { %v7087_v41 = vpop.f32.mrf.mxu1  ;;  %v7125_v3 = vpop.f32.mrf.mxu0  ;;  %7555 = vmatprep.subr.mxu1 %v7535_v52 }
 0xfaa   :  { %v12412_v62 = vadd.f32 %v7125_v3, %v7085_v51  ;;  %v7130_v0 = vmul.f32 %v12410_v25, %v12410_v25  ;;  %v7533_v51 = vld [vmem:[#allocation19 + $0x68] sm:$0xff]  ;;  %v7532_v41 = vld [vmem:[#allocation19 + $0x60] sm:$0xff]  ;;  %v7531_v3 = vld [vmem:[#allocation19 + $0x58] sm:$0xff] }
 0xfab   :  { %v7127_v27 = vpop.f32.mrf.mxu0 }
 0xfac   :  { %7165 = vmatprep.subr.mxu0 %v12412_v62  ;;  %v7131_v23 = vmul.f32 %v12412_v62, %v12412_v62  ;;  %v7529_v27 = vld [vmem:[#allocation19 + $0x48] sm:$0xff] }
 0xfad   :  { %v7128_v19 = vpop.f32.mrf.mxu0  ;;  %7166 = vmatpush1.msra.mxu0 %v12410_v25 }
 0xfae   :  { %8462 = vmatmul.mubr.msk.f32.vlgmr.msra.gmra.mxu0 %vm7132_vm1, %v9742_v30  ;;  %7236 = vmatprep.subr.mxu0 %v7131_v23 }
 0xfaf   :  { %7237 = vmatpush1.msra.mxu0 %v7130_v0  ;;  %7270 = vmatprep.mubr.f32.mxu0 %v9741_v32 }
 0xfb0   :  { %8767 = vmatprep.subr.mxu0 %v7340_v46  ;;  %v7528_v46 = vld [vmem:[#allocation19 + $0x40] sm:$0xff] }
 0xfb2   :  { %8463 = vmatmul.mubr.msk.f32.vlgmr.msra.gmra.mxu0 %vm7132_vm1, %v9742_v30  ;;  %v7318_v30 = vld [vmem:[#allocation17 + $0x148] sm:$0xff] }
 0xfb3   :  { %8768 = vmatpush3.msra.mxu0 %v7324_v4  ;;  %v7527_v4 = vld [vmem:[#allocation19 + $0x38] sm:$0xff] }
 0xfb4   :  { %8769 = vmatprep.subr.mxu0 %v7339_v49  ;;  %v7526_v49 = vld [vmem:[#allocation19 + $0x30] sm:$0xff] }
 0xfb5   :  { %8770 = vmatpush3.msra.mxu0 %v7323_v35  ;;  %v7525_v35 = vld [vmem:[#allocation19 + $0x28] sm:$0xff] }
 0xfb6   :  { %8771 = vmatprep.subr.mxu0 %v7338_v39  ;;  %v7524_v39 = vld [vmem:[#allocation19 + $0x20] sm:$0xff] }
 0xfb7   :  { %8772 = vmatpush3.msra.mxu0 %v7322_v61  ;;  %v7523_v61 = vld [vmem:[#allocation19 + $0x18] sm:$0xff] }
 0xfb8   :  { %8773 = vmatprep.subr.mxu0 %v7337_v58  ;;  %v7522_v58 = vld [vmem:[#allocation19 + $0x10] sm:$0xff] }
 0xfb9   :  { %8774 = vmatpush3.msra.mxu0 %v7321_v5  ;;  %v7521_v5 = vld [vmem:[#allocation19 + $0x8] sm:$0xff] }
 0xfba   :  { %8775 = vmatprep.subr.mxu0 %v7336_v2  ;;  %v7520_v2 = vld [vmem:[#allocation19] sm:$0xff] }
 0xfbb   :  { %8776 = vmatpush3.msra.mxu0 %v7320_v38 }
 0xfbc   :  { %8777 = vmatprep.subr.mxu0 %v7335_v22 }
 0xfbd   :  { %8778 = vmatpush3.msra.mxu0 %v7319_v1 }
 0xfbe   :  { %8779 = vmatprep.subr.mxu0 %v7334_v17  ;;  %v7488_v17 = vld [vmem:[#allocation14] sm:$0x1] }
 0xfbf   :  { %8780 = vmatpush3.msra.mxu0 %v7318_v30 }
 0xfc0   :  { %8781 = vmatprep.subr.mxu0 %v7333_v20 }
 0xfc1   :  { %8782 = vmatpush3.msra.mxu0 %v7317_v14  ;;  %v7510_v14 = vld [vmem:[#allocation16] sm:$0x1] }
 0xfc2   :  { %8783 = vmatprep.subr.mxu0 %v7332_v15 }
 0xfc3   :  { %8784 = vmatpush3.msra.mxu0 %v7316_v42 }
 0xfc4   :  { %8785 = vmatprep.subr.mxu0 %v7331_v12 }
 0xfc5   :  { %8786 = vmatpush3.msra.mxu0 %v7315_v13 }
 0xfc6   :  { %8787 = vmatprep.subr.mxu0 %v7330_v18 }
 0xfc7   :  { %8788 = vmatpush3.msra.mxu0 %v7314_v50 }
 0xfc8   :  { %8789 = vmatprep.subr.mxu0 %v7329_v10 }
 0xfc9   :  { %8790 = vmatpush3.msra.mxu0 %v7313_v11 }
 0xfca   :  { %8791 = vmatprep.subr.mxu0 %v7328_v29 }
 0xfcb   :  { %8792 = vmatpush3.msra.mxu0 %v7312_v48 }
 0xfcc   :  { %8793 = vmatprep.subr.mxu0 %v7327_v24 }
 0xfcd   :  { %8794 = vmatpush3.msra.mxu0 %v7311_v44  ;;  %v7637_v44 = vld [vmem:[#allocation20 + $0x8] sm:$0xff] }
 0xfce   :  { %8795 = vmatprep.subr.mxu0 %v7326_v36 }
 0xfcf   :  { %8796 = vmatpush3.msra.mxu0 %v7310_v9  ;;  %v7636_v9 = vld [vmem:[#allocation20] sm:$0xff] }
 0xfd0   :  { %8797 = vmatprep.subr.mxu0 %v7325_v45 }
 0xfd1   :  { %8798 = vmatpush3.msra.mxu0 %v7309_v31 }
0x106e   :  { %v7201_v60 = vpop.f32.mrf.mxu0 }
0x1070   :  { %v7203_v21 = vpop.f32.mrf.mxu0 }
0x1071   :  { %7405 = vmatprep.mubr.f32.mxu1 %v7203_v21 }
0x1072   :  { %v7272_v37 = vpop.f32.mrf.mxu0  ;;  %7406 = vmatmul.mubr.f32.vlgmr.msra.gmra.mxu1 %v7201_v60  ;;  %v7640_v60 = vld [vmem:[#allocation22] sm:$0x3] }
0x1073   :  { %7603 = vmatprep.mubr.f32.mxu1 %v9741_v32  ;;  %7556 = vmatpush1.msra.mxu1 %v7534_v33 }
0x1074   :  { %v7274_v56 = vpop.f32.mrf.mxu0  ;;  %7557 = vmatprep.subr.mxu1 %v7533_v51 }
0x1075   :  { %7475 = vmatprep.mubr.f32.mxu0 %v7274_v56  ;;  %7558 = vmatpush1.msra.mxu1 %v7532_v41 }
0x1076   :  { %7476 = vmatmul.mubr.f32.vlgmr.msra.gmra.mxu0 %v7272_v37  ;;  %7559 = vmatprep.subr.mxu1 %v7531_v3 }
0x1077   :  { %7708 = vmatprep.mubr.f32.mxu0 %v9741_v32  ;;  %v7530_v32 = vld [vmem:[#allocation19 + $0x50] sm:$0xff] }
0x1078   :  { %7560 = vmatpush1.msra.mxu1 %v7530_v32 }
0x1079   :  { %7561 = vmatprep.subr.mxu1 %v7529_v27 }
0x107a   :  { %7562 = vmatpush1.msra.mxu1 %v7528_v46 }
0x107b   :  { %7563 = vmatprep.subr.mxu1 %v7527_v4 }
0x107c   :  { %7564 = vmatpush1.msra.mxu1 %v7526_v49 }
0x107d   :  { %7565 = vmatprep.subr.mxu1 %v7525_v35 }
0x107e   :  { %7566 = vmatpush1.msra.mxu1 %v7524_v39 }
0x107f   :  { %7567 = vmatprep.subr.mxu1 %v7523_v61 }
0x1080   :  { %7568 = vmatpush1.msra.mxu1 %v7522_v58 }
0x1081   :  { %7569 = vmatprep.subr.mxu1 %v7521_v5 }
0x1082   :  { %7570 = vmatpush1.msra.mxu1 %v7520_v2 }
0x1132   :  { %v8764_v40 = vpop.f32.mrf.mxu1 }
0x1134   :  { %v8765_v43 = vpop.f32.mrf.mxu1 }
0x1135   :  { %v8766_v55 = vadd.f32 %v8765_v43, %v8764_v40 }
0x1136   :  { %v8799_v63 = vpop.f32.mrf.mxu0 }
0x1138   :  { %v8800_v28 = vpop.f32.mrf.mxu0 }
0x1139   :  { %v8801_v59 = vadd.f32 %v8800_v28, %v8799_v63 }
0x113b   :  { %v7478_v57 = vadd.f32 %v8801_v59, %v8766_v55 }
0x113d   :  { %v7481_v26 = vmul.f32 0.03125, %v7478_v57 }
0x113f   :  { %v7482_v16 = vmul.f32 %v7481_v26, %v7481_v26 }
0x1141   :  { %7484 = vrot.lane.b32.xlu0 %v7482_v16, %s9731_s19 }
0x11b3   :  { %v7485_v23 = vpop.permute.xlu0 %7484 }
0x11b4   :  { %v7487_v0 = vsub.f32 %v7481_v26, %v7485_v23 }
0x11b6   :  { %v7489_v19 = vadd.f32 1e-05, %v7487_v0 }
0x11b8   :  { %9461 = vrsqrt.f32 %v7489_v19 }
0x11c5   :  { %v9462_v38 = vpop.eup %9461 }
0x11c6   :  { %v7498_v22 = vrot.slane %v9462_v38, %v11818_v54 }
0x11c8   :  { %v7505_v1 = vrot.slane %v7498_v22, %v11818_v54 }
0x11ca   :  { %7506 = vrot.lane.b32.xlu0 %v7505_v1, %s9731_s19 }
0x123c   :  { %v7507_v30 = vpop.permute.xlu0 %7506 }
0x123d   :  { %v7509_v20 = vmul.f32 %v7507_v30, %v7488_v17 }
0x123f   :  { %v7511_v15 = vmul.f32 %v7509_v20, %v7481_v26 }
0x1241   :  { %v7512_v42 = vsub.f32 %v7510_v14, %v7511_v15 }
0x1243   :  { %v7517_v12 = vrot.slane %v7512_v42, %v11825_v53 }
0x1245   :  { %v7519_v13 = vsel %vm4242_vm2, %v7509_v20, %v7517_v12 }
0x1246   :  { %8464 = vmatmul.mubr.msk.f32.vlgmr.msra.gmra.mxu1 %vm2648_vm0, %v7519_v13  ;;  %vm7715_vm0 = vcmask 1041408  }
0x1306   :  { %v7605_v18 = vpop.f32.mrf.mxu1 }
0x1307   :  { %v7613_v50 = vrot.slane %v7605_v18, %v11825_v53  ;;  %v7623_v11 = vrot.slane %v7605_v18, %v11833_v7 }
0x1308   :  { %v7607_v10 = vpop.f32.mrf.mxu1 }
0x1309   :  { %v7618_v54 = vmul.f32 %v7613_v50, %v12410_v25  ;;  %v7617_v47 = vrot.slane %v7607_v10, %v11825_v53  ;;  %v7627_v48 = vrot.slane %v7607_v10, %v11833_v7 }
0x130b   :  { %v7628_v29 = vadd.f32 %v7623_v11, %v7618_v54  ;;  %v7619_v6 = vmul.f32 %v7617_v47, %v12412_v62 }
0x130d   :  { %vm7630_vm3 = vcmp.ge.f32.partialorder %v7628_v29, 0.0  ;;  %v7632_v8 = vmul.f32 0.2, %v7628_v29  ;;  %v7629_v24 = vadd.f32 %v7627_v48, %v7619_v6 }
0x130f   :  { %vm7631_vm2 = vcmp.ge.f32.partialorder %v7629_v24, 0.0  ;;  %v7633_v34 = vmul.f32 0.2, %v7629_v24  ;;  %v7634_v36 = vsel %vm7630_vm3, %v7628_v29, %v7632_v8 }
0x1310   :  { %v7638_v25 = vmul.f32 %v7636_v9, %v7634_v36 }
0x1311   :  { %v7635_v45 = vsel %vm7631_vm2, %v7629_v24, %v7633_v34 }
0x1312   :  { %v7639_v31 = vmul.f32 %v7637_v44, %v7635_v45 }
0x1314   :  { %7674 = vmatprep.subr.mxu0 %v7639_v31 }
0x1315   :  { %7675 = vmatpush1.msra.mxu0 %v7638_v25 }
0x1316   :  { %8465 = vmatmul.mubr.msk.f32.vlgmr.msra.gmra.mxu0 %vm7132_vm1, %v7640_v60 }
0x13d6   :  { %v7710_v53 = vpop.f32.mrf.mxu0 }
0x13d7   :  { %v7716_v7 = vsel %vm7715_vm0, %v7710_v53, 0.0 }
0x13d8   :  { %v7712_v62 = vpop.f32.mrf.mxu0 }
0x13d9   :  { %v7717_v21 = vsel %vm7715_vm0, %v7712_v62, 0.0 }
0x13da   :  { %v7718_v37 = vadd.f32 %v7717_v21, %v7716_v7 }
0x13dc   :  { %7719 = vadd.xlane.f32.xlu1 %v7718_v37 }
0x1465   :  { %v7720_v56 = vpop.xlane.xlu1 %7719 }
0x1466   :  { %v7721_v40 = vsub.f32 0.0, %v7720_v56 }
0x1468   :  { %v7722_v43 = vmul.f32 1.442695, %v7721_v40 }
0x146a   :  { %9463 = vpow2.f32 %v7722_v43 }
0x1477   :  { %v9464_v63 = vpop.eup %9463 }
0x1478   :  { %v7724_v28 = vadd.f32 1.0, %v9464_v63 }
0x147a   :  { %9465 = vrcp.f32 %v7724_v28 }
0x1487   :  { %v9466_v55 = vpop.eup %9465 }
0x1488   :  { %7728 = vst.msk [vmem:[%s12467_s23] sm:$0x3] %vm7727_vm4, %v9466_v55 }
0x1489   :  { %7733 = vsyncpa [#allocation7], 1 }
0x148a   :  { %7734 = vsyncpa [#allocation9], 1 }
0x148b   :  { %7735 = vsyncpa [#allocation12], 1 }
0x148c   :  { %7736 = vsyncpa [#allocation15], 1 }
0x148d   :  { %7737 = vsyncpa [#allocation18], 1 }
0x148e   :  { %7738 = vsyncpa [#allocation21], 1 }
0x148f   :  { %7739 = vsyncmov [#allocation5] }
0x1492   :  { %s7740_s16 = vpop.sfrf %7739 }
0x1493   :  { %p8466_p4 = scmp.ne.s32.totalorder %s7740_s16, 0 }
0x1495   :  { %7744 = shalt.err (%p8466_p4)  }
0x1496   :  { %7746 = vsyncmov [#allocation5 + $0x1] }
0x1499   :  { %s7747_s8 = vpop.sfrf %7746 }
0x149a   :  { %p8467_p5 = scmp.ne.s32.totalorder %s7747_s8, 0 }
0x149c   :  { %7751 = shalt.err (%p8467_p5)  }

</bundles_post_ra>
